<compile_context>
chip_gen: v6e
topology: v6e:2x2x1
jax: 0.10.0
libtpu: 0.0.40
codegen_flags: <defaults>
</compile_context>

<pallas_src>
import functools

import jax
import jax.numpy as jnp
from jax.experimental import pallas as pl
from jax.experimental.pallas import tpu as pltpu

_EPS = 1e-5  # PyTorch InstanceNorm2d default (affine=False, biased variance)


def _res_block_kernel(x_ref, w1_ref, w2_ref, o_ref, pad_ref, col_ref, *, H, W, C):
    """Fused residual block for one batch element.

    x_ref:   (1, H, W, C)  channels-last input (also used as the residual)
    w*_ref:  (9*C, C)      conv weights, row index = (3*dy + dx)*C + c_in
    o_ref:   (1, H, W, C)  output
    pad_ref: VMEM scratch (H+2, W+2, C)  reflection-padded image
    col_ref: VMEM scratch (H*W, 9*C)     im2col slab (taps packed into K)
    """
    hw = H * W
    inv_hw = 1.0 / float(hw)
    op_dtype = pad_ref.dtype

    def conv3x3_instnorm(img, w_ref, relu):
        # ---- reflection pad(1) entirely inside VMEM ----
        pad_ref[1:H + 1, 1:W + 1, :] = img
        pad_ref[0:1, 1:W + 1, :] = img[1:2, :, :]                   # top row
        pad_ref[H + 1:H + 2, 1:W + 1, :] = img[H - 2:H - 1, :, :]   # bottom row
        pad_ref[:, 0:1, :] = pad_ref[:, 2:3, :]                     # left col
        pad_ref[:, W + 1:W + 2, :] = pad_ref[:, W - 1:W, :]         # right col

        # ---- im2col slab: 9 static ref-slice loads, taps packed into K ----
        for dy in range(3):
            for dx in range(3):
                k = 3 * dy + dx
                patch = pad_ref[dy:dy + H, dx:dx + W, :]            # (H, W, C)
                col_ref[:, k * C:(k + 1) * C] = patch.reshape(hw, C)

        # ---- 3x3 conv as ONE (HW, 9C) x (9C, C) MXU matmul ----
        acc = jnp.dot(col_ref[...], w_ref[...],
                      preferred_element_type=jnp.float32)           # (HW, C) f32

        # ---- InstanceNorm (affine=False), single reduction pass ----
        s = jnp.sum(acc, axis=0, keepdims=True)
        ss = jnp.sum(acc * acc, axis=0, keepdims=True)
        mean = s * inv_hw
        var = jnp.maximum(ss * inv_hw - mean * mean, 0.0)           # clamp >= 0
        y = (acc - mean) * jax.lax.rsqrt(var + _EPS)
        if relu:
            y = jnp.maximum(y, 0.0)
        return y                                                    # (HW, C) f32

    x = x_ref[0]                                                    # (H, W, C)
    y1 = conv3x3_instnorm(x.astype(op_dtype), w1_ref, relu=True)
    y2 = conv3x3_instnorm(y1.astype(op_dtype).reshape(H, W, C), w2_ref,
                          relu=False)
    o_ref[0] = (x.astype(jnp.float32) + y2.reshape(H, W, C)).astype(o_ref.dtype)


def _torch_conv_w_to_colmat(w_oihw, dtype):
    """(Cout, Cin, 3, 3) -> (9*Cin, Cout), row index = (3*dy + dx)*Cin + c_in."""
    cout, cin, kh, kw = w_oihw.shape
    return (jnp.transpose(w_oihw, (2, 3, 1, 0))
            .reshape(kh * kw * cin, cout).astype(dtype))


def res_block_apply(x_nchw, w1, b1, w2, b2, *, conv_operand_dtype=None):
    # b1/b2 intentionally unused: a per-channel constant bias feeding
    # InstanceNorm2d(affine=False, track_running_stats=False) cancels exactly
    # (mean removes it, variance unchanged), so the bias add is skipped.
    del b1, b2
    n, c, h, w = x_nchw.shape
    assert h >= 2 and w >= 2, "ReflectionPad2d(1) requires H >= 2 and W >= 2"

    # MXU operand dtype; pass jnp.bfloat16 for production f32 inputs (2-3x MXU
    # throughput, half the scratch VMEM) if ~1e-2 relative error is acceptable.
    op_dtype = jnp.dtype(conv_operand_dtype or x_nchw.dtype)

    x = jnp.transpose(x_nchw, (0, 2, 3, 1))                     # NHWC
    w1m = _torch_conv_w_to_colmat(w1, op_dtype)                 # (9C, C)
    w2m = _torch_conv_w_to_colmat(w2, op_dtype)

    kernel = functools.partial(_res_block_kernel, H=h, W=w, C=c)

    # Explicit VMEM budget (blocks + scratch + double-buffer / compiler margin).
    isz = x.dtype.itemsize
    osz = op_dtype.itemsize
    est = (4 * h * w * c * isz                     # in + out blocks, double-buffered
           + 4 * 9 * c * c * osz                   # both weight mats, double-buffered
           + (h + 2) * (w + 2) * c * osz           # padded-image scratch
           + h * w * 9 * c * osz)                  # im2col scratch
    vmem_limit = int(min(100 * 2**20, max(16 * 2**20, 4 * est)))

    flops = 4 * n * h * w * 9 * c * c              # 2 stages * 2*HW*(9C)*C
    bytes_accessed = 2 * x.size * isz + (w1m.size + w2m.size) * osz

    out = pl.pallas_call(
        kernel,
        out_shape=jax.ShapeDtypeStruct((n, h, w, c), x.dtype),
        grid=(n,),
        in_specs=[
            pl.BlockSpec((1, h, w, c), lambda i: (i, 0, 0, 0)),
            pl.BlockSpec((9 * c, c), lambda i: (0, 0)),
            pl.BlockSpec((9 * c, c), lambda i: (0, 0)),
        ],
        out_specs=pl.BlockSpec((1, h, w, c), lambda i: (i, 0, 0, 0)),
        scratch_shapes=[
            pltpu.VMEM((h + 2, w + 2, c), op_dtype),            # padded image
            pltpu.VMEM((h * w, 9 * c), op_dtype),               # im2col slab
        ],
        compiler_params=pltpu.CompilerParams(
            dimension_semantics=("parallel",),
            vmem_limit_bytes=vmem_limit),
        cost_estimate=pl.CostEstimate(
            flops=flops, transcendentals=2 * n * c,
            bytes_accessed=bytes_accessed),
    )(x, w1m, w2m)

    return jnp.transpose(out, (0, 3, 1, 2))                     # back to NCHW


# ---------------- pure-JAX reference (for correctness check) ----------------
def _ref_instance_norm(y):
    mean = jnp.mean(y, axis=(2, 3), keepdims=True)
    var = jnp.mean((y - mean) ** 2, axis=(2, 3), keepdims=True)
    return (y - mean) * jax.lax.rsqrt(var + _EPS)


def _ref_conv3x3_reflect(x_nchw, w, b):
    xp = jnp.pad(x_nchw, ((0, 0), (0, 0), (1, 1), (1, 1)), mode="reflect")
    y = jax.lax.conv_general_dilated(
        xp, w, window_strides=(1, 1), padding="VALID",
        dimension_numbers=("NCHW", "OIHW", "NCHW"))
    return y + b.reshape(1, -1, 1, 1)


def res_block_ref(x, w1, b1, w2, b2):
    y = jax.nn.relu(_ref_instance_norm(_ref_conv3x3_reflect(x, w1, b1)))
    y = _ref_instance_norm(_ref_conv3x3_reflect(y, w2, b2))
    return x + y


if __name__ == "__main__":
    key = jax.random.PRNGKey(0)
    kx, k1, k2, k3, k4 = jax.random.split(key, 5)

    N, C, H, W = 2, 4, 16, 16  # in_features = 4
    x = jax.random.normal(kx, (N, C, H, W), dtype=jnp.float32)

    # Deterministic synthetic parameters (Conv2d(C, C, 3) with bias), twice.
    w1 = jax.random.normal(k1, (C, C, 3, 3), dtype=jnp.float32) * 0.1
    b1 = jax.random.normal(k2, (C,), dtype=jnp.float32) * 0.1
    w2 = jax.random.normal(k3, (C, C, 3, 3), dtype=jnp.float32) * 0.1
    b2 = jax.random.normal(k4, (C,), dtype=jnp.float32) * 0.1

    out = jax.block_until_ready(res_block_apply(x, w1, b1, w2, b2))
    ref = jax.block_until_ready(res_block_ref(x, w1, b1, w2, b2))

    assert out.shape == (N, C, H, W)
    assert jnp.allclose(out, ref, rtol=1e-3, atol=1e-3), "mismatch vs reference"
    print("KERNEL_OK")
</pallas_src>

<mosaic_0001>
module attributes {stable_mosaic.version = 11 : i64} {
  func.func @_res_block_kernel(%arg0: i32, %arg1: memref<1x16x16x4xf32, #tpu.memory_space<vmem>>, %arg2: memref<36x4xf32, #tpu.memory_space<vmem>>, %arg3: memref<36x4xf32, #tpu.memory_space<vmem>>, %arg4: memref<1x16x16x4xf32, #tpu.memory_space<vmem>>, %arg5: memref<18x18x4xf32, #tpu.memory_space<vmem>>, %arg6: memref<256x36xf32, #tpu.memory_space<vmem>>) attributes {dimension_semantics = [#tpu.dimension_semantics<parallel>], iteration_bounds = array<i64: 2>, scalar_prefetch = 0 : i64, scratch_operands = 2 : i64, tpu.core_type = #tpu.core_type<tc>, window_params = [{transform_indices = @transform_0, window_bounds = array<i64: 1, 16, 16, 4>}, {pipeline_mode = #tpu.pipeline_mode<synchronous>, transform_indices = @transform_1, window_bounds = array<i64: 36, 4>}, {pipeline_mode = #tpu.pipeline_mode<synchronous>, transform_indices = @transform_2, window_bounds = array<i64: 36, 4>}, {transform_indices = @transform_3, window_bounds = array<i64: 1, 16, 16, 4>}]} {
    %c0 = arith.constant 0 : index
    %c0_0 = arith.constant 0 : index
    %c0_1 = arith.constant 0 : index
    %c0_2 = arith.constant 0 : index
    %0 = vector.load %arg1[%c0, %c0_0, %c0_1, %c0_2] : memref<1x16x16x4xf32, #tpu.memory_space<vmem>>, vector<1x16x16x4xf32>
    %1 = vector.shape_cast %0 : vector<1x16x16x4xf32> to vector<16x16x4xf32>
    %c1 = arith.constant 1 : index
    %c1_3 = arith.constant 1 : index
    %c0_4 = arith.constant 0 : index
    %2 = vector.load %arg5[%c1, %c1_3, %c0_4] : memref<18x18x4xf32, #tpu.memory_space<vmem>>, vector<16x16x4xf32>
    tpu.vector_store %arg5[%c1, %c1_3, %c0_4], %1 {strides = array<i32>} : memref<18x18x4xf32, #tpu.memory_space<vmem>>, vector<16x16x4xf32>,
    %3 = vector.extract_strided_slice %1 {offsets = [1, 0, 0], sizes = [1, 16, 4], strides = [1, 1, 1]} : vector<16x16x4xf32> to vector<1x16x4xf32>
    %c0_5 = arith.constant 0 : index
    %c1_6 = arith.constant 1 : index
    %c0_7 = arith.constant 0 : index
    %4 = vector.load %arg5[%c0_5, %c1_6, %c0_7] : memref<18x18x4xf32, #tpu.memory_space<vmem>>, vector<1x16x4xf32>
    tpu.vector_store %arg5[%c0_5, %c1_6, %c0_7], %3 {strides = array<i32>} : memref<18x18x4xf32, #tpu.memory_space<vmem>>, vector<1x16x4xf32>,
    %5 = vector.extract_strided_slice %1 {offsets = [14, 0, 0], sizes = [1, 16, 4], strides = [1, 1, 1]} : vector<16x16x4xf32> to vector<1x16x4xf32>
    %c17 = arith.constant 17 : index
    %c1_8 = arith.constant 1 : index
    %c0_9 = arith.constant 0 : index
    %6 = vector.load %arg5[%c17, %c1_8, %c0_9] : memref<18x18x4xf32, #tpu.memory_space<vmem>>, vector<1x16x4xf32>
    tpu.vector_store %arg5[%c17, %c1_8, %c0_9], %5 {strides = array<i32>} : memref<18x18x4xf32, #tpu.memory_space<vmem>>, vector<1x16x4xf32>,
    %c0_10 = arith.constant 0 : index
    %c2 = arith.constant 2 : index
    %c0_11 = arith.constant 0 : index
    %7 = vector.load %arg5[%c0_10, %c2, %c0_11] : memref<18x18x4xf32, #tpu.memory_space<vmem>>, vector<18x1x4xf32>
    %c0_12 = arith.constant 0 : index
    %c0_13 = arith.constant 0 : index
    %c0_14 = arith.constant 0 : index
    %8 = vector.load %arg5[%c0_12, %c0_13, %c0_14] : memref<18x18x4xf32, #tpu.memory_space<vmem>>, vector<18x1x4xf32>
    tpu.vector_store %arg5[%c0_12, %c0_13, %c0_14], %7 {strides = array<i32>} : memref<18x18x4xf32, #tpu.memory_space<vmem>>, vector<18x1x4xf32>,
    %c0_15 = arith.constant 0 : index
    %c15 = arith.constant 15 : index
    %c0_16 = arith.constant 0 : index
    %9 = vector.load %arg5[%c0_15, %c15, %c0_16] : memref<18x18x4xf32, #tpu.memory_space<vmem>>, vector<18x1x4xf32>
    %c0_17 = arith.constant 0 : index
    %c17_18 = arith.constant 17 : index
    %c0_19 = arith.constant 0 : index
    %10 = vector.load %arg5[%c0_17, %c17_18, %c0_19] : memref<18x18x4xf32, #tpu.memory_space<vmem>>, vector<18x1x4xf32>
    tpu.vector_store %arg5[%c0_17, %c17_18, %c0_19], %9 {strides = array<i32>} : memref<18x18x4xf32, #tpu.memory_space<vmem>>, vector<18x1x4xf32>,
    %c0_20 = arith.constant 0 : index
    %c0_21 = arith.constant 0 : index
    %c0_22 = arith.constant 0 : index
    %11 = vector.load %arg5[%c0_20, %c0_21, %c0_22] : memref<18x18x4xf32, #tpu.memory_space<vmem>>, vector<16x16x4xf32>
    %12 = vector.shape_cast %11 : vector<16x16x4xf32> to vector<256x4xf32>
    %c0_23 = arith.constant 0 : index
    %c0_24 = arith.constant 0 : index
    %13 = vector.load %arg6[%c0_23, %c0_24] : memref<256x36xf32, #tpu.memory_space<vmem>>, vector<256x4xf32>
    tpu.vector_store %arg6[%c0_23, %c0_24], %12 {strides = array<i32>} : memref<256x36xf32, #tpu.memory_space<vmem>>, vector<256x4xf32>,
    %c0_25 = arith.constant 0 : index
    %c1_26 = arith.constant 1 : index
    %c0_27 = arith.constant 0 : index
    %14 = vector.load %arg5[%c0_25, %c1_26, %c0_27] : memref<18x18x4xf32, #tpu.memory_space<vmem>>, vector<16x16x4xf32>
    %15 = vector.shape_cast %14 : vector<16x16x4xf32> to vector<256x4xf32>
    %c0_28 = arith.constant 0 : index
    %c4 = arith.constant 4 : index
    %16 = vector.load %arg6[%c0_28, %c4] : memref<256x36xf32, #tpu.memory_space<vmem>>, vector<256x4xf32>
    tpu.vector_store %arg6[%c0_28, %c4], %15 {strides = array<i32>} : memref<256x36xf32, #tpu.memory_space<vmem>>, vector<256x4xf32>,
    %c0_29 = arith.constant 0 : index
    %c2_30 = arith.constant 2 : index
    %c0_31 = arith.constant 0 : index
    %17 = vector.load %arg5[%c0_29, %c2_30, %c0_31] : memref<18x18x4xf32, #tpu.memory_space<vmem>>, vector<16x16x4xf32>
    %18 = vector.shape_cast %17 : vector<16x16x4xf32> to vector<256x4xf32>
    %c0_32 = arith.constant 0 : index
    %c8 = arith.constant 8 : index
    %19 = vector.load %arg6[%c0_32, %c8] : memref<256x36xf32, #tpu.memory_space<vmem>>, vector<256x4xf32>
    tpu.vector_store %arg6[%c0_32, %c8], %18 {strides = array<i32>} : memref<256x36xf32, #tpu.memory_space<vmem>>, vector<256x4xf32>,
    %c1_33 = arith.constant 1 : index
    %c0_34 = arith.constant 0 : index
    %c0_35 = arith.constant 0 : index
    %20 = vector.load %arg5[%c1_33, %c0_34, %c0_35] : memref<18x18x4xf32, #tpu.memory_space<vmem>>, vector<16x16x4xf32>
    %21 = vector.shape_cast %20 : vector<16x16x4xf32> to vector<256x4xf32>
    %c0_36 = arith.constant 0 : index
    %c12 = arith.constant 12 : index
    %22 = vector.load %arg6[%c0_36, %c12] : memref<256x36xf32, #tpu.memory_space<vmem>>, vector<256x4xf32>
    tpu.vector_store %arg6[%c0_36, %c12], %21 {strides = array<i32>} : memref<256x36xf32, #tpu.memory_space<vmem>>, vector<256x4xf32>,
    %c1_37 = arith.constant 1 : index
    %c1_38 = arith.constant 1 : index
    %c0_39 = arith.constant 0 : index
    %23 = vector.load %arg5[%c1_37, %c1_38, %c0_39] : memref<18x18x4xf32, #tpu.memory_space<vmem>>, vector<16x16x4xf32>
    %24 = vector.shape_cast %23 : vector<16x16x4xf32> to vector<256x4xf32>
    %c0_40 = arith.constant 0 : index
    %c16 = arith.constant 16 : index
    %25 = vector.load %arg6[%c0_40, %c16] : memref<256x36xf32, #tpu.memory_space<vmem>>, vector<256x4xf32>
    tpu.vector_store %arg6[%c0_40, %c16], %24 {strides = array<i32>} : memref<256x36xf32, #tpu.memory_space<vmem>>, vector<256x4xf32>,
    %c1_41 = arith.constant 1 : index
    %c2_42 = arith.constant 2 : index
    %c0_43 = arith.constant 0 : index
    %26 = vector.load %arg5[%c1_41, %c2_42, %c0_43] : memref<18x18x4xf32, #tpu.memory_space<vmem>>, vector<16x16x4xf32>
    %27 = vector.shape_cast %26 : vector<16x16x4xf32> to vector<256x4xf32>
    %c0_44 = arith.constant 0 : index
    %c20 = arith.constant 20 : index
    %28 = vector.load %arg6[%c0_44, %c20] : memref<256x36xf32, #tpu.memory_space<vmem>>, vector<256x4xf32>
    tpu.vector_store %arg6[%c0_44, %c20], %27 {strides = array<i32>} : memref<256x36xf32, #tpu.memory_space<vmem>>, vector<256x4xf32>,
    %c2_45 = arith.constant 2 : index
    %c0_46 = arith.constant 0 : index
    %c0_47 = arith.constant 0 : index
    %29 = vector.load %arg5[%c2_45, %c0_46, %c0_47] : memref<18x18x4xf32, #tpu.memory_space<vmem>>, vector<16x16x4xf32>
    %30 = vector.shape_cast %29 : vector<16x16x4xf32> to vector<256x4xf32>
    %c0_48 = arith.constant 0 : index
    %c24 = arith.constant 24 : index
    %31 = vector.load %arg6[%c0_48, %c24] : memref<256x36xf32, #tpu.memory_space<vmem>>, vector<256x4xf32>
    tpu.vector_store %arg6[%c0_48, %c24], %30 {strides = array<i32>} : memref<256x36xf32, #tpu.memory_space<vmem>>, vector<256x4xf32>,
    %c2_49 = arith.constant 2 : index
    %c1_50 = arith.constant 1 : index
    %c0_51 = arith.constant 0 : index
    %32 = vector.load %arg5[%c2_49, %c1_50, %c0_51] : memref<18x18x4xf32, #tpu.memory_space<vmem>>, vector<16x16x4xf32>
    %33 = vector.shape_cast %32 : vector<16x16x4xf32> to vector<256x4xf32>
    %c0_52 = arith.constant 0 : index
    %c28 = arith.constant 28 : index
    %34 = vector.load %arg6[%c0_52, %c28] : memref<256x36xf32, #tpu.memory_space<vmem>>, vector<256x4xf32>
    tpu.vector_store %arg6[%c0_52, %c28], %33 {strides = array<i32>} : memref<256x36xf32, #tpu.memory_space<vmem>>, vector<256x4xf32>,
    %c2_53 = arith.constant 2 : index
    %c2_54 = arith.constant 2 : index
    %c0_55 = arith.constant 0 : index
    %35 = vector.load %arg5[%c2_53, %c2_54, %c0_55] : memref<18x18x4xf32, #tpu.memory_space<vmem>>, vector<16x16x4xf32>
    %36 = vector.shape_cast %35 : vector<16x16x4xf32> to vector<256x4xf32>
    %c0_56 = arith.constant 0 : index
    %c32 = arith.constant 32 : index
    %37 = vector.load %arg6[%c0_56, %c32] : memref<256x36xf32, #tpu.memory_space<vmem>>, vector<256x4xf32>
    tpu.vector_store %arg6[%c0_56, %c32], %36 {strides = array<i32>} : memref<256x36xf32, #tpu.memory_space<vmem>>, vector<256x4xf32>,
    %c0_57 = arith.constant 0 : index
    %c0_58 = arith.constant 0 : index
    %38 = vector.load %arg6[%c0_57, %c0_58] : memref<256x36xf32, #tpu.memory_space<vmem>>, vector<256x36xf32>
    %c0_59 = arith.constant 0 : index
    %c0_60 = arith.constant 0 : index
    %39 = vector.load %arg2[%c0_59, %c0_60] : memref<36x4xf32, #tpu.memory_space<vmem>>, vector<36x4xf32>
    %cst = arith.constant dense<0.000000e+00> : vector<256x4xf32>
    %40 = tpu.matmul %38, %39, %cst {dimension_numbers = #tpu.dot_dimension_numbers<[1], [0], [0], [1], [0, 0, 1, 1], [], []>} : vector<256x36xf32>, vector<36x4xf32>, vector<256x4xf32> -> vector<256x4xf32>
    %cst_61 = arith.constant dense<0.000000e+00> : vector<4xf32>
    %41 = vector.multi_reduction <add>, %40, %cst_61 [0] : vector<256x4xf32> to vector<4xf32>
    %42 = vector.shape_cast %41 : vector<4xf32> to vector<1x4xf32>
    %43 = arith.mulf %40, %40 : vector<256x4xf32>
    %cst_62 = arith.constant dense<0.000000e+00> : vector<4xf32>
    %44 = vector.multi_reduction <add>, %43, %cst_62 [0] : vector<256x4xf32> to vector<4xf32>
    %45 = vector.shape_cast %44 : vector<4xf32> to vector<1x4xf32>
    %cst_63 = arith.constant 3.906250e-03 : f32
    %46 = vector.broadcast %cst_63 : f32 to vector<1x4xf32>
    %47 = arith.mulf %42, %46 : vector<1x4xf32>
    %cst_64 = arith.constant 3.906250e-03 : f32
    %48 = vector.broadcast %cst_64 : f32 to vector<1x4xf32>
    %49 = arith.mulf %45, %48 : vector<1x4xf32>
    %50 = arith.mulf %47, %47 : vector<1x4xf32>
    %51 = arith.subf %49, %50 : vector<1x4xf32>
    %cst_65 = arith.constant 0.000000e+00 : f32
    %52 = vector.broadcast %cst_65 : f32 to vector<1x4xf32>
    %53 = arith.maximumf %51, %52 : vector<1x4xf32>
    %54 = vector.broadcast %47 : vector<1x4xf32> to vector<256x4xf32>
    %55 = arith.subf %40, %54 : vector<256x4xf32>
    %cst_66 = arith.constant 9.99999974E-6 : f32
    %56 = vector.broadcast %cst_66 : f32 to vector<1x4xf32>
    %57 = arith.addf %53, %56 : vector<1x4xf32>
    %58 = math.rsqrt %57 : vector<1x4xf32>
    %59 = vector.broadcast %58 : vector<1x4xf32> to vector<256x4xf32>
    %60 = arith.mulf %55, %59 : vector<256x4xf32>
    %cst_67 = arith.constant 0.000000e+00 : f32
    %61 = vector.broadcast %cst_67 : f32 to vector<256x4xf32>
    %62 = arith.maximumf %60, %61 : vector<256x4xf32>
    %63 = vector.shape_cast %62 : vector<256x4xf32> to vector<16x16x4xf32>
    %c1_68 = arith.constant 1 : index
    %c1_69 = arith.constant 1 : index
    %c0_70 = arith.constant 0 : index
    %64 = vector.load %arg5[%c1_68, %c1_69, %c0_70] : memref<18x18x4xf32, #tpu.memory_space<vmem>>, vector<16x16x4xf32>
    tpu.vector_store %arg5[%c1_68, %c1_69, %c0_70], %63 {strides = array<i32>} : memref<18x18x4xf32, #tpu.memory_space<vmem>>, vector<16x16x4xf32>,
    %65 = vector.extract_strided_slice %63 {offsets = [1, 0, 0], sizes = [1, 16, 4], strides = [1, 1, 1]} : vector<16x16x4xf32> to vector<1x16x4xf32>
    %c0_71 = arith.constant 0 : index
    %c1_72 = arith.constant 1 : index
    %c0_73 = arith.constant 0 : index
    %66 = vector.load %arg5[%c0_71, %c1_72, %c0_73] : memref<18x18x4xf32, #tpu.memory_space<vmem>>, vector<1x16x4xf32>
    tpu.vector_store %arg5[%c0_71, %c1_72, %c0_73], %65 {strides = array<i32>} : memref<18x18x4xf32, #tpu.memory_space<vmem>>, vector<1x16x4xf32>,
    %67 = vector.extract_strided_slice %63 {offsets = [14, 0, 0], sizes = [1, 16, 4], strides = [1, 1, 1]} : vector<16x16x4xf32> to vector<1x16x4xf32>
    %c17_74 = arith.constant 17 : index
    %c1_75 = arith.constant 1 : index
    %c0_76 = arith.constant 0 : index
    %68 = vector.load %arg5[%c17_74, %c1_75, %c0_76] : memref<18x18x4xf32, #tpu.memory_space<vmem>>, vector<1x16x4xf32>
    tpu.vector_store %arg5[%c17_74, %c1_75, %c0_76], %67 {strides = array<i32>} : memref<18x18x4xf32, #tpu.memory_space<vmem>>, vector<1x16x4xf32>,
    %c0_77 = arith.constant 0 : index
    %c2_78 = arith.constant 2 : index
    %c0_79 = arith.constant 0 : index
    %69 = vector.load %arg5[%c0_77, %c2_78, %c0_79] : memref<18x18x4xf32, #tpu.memory_space<vmem>>, vector<18x1x4xf32>
    %c0_80 = arith.constant 0 : index
    %c0_81 = arith.constant 0 : index
    %c0_82 = arith.constant 0 : index
    %70 = vector.load %arg5[%c0_80, %c0_81, %c0_82] : memref<18x18x4xf32, #tpu.memory_space<vmem>>, vector<18x1x4xf32>
    tpu.vector_store %arg5[%c0_80, %c0_81, %c0_82], %69 {strides = array<i32>} : memref<18x18x4xf32, #tpu.memory_space<vmem>>, vector<18x1x4xf32>,
    %c0_83 = arith.constant 0 : index
    %c15_84 = arith.constant 15 : index
    %c0_85 = arith.constant 0 : index
    %71 = vector.load %arg5[%c0_83, %c15_84, %c0_85] : memref<18x18x4xf32, #tpu.memory_space<vmem>>, vector<18x1x4xf32>
    %c0_86 = arith.constant 0 : index
    %c17_87 = arith.constant 17 : index
    %c0_88 = arith.constant 0 : index
    %72 = vector.load %arg5[%c0_86, %c17_87, %c0_88] : memref<18x18x4xf32, #tpu.memory_space<vmem>>, vector<18x1x4xf32>
    tpu.vector_store %arg5[%c0_86, %c17_87, %c0_88], %71 {strides = array<i32>} : memref<18x18x4xf32, #tpu.memory_space<vmem>>, vector<18x1x4xf32>,
    %c0_89 = arith.constant 0 : index
    %c0_90 = arith.constant 0 : index
    %c0_91 = arith.constant 0 : index
    %73 = vector.load %arg5[%c0_89, %c0_90, %c0_91] : memref<18x18x4xf32, #tpu.memory_space<vmem>>, vector<16x16x4xf32>
    %74 = vector.shape_cast %73 : vector<16x16x4xf32> to vector<256x4xf32>
    %c0_92 = arith.constant 0 : index
    %c0_93 = arith.constant 0 : index
    %75 = vector.load %arg6[%c0_92, %c0_93] : memref<256x36xf32, #tpu.memory_space<vmem>>, vector<256x4xf32>
    tpu.vector_store %arg6[%c0_92, %c0_93], %74 {strides = array<i32>} : memref<256x36xf32, #tpu.memory_space<vmem>>, vector<256x4xf32>,
    %c0_94 = arith.constant 0 : index
    %c1_95 = arith.constant 1 : index
    %c0_96 = arith.constant 0 : index
    %76 = vector.load %arg5[%c0_94, %c1_95, %c0_96] : memref<18x18x4xf32, #tpu.memory_space<vmem>>, vector<16x16x4xf32>
    %77 = vector.shape_cast %76 : vector<16x16x4xf32> to vector<256x4xf32>
    %c0_97 = arith.constant 0 : index
    %c4_98 = arith.constant 4 : index
    %78 = vector.load %arg6[%c0_97, %c4_98] : memref<256x36xf32, #tpu.memory_space<vmem>>, vector<256x4xf32>
    tpu.vector_store %arg6[%c0_97, %c4_98], %77 {strides = array<i32>} : memref<256x36xf32, #tpu.memory_space<vmem>>, vector<256x4xf32>,
    %c0_99 = arith.constant 0 : index
    %c2_100 = arith.constant 2 : index
    %c0_101 = arith.constant 0 : index
    %79 = vector.load %arg5[%c0_99, %c2_100, %c0_101] : memref<18x18x4xf32, #tpu.memory_space<vmem>>, vector<16x16x4xf32>
    %80 = vector.shape_cast %79 : vector<16x16x4xf32> to vector<256x4xf32>
    %c0_102 = arith.constant 0 : index
    %c8_103 = arith.constant 8 : index
    %81 = vector.load %arg6[%c0_102, %c8_103] : memref<256x36xf32, #tpu.memory_space<vmem>>, vector<256x4xf32>
    tpu.vector_store %arg6[%c0_102, %c8_103], %80 {strides = array<i32>} : memref<256x36xf32, #tpu.memory_space<vmem>>, vector<256x4xf32>,
    %c1_104 = arith.constant 1 : index
    %c0_105 = arith.constant 0 : index
    %c0_106 = arith.constant 0 : index
    %82 = vector.load %arg5[%c1_104, %c0_105, %c0_106] : memref<18x18x4xf32, #tpu.memory_space<vmem>>, vector<16x16x4xf32>
    %83 = vector.shape_cast %82 : vector<16x16x4xf32> to vector<256x4xf32>
    %c0_107 = arith.constant 0 : index
    %c12_108 = arith.constant 12 : index
    %84 = vector.load %arg6[%c0_107, %c12_108] : memref<256x36xf32, #tpu.memory_space<vmem>>, vector<256x4xf32>
    tpu.vector_store %arg6[%c0_107, %c12_108], %83 {strides = array<i32>} : memref<256x36xf32, #tpu.memory_space<vmem>>, vector<256x4xf32>,
    %c1_109 = arith.constant 1 : index
    %c1_110 = arith.constant 1 : index
    %c0_111 = arith.constant 0 : index
    %85 = vector.load %arg5[%c1_109, %c1_110, %c0_111] : memref<18x18x4xf32, #tpu.memory_space<vmem>>, vector<16x16x4xf32>
    %86 = vector.shape_cast %85 : vector<16x16x4xf32> to vector<256x4xf32>
    %c0_112 = arith.constant 0 : index
    %c16_113 = arith.constant 16 : index
    %87 = vector.load %arg6[%c0_112, %c16_113] : memref<256x36xf32, #tpu.memory_space<vmem>>, vector<256x4xf32>
    tpu.vector_store %arg6[%c0_112, %c16_113], %86 {strides = array<i32>} : memref<256x36xf32, #tpu.memory_space<vmem>>, vector<256x4xf32>,
    %c1_114 = arith.constant 1 : index
    %c2_115 = arith.constant 2 : index
    %c0_116 = arith.constant 0 : index
    %88 = vector.load %arg5[%c1_114, %c2_115, %c0_116] : memref<18x18x4xf32, #tpu.memory_space<vmem>>, vector<16x16x4xf32>
    %89 = vector.shape_cast %88 : vector<16x16x4xf32> to vector<256x4xf32>
    %c0_117 = arith.constant 0 : index
    %c20_118 = arith.constant 20 : index
    %90 = vector.load %arg6[%c0_117, %c20_118] : memref<256x36xf32, #tpu.memory_space<vmem>>, vector<256x4xf32>
    tpu.vector_store %arg6[%c0_117, %c20_118], %89 {strides = array<i32>} : memref<256x36xf32, #tpu.memory_space<vmem>>, vector<256x4xf32>,
    %c2_119 = arith.constant 2 : index
    %c0_120 = arith.constant 0 : index
    %c0_121 = arith.constant 0 : index
    %91 = vector.load %arg5[%c2_119, %c0_120, %c0_121] : memref<18x18x4xf32, #tpu.memory_space<vmem>>, vector<16x16x4xf32>
    %92 = vector.shape_cast %91 : vector<16x16x4xf32> to vector<256x4xf32>
    %c0_122 = arith.constant 0 : index
    %c24_123 = arith.constant 24 : index
    %93 = vector.load %arg6[%c0_122, %c24_123] : memref<256x36xf32, #tpu.memory_space<vmem>>, vector<256x4xf32>
    tpu.vector_store %arg6[%c0_122, %c24_123], %92 {strides = array<i32>} : memref<256x36xf32, #tpu.memory_space<vmem>>, vector<256x4xf32>,
    %c2_124 = arith.constant 2 : index
    %c1_125 = arith.constant 1 : index
    %c0_126 = arith.constant 0 : index
    %94 = vector.load %arg5[%c2_124, %c1_125, %c0_126] : memref<18x18x4xf32, #tpu.memory_space<vmem>>, vector<16x16x4xf32>
    %95 = vector.shape_cast %94 : vector<16x16x4xf32> to vector<256x4xf32>
    %c0_127 = arith.constant 0 : index
    %c28_128 = arith.constant 28 : index
    %96 = vector.load %arg6[%c0_127, %c28_128] : memref<256x36xf32, #tpu.memory_space<vmem>>, vector<256x4xf32>
    tpu.vector_store %arg6[%c0_127, %c28_128], %95 {strides = array<i32>} : memref<256x36xf32, #tpu.memory_space<vmem>>, vector<256x4xf32>,
    %c2_129 = arith.constant 2 : index
    %c2_130 = arith.constant 2 : index
    %c0_131 = arith.constant 0 : index
    %97 = vector.load %arg5[%c2_129, %c2_130, %c0_131] : memref<18x18x4xf32, #tpu.memory_space<vmem>>, vector<16x16x4xf32>
    %98 = vector.shape_cast %97 : vector<16x16x4xf32> to vector<256x4xf32>
    %c0_132 = arith.constant 0 : index
    %c32_133 = arith.constant 32 : index
    %99 = vector.load %arg6[%c0_132, %c32_133] : memref<256x36xf32, #tpu.memory_space<vmem>>, vector<256x4xf32>
    tpu.vector_store %arg6[%c0_132, %c32_133], %98 {strides = array<i32>} : memref<256x36xf32, #tpu.memory_space<vmem>>, vector<256x4xf32>,
    %c0_134 = arith.constant 0 : index
    %c0_135 = arith.constant 0 : index
    %100 = vector.load %arg6[%c0_134, %c0_135] : memref<256x36xf32, #tpu.memory_space<vmem>>, vector<256x36xf32>
    %c0_136 = arith.constant 0 : index
    %c0_137 = arith.constant 0 : index
    %101 = vector.load %arg3[%c0_136, %c0_137] : memref<36x4xf32, #tpu.memory_space<vmem>>, vector<36x4xf32>
    %cst_138 = arith.constant dense<0.000000e+00> : vector<256x4xf32>
    %102 = tpu.matmul %100, %101, %cst_138 {dimension_numbers = #tpu.dot_dimension_numbers<[1], [0], [0], [1], [0, 0, 1, 1], [], []>} : vector<256x36xf32>, vector<36x4xf32>, vector<256x4xf32> -> vector<256x4xf32>
    %cst_139 = arith.constant dense<0.000000e+00> : vector<4xf32>
    %103 = vector.multi_reduction <add>, %102, %cst_139 [0] : vector<256x4xf32> to vector<4xf32>
    %104 = vector.shape_cast %103 : vector<4xf32> to vector<1x4xf32>
    %105 = arith.mulf %102, %102 : vector<256x4xf32>
    %cst_140 = arith.constant dense<0.000000e+00> : vector<4xf32>
    %106 = vector.multi_reduction <add>, %105, %cst_140 [0] : vector<256x4xf32> to vector<4xf32>
    %107 = vector.shape_cast %106 : vector<4xf32> to vector<1x4xf32>
    %cst_141 = arith.constant 3.906250e-03 : f32
    %108 = vector.broadcast %cst_141 : f32 to vector<1x4xf32>
    %109 = arith.mulf %104, %108 : vector<1x4xf32>
    %cst_142 = arith.constant 3.906250e-03 : f32
    %110 = vector.broadcast %cst_142 : f32 to vector<1x4xf32>
    %111 = arith.mulf %107, %110 : vector<1x4xf32>
    %112 = arith.mulf %109, %109 : vector<1x4xf32>
    %113 = arith.subf %111, %112 : vector<1x4xf32>
    %cst_143 = arith.constant 0.000000e+00 : f32
    %114 = vector.broadcast %cst_143 : f32 to vector<1x4xf32>
    %115 = arith.maximumf %113, %114 : vector<1x4xf32>
    %116 = vector.broadcast %109 : vector<1x4xf32> to vector<256x4xf32>
    %117 = arith.subf %102, %116 : vector<256x4xf32>
    %cst_144 = arith.constant 9.99999974E-6 : f32
    %118 = vector.broadcast %cst_144 : f32 to vector<1x4xf32>
    %119 = arith.addf %115, %118 : vector<1x4xf32>
    %120 = math.rsqrt %119 : vector<1x4xf32>
    %121 = vector.broadcast %120 : vector<1x4xf32> to vector<256x4xf32>
    %122 = arith.mulf %117, %121 : vector<256x4xf32>
    %123 = vector.shape_cast %122 : vector<256x4xf32> to vector<16x16x4xf32>
    %124 = arith.addf %1, %123 : vector<16x16x4xf32>
    %c0_145 = arith.constant 0 : index
    %c0_146 = arith.constant 0 : index
    %c0_147 = arith.constant 0 : index
    %c0_148 = arith.constant 0 : index
    %125 = vector.load %arg4[%c0_145, %c0_146, %c0_147, %c0_148] : memref<1x16x16x4xf32, #tpu.memory_space<vmem>>, vector<1x16x16x4xf32>
    %126 = vector.shape_cast %125 : vector<1x16x16x4xf32> to vector<16x16x4xf32>
    %127 = vector.shape_cast %124 : vector<16x16x4xf32> to vector<1x16x16x4xf32>
    tpu.vector_store %arg4[%c0_145, %c0_146, %c0_147, %c0_148], %127 {strides = array<i32>} : memref<1x16x16x4xf32, #tpu.memory_space<vmem>>, vector<1x16x16x4xf32>,
    return
  }
  func.func @transform_0(%arg0: i32) -> (i32, i32, i32, i32) {
    %c0_i32 = arith.constant 0 : i32
    %c0_i32_0 = arith.constant 0 : i32
    %c0_i32_1 = arith.constant 0 : i32
    %c0_i32_2 = arith.constant 0 : i32
    return %arg0, %c0_i32, %c0_i32_0, %c0_i32_1 : i32, i32, i32, i32
  }
  func.func @transform_1(%arg0: i32) -> (i32, i32) {
    %c0_i32 = arith.constant 0 : i32
    %c0_i32_0 = arith.constant 0 : i32
    %c0_i32_1 = arith.constant 0 : i32
    return %c0_i32, %c0_i32_0 : i32, i32
  }
  func.func @transform_2(%arg0: i32) -> (i32, i32) {
    %c0_i32 = arith.constant 0 : i32
    %c0_i32_0 = arith.constant 0 : i32
    %c0_i32_1 = arith.constant 0 : i32
    return %c0_i32, %c0_i32_0 : i32, i32
  }
  func.func @transform_3(%arg0: i32) -> (i32, i32, i32, i32) {
    %c0_i32 = arith.constant 0 : i32
    %c0_i32_0 = arith.constant 0 : i32
    %c0_i32_1 = arith.constant 0 : i32
    %c0_i32_2 = arith.constant 0 : i32
    return %arg0, %c0_i32, %c0_i32_0, %c0_i32_1 : i32, i32, i32, i32
  }
}

</mosaic_0001>

<bundles_post_ra>
// kernel: tpu_custom_call.1
= control target key start
LH: loop header
LB: loop body
LE: loop exit
PB: predicated region body
PF: predicated region fallthrough
CT: control target
= control target key end

     0   :  { %s5314_s12 = smov 0   ;;  %s8061_s0 = inlined_call_operand.vmem [shape: f32[2,16,16,4], index: 0, kind: input, shape index: {}]   ;;  %s8062_s1 = inlined_call_operand.vmem [shape: f32[36,4], index: 1, kind: input, shape index: {}]   ;;  %s8063_s2 = inlined_call_operand.vmem [shape: f32[36,4], index: 2, kind: input, shape index: {}]   ;;  %s8064_s3 = inlined_call_operand.vmem [shape: f32[2,16,16,4], index: 3, kind: output, shape index: {}]  }
   0x1 LB: > { %s4989_s13 = sadd.s32 4294967295, %s5284_s12   ;;  %p4993_p0 = scmp.ge.s32.totalorder %s5284_s12, 1  ;;  %s5284_s12 = sphi %s5314_s12, %s13_s12  }
   0x2   : > { %p137_p1 = scmp.lt.s32.totalorder %s5284_s12, 3 }
   0x4   : > { %p138_p2 = pnand %p4993_p0, %p137_p1 }
   0x6   : > { %141 = sbr.rel (%p138_p2) target bundleno = 1813 (0x715), region = 32 }
   0xb   : > { %p161_p3 = scmp.lt.s32.totalorder %s4989_s13, 1  ;;  %vm204_vm0 = vcmask 31744   ;;  %s5286_s18 = smov 4   ;;  %vm260_vm1 = vcmask 24576   ;;  %vm539_vm2 = vcmask 64544   ;;  %vm732_vm3 = vcmask 97344  }
   0xc   : > { %s5287_s19 = smov 8   ;;  %s5288_s20 = smov 12   ;;  %vm925_vm4 = vcmask 130144   ;;  %vm2058_vm5 = vcmask 1043456   ;;  %vm1118_vm6 = vcmask 162944   ;;  %vm1311_vm7 = vcmask 195744  }
   0xd   : > { %s8200_s13 = smov (!%p161_p3, %s4989_s13), 1  ;;  %s5289_s21 = smov 16   ;;  %vm1505_vm8 = vcmask 228544   ;;  %vm1698_vm9 = vcmask 261344   ;;  %vm1891_vm10 = vcmask 294144   ;;  %vm1961_vm11 = vcmask 293888  }
   0xe   : > { %s5066_s14 = sshll.u32 %s8200_s13, 8  ;;  %s5290_s22 = smov 20  }
   0xf   : > { %s5330_s17 = scalar_lea.vmem %s8061_s0, %s5066_s14  ;;  %s5291_s4 = smov 24  }
  0x10   : > { %v5333_v0 = vld [vmem:[%s5330_s17 + $0x10] sm:$0xff]  ;;  %v5336_v1 = vld [vmem:[%s5330_s17] sm:$0xff]  ;;  %v5339_v2 = vld [vmem:[%s5330_s17 + $0x18] sm:$0xff]  ;;  %s5292_s7 = smov 28   ;;  %s5293_s8 = smov 32  }
  0x11   : > { %8111 = vst [vmem:[#allocation4_spill] sm:$0xff] %v5333_v0  ;;  %8112 = vst [vmem:[#allocation5_spill] sm:$0xff] %v5336_v1  ;;  %v5352_v3 = vld [vmem:[%s5330_s17 + $0x8] sm:$0xff]  ;;  %v5355_v4 = vld [vmem:[%s5330_s17 + $0x20] sm:$0xff] }
  0x12   : > { %8113 = vst [vmem:[#allocation6_spill] sm:$0xff] %v5339_v2  ;;  %237 = vst.msk [vmem:[#allocation2 + $0x1] sm:$0xff] %vm204_vm0, %v5333_v0  ;;  %v5358_v5 = vld [vmem:[%s5330_s17 + $0x28] sm:$0xff]  ;;  %v5367_v6 = vld [vmem:[%s5330_s17 + $0x30] sm:$0xff] }
  0x13   : > { %207 = vst.msk [vmem:[#allocation2 + $0x31] sm:$0xff] %vm204_vm0, %v5333_v0  ;;  %205 = vst.msk [vmem:[#allocation2 + $0x19] sm:$0xff] %vm204_vm0, %v5336_v1  ;;  %v5370_v7 = vld [vmem:[%s5330_s17 + $0x38] sm:$0xff]  ;;  %v5373_v8 = vld [vmem:[%s5330_s17 + $0x40] sm:$0xff] }
  0x14   : > { %238 = vst.msk [vmem:[#allocation2 + $0x9] sm:$0xff] %vm204_vm0, %v5339_v2  ;;  %208 = vst.msk [vmem:[#allocation2 + $0x39] sm:$0xff] %vm204_vm0, %v5339_v2  ;;  %v5382_v9 = vld [vmem:[%s5330_s17 + $0x48] sm:$0xff]  ;;  %v5385_v10 = vld [vmem:[%s5330_s17 + $0x50] sm:$0xff] }
  0x15   : > { %8114 = vst [vmem:[#allocation7_spill] sm:$0xff] %v5352_v3  ;;  %8115 = vst [vmem:[#allocation8_spill] sm:$0xff] %v5355_v4  ;;  %v5388_v11 = vld [vmem:[%s5330_s17 + $0x58] sm:$0xff]  ;;  %v5397_v12 = vld [vmem:[%s5330_s17 + $0x60] sm:$0xff] }
  0x16   : > { %8116 = vst [vmem:[#allocation9_spill] sm:$0xff] %v5358_v5  ;;  %206 = vst.msk [vmem:[#allocation2 + $0x21] sm:$0xff] %vm204_vm0, %v5352_v3  ;;  %v5400_v13 = vld [vmem:[%s5330_s17 + $0x68] sm:$0xff]  ;;  %v5403_v14 = vld [vmem:[%s5330_s17 + $0x70] sm:$0xff] }
  0x17   : > { %209 = vst.msk [vmem:[#allocation2 + $0x49] sm:$0xff] %vm204_vm0, %v5355_v4  ;;  %210 = vst.msk [vmem:[#allocation2 + $0x51] sm:$0xff] %vm204_vm0, %v5358_v5  ;;  %v5412_v15 = vld [vmem:[%s5330_s17 + $0x78] sm:$0xff]  ;;  %v5415_v16 = vld [vmem:[%s5330_s17 + $0x80] sm:$0xff] }
  0x18   : > { %8117 = vst [vmem:[#allocation10_spill] sm:$0xff] %v5367_v6  ;;  %8118 = vst [vmem:[#allocation11_spill] sm:$0xff] %v5370_v7  ;;  %v5418_v17 = vld [vmem:[%s5330_s17 + $0x88] sm:$0xff]  ;;  %v5427_v18 = vld [vmem:[%s5330_s17 + $0x90] sm:$0xff] }
  0x19   : > { %8119 = vst [vmem:[#allocation12_spill] sm:$0xff] %v5373_v8  ;;  %211 = vst.msk [vmem:[#allocation2 + $0x61] sm:$0xff] %vm204_vm0, %v5367_v6  ;;  %v5430_v19 = vld [vmem:[%s5330_s17 + $0x98] sm:$0xff]  ;;  %v5433_v20 = vld [vmem:[%s5330_s17 + $0xa0] sm:$0xff] }
  0x1a   : > { %212 = vst.msk [vmem:[#allocation2 + $0x69] sm:$0xff] %vm204_vm0, %v5370_v7  ;;  %213 = vst.msk [vmem:[#allocation2 + $0x79] sm:$0xff] %vm204_vm0, %v5373_v8  ;;  %v5442_v21 = vld [vmem:[%s5330_s17 + $0xa8] sm:$0xff]  ;;  %v5445_v22 = vld [vmem:[%s5330_s17 + $0xb0] sm:$0xff] }
  0x1b   : > { %8120 = vst [vmem:[#allocation13_spill] sm:$0xff] %v5382_v9  ;;  %8121 = vst [vmem:[#allocation14_spill] sm:$0xff] %v5385_v10  ;;  %v5448_v23 = vld [vmem:[%s5330_s17 + $0xb8] sm:$0xff]  ;;  %v379_v24 = vld [vmem:[#allocation2 + $0x1] sm:$0xff] }
  0x1c   : > { %8122 = vst [vmem:[#allocation15_spill] sm:$0xff] %v5388_v11  ;;  %214 = vst.msk [vmem:[#allocation2 + $0x81] sm:$0xff] %vm204_vm0, %v5382_v9  ;;  %v5450_v25 = vld [vmem:[#allocation2 + $0x19] sm:$0xff]  ;;  %443 = vrot.lane.b32.xlu0 %v379_v24, %s5286_s18  ;;  %v380_v26 = vld [vmem:[#allocation2 + $0x9] sm:$0xff] }
  0x1d   : > { %215 = vst.msk [vmem:[#allocation2 + $0x91] sm:$0xff] %vm204_vm0, %v5385_v10  ;;  %216 = vst.msk [vmem:[#allocation2 + $0x99] sm:$0xff] %vm204_vm0, %v5388_v11  ;;  %447 = vrot.lane.b32.xlu1 %v5450_v25, %s5286_s18  ;;  %v5461_v27 = vld [vmem:[#allocation2 + $0x21] sm:$0xff]  ;;  %v5466_v28 = vld [vmem:[#allocation2 + $0x31] sm:$0xff] }
  0x1e   : > { %8123 = vst [vmem:[#allocation16_spill] sm:$0xff] %v5397_v12  ;;  %8124 = vst [vmem:[#allocation17_spill] sm:$0xff] %v5400_v13  ;;  %v5468_v29 = vld [vmem:[#allocation2 + $0x39] sm:$0xff]  ;;  %v5470_v30 = vld [vmem:[#allocation2 + $0x49] sm:$0xff] }
  0x1f   : > { %8125 = vst [vmem:[#allocation18_spill] sm:$0xff] %v5403_v14  ;;  %217 = vst.msk [vmem:[#allocation2 + $0xa9] sm:$0xff] %vm204_vm0, %v5397_v12  ;;  %v5473_v31 = vld [vmem:[%s5330_s17 + $0xc0] sm:$0xff]  ;;  %v5479_v32 = vld [vmem:[#allocation2 + $0x51] sm:$0xff] }
  0x20   : > { %218 = vst.msk [vmem:[#allocation2 + $0xb1] sm:$0xff] %vm204_vm0, %v5400_v13  ;;  %219 = vst.msk [vmem:[#allocation2 + $0xc1] sm:$0xff] %vm204_vm0, %v5403_v14  ;;  %445 = vrot.lane.b32.xlu0 %v380_v26, %s5286_s18  ;;  %v5484_v33 = vld [vmem:[%s5330_s17 + $0xc8] sm:$0xff]  ;;  %v5487_v34 = vld [vmem:[%s5330_s17 + $0xd0] sm:$0xff] }
  0x21   : > { %8126 = vst [vmem:[#allocation19_spill] sm:$0xff] %v5412_v15  ;;  %8127 = vst [vmem:[#allocation20_spill] sm:$0xff] %v5415_v16  ;;  %449 = vrot.lane.b32.xlu1 %v5461_v27, %s5286_s18  ;;  %v5494_v35 = vld [vmem:[%s5330_s17 + $0xd8] sm:$0xff]  ;;  %v5497_v36 = vld [vmem:[%s5330_s17 + $0xe0] sm:$0xff] }
  0x22   : > { %8128 = vst [vmem:[#allocation21_spill] sm:$0xff] %v5418_v17  ;;  %220 = vst.msk [vmem:[#allocation2 + $0xc9] sm:$0xff] %vm204_vm0, %v5412_v15  ;;  %v5500_v37 = vld [vmem:[%s5330_s17 + $0xe8] sm:$0xff]  ;;  %v280_v39 = vld [vmem:[#allocation2 + $0x27] sm:$0x1] }
  0x23   : > { %221 = vst.msk [vmem:[#allocation2 + $0xd9] sm:$0xff] %vm204_vm0, %v5415_v16  ;;  %222 = vst.msk [vmem:[#allocation2 + $0xe1] sm:$0xff] %vm204_vm0, %v5418_v17  ;;  %v279_v38 = vld [vmem:[#allocation2 + $0xf] sm:$0x1]  ;;  %v281_v40 = vld [vmem:[#allocation2 + $0x3f] sm:$0x1] }
  0x24   : > { %8129 = vst [vmem:[#allocation22_spill] sm:$0xff] %v5427_v18  ;;  %8130 = vst [vmem:[#allocation23_spill] sm:$0xff] %v5430_v19  ;;  %451 = vrot.lane.b32.xlu0 %v5466_v28, %s5286_s18  ;;  %v282_v41 = vld [vmem:[#allocation2 + $0x57] sm:$0x1]  ;;  %v283_v42 = vld [vmem:[#allocation2 + $0x6f] sm:$0x1] }
  0x25   : > { %8131 = vst [vmem:[#allocation24_spill] sm:$0xff] %v5433_v20  ;;  %223 = vst.msk [vmem:[#allocation2 + $0xf1] sm:$0xff] %vm204_vm0, %v5427_v18  ;;  %453 = vrot.lane.b32.xlu1 %v5468_v29, %s5286_s18  ;;  %v5519_v43 = vld [vmem:[#allocation2 + $0x61] sm:$0xff]  ;;  %v5521_v44 = vld [vmem:[#allocation2 + $0x69] sm:$0xff] }
  0x26   : > { %224 = vst.msk [vmem:[#allocation2 + $0xf9] sm:$0xff] %vm204_vm0, %v5430_v19  ;;  %225 = vst.msk [vmem:[#allocation2 + $0x109] sm:$0xff] %vm204_vm0, %v5433_v20  ;;  %v284_v45 = vld [vmem:[#allocation2 + $0x87] sm:$0x1]  ;;  %v285_v46 = vld [vmem:[#allocation2 + $0x9f] sm:$0x1] }
  0x27   : > { %8132 = vst [vmem:[#allocation25_spill] sm:$0xff] %v5442_v21  ;;  %8133 = vst [vmem:[#allocation26_spill] sm:$0xff] %v5445_v22  ;;  %v286_v47 = vld [vmem:[#allocation2 + $0xb7] sm:$0x1]  ;;  %v5533_v49 = vld [vmem:[#allocation2 + $0x79] sm:$0xff] }
  0x28   : > { %8134 = vst [vmem:[#allocation27_spill] sm:$0xff] %v5448_v23  ;;  %226 = vst.msk [vmem:[#allocation2 + $0x111] sm:$0xff] %vm204_vm0, %v5442_v21  ;;  %455 = vrot.lane.b32.xlu0 %v5470_v30, %s5286_s18  ;;  %v5535_v50 = vld [vmem:[#allocation2 + $0x81] sm:$0xff]  ;;  %v5543_v53 = vld [vmem:[#allocation2 + $0x91] sm:$0xff] }
  0x29   : > { %227 = vst.msk [vmem:[#allocation2 + $0x121] sm:$0xff] %vm204_vm0, %v5445_v22  ;;  %228 = vst.msk [vmem:[#allocation2 + $0x129] sm:$0xff] %vm204_vm0, %v5448_v23  ;;  %457 = vrot.lane.b32.xlu1 %v5479_v32, %s5286_s18  ;;  %v287_v48 = vld [vmem:[#allocation2 + $0xcf] sm:$0x1]  ;;  %v5545_v54 = vld [vmem:[#allocation2 + $0x99] sm:$0xff] }
  0x2a   : > { %8135 = vst [vmem:[#allocation28_spill] sm:$0xff] %v5473_v31  ;;  %229 = vst.msk [vmem:[#allocation2 + $0x139] sm:$0xff] %vm204_vm0, %v5473_v31  ;;  %v288_v51 = vld [vmem:[#allocation2 + $0xe7] sm:$0x1]  ;;  %v242_v57 = vld [vmem:[#allocation2 + $0x2] sm:$0x1] }
  0x2b   : > { %8136 = vst [vmem:[#allocation29_spill] sm:$0xff] %v5484_v33  ;;  %8137 = vst [vmem:[#allocation30_spill] sm:$0xff] %v5487_v34  ;;  %v243_v58 = vld [vmem:[#allocation2 + $0x1a] sm:$0x1]  ;;  %v5553_v59 = vld [vmem:[#allocation2 + $0xa9] sm:$0xff] }
  0x2c   : > { %230 = vst.msk [vmem:[#allocation2 + $0x141] sm:$0xff] %vm204_vm0, %v5484_v33  ;;  %231 = vst.msk [vmem:[#allocation2 + $0x151] sm:$0xff] %vm204_vm0, %v5487_v34  ;;  %459 = vrot.lane.b32.xlu0 %v5519_v43, %s5286_s18  ;;  %v316_v61 = vld [vmem:[#allocation2 + $0x8] sm:$0xff]  ;;  %v5557_v62 = vld [vmem:[#allocation2 + $0xb1] sm:$0xff] }
  0x2d   : > { %8138 = vst [vmem:[#allocation31_spill] sm:$0xff] %v5494_v35  ;;  %8139 = vst [vmem:[#allocation32_spill] sm:$0xff] %v5497_v36  ;;  %461 = vrot.lane.b32.xlu1 %v5521_v44, %s5286_s18  ;;  %v289_v52 = vld [vmem:[#allocation2 + $0xff] sm:$0x1]  ;;  %v5561_v63 = vld [vmem:[#allocation2 + $0x20] sm:$0xff] }
  0x2e   : > { %8140 = vst [vmem:[#allocation33_spill] sm:$0xff] %v5500_v37  ;;  %232 = vst.msk [vmem:[#allocation2 + $0x159] sm:$0xff] %vm204_vm0, %v5494_v35  ;;  %v244_v26 = vld [vmem:[#allocation2 + $0x32] sm:$0x1]  ;;  %v5757_v6 = vld [vmem:[%s5330_s17 + $0xf8] sm:$0xff] }
  0x2f   : > { %233 = vst.msk [vmem:[#allocation2 + $0x169] sm:$0xff] %vm204_vm0, %v5497_v36  ;;  %240 = vst.msk [vmem:[#allocation2 + $0x199] sm:$0xff] %vm204_vm0, %v5497_v36  ;;  %v290_v55 = vld [vmem:[#allocation2 + $0x117] sm:$0x1] }
  0x30   : > { %234 = vst.msk [vmem:[#allocation2 + $0x171] sm:$0xff] %vm204_vm0, %v5500_v37  ;;  %241 = vst.msk [vmem:[#allocation2 + $0x1a1] sm:$0xff] %vm204_vm0, %v5500_v37  ;;  %463 = vrot.lane.b32.xlu0 %v5533_v49, %s5286_s18  ;;  %v291_v56 = vld [vmem:[#allocation2 + $0x12f] sm:$0x1]  ;;  %v5656_v34 = vld [vmem:[#allocation2 + $0x110] sm:$0xff] }
  0x31   : > { %297 = vst.msk [vmem:[#allocation2 + $0x11] sm:$0x1] %vm260_vm1, %v279_v38  ;;  %298 = vst.msk [vmem:[#allocation2 + $0x29] sm:$0x1] %vm260_vm1, %v280_v39  ;;  %465 = vrot.lane.b32.xlu1 %v5535_v50, %s5286_s18  ;;  %v5566_v38 = vld [vmem:[#allocation2 + $0x38] sm:$0xff]  ;;  %v5568_v39 = vld [vmem:[#allocation2 + $0xc1] sm:$0xff] }
  0x32   : > { %299 = vst.msk [vmem:[#allocation2 + $0x41] sm:$0x1] %vm260_vm1, %v281_v40  ;;  %300 = vst.msk [vmem:[#allocation2 + $0x59] sm:$0x1] %vm260_vm1, %v282_v41  ;;  %v245_v41 = vld [vmem:[#allocation2 + $0x4a] sm:$0x1] }
  0x33   : > { %301 = vst.msk [vmem:[#allocation2 + $0x71] sm:$0x1] %vm260_vm1, %v283_v42  ;;  %302 = vst.msk [vmem:[#allocation2 + $0x89] sm:$0x1] %vm260_vm1, %v284_v45  ;;  %v292_v60 = vld [vmem:[#allocation2 + $0x147] sm:$0x1] }
  0x34   : > { %303 = vst.msk [vmem:[#allocation2 + $0xa1] sm:$0x1] %vm260_vm1, %v285_v46  ;;  %304 = vst.msk [vmem:[#allocation2 + $0xb9] sm:$0x1] %vm260_vm1, %v286_v47  ;;  %467 = vrot.lane.b32.xlu0 %v5543_v53, %s5286_s18  ;;  %v5578_v42 = vld [vmem:[#allocation2 + $0x50] sm:$0xff]  ;;  %v5586_v47 = vld [vmem:[#allocation2 + $0x68] sm:$0xff] }
  0x35   : > { %305 = vst.msk [vmem:[#allocation2 + $0xd1] sm:$0x1] %vm260_vm1, %v287_v48  ;;  %306 = vst.msk [vmem:[#allocation2 + $0xe9] sm:$0x1] %vm260_vm1, %v288_v51  ;;  %469 = vrot.lane.b32.xlu1 %v5545_v54, %s5286_s18  ;;  %v293_v24 = vld [vmem:[#allocation2 + $0x15f] sm:$0x1] }
  0x36   : > { %307 = vst.msk [vmem:[#allocation2 + $0x101] sm:$0x1] %vm260_vm1, %v289_v52  ;;  %308 = vst.msk [vmem:[#allocation2 + $0x119] sm:$0x1] %vm260_vm1, %v290_v55  ;;  %v246_v45 = vld [vmem:[#allocation2 + $0x62] sm:$0x1] }
  0x37   : > { %309 = vst.msk [vmem:[#allocation2 + $0x131] sm:$0x1] %vm260_vm1, %v291_v56  ;;  %261 = vst.msk [vmem:[#allocation2] sm:$0x1] %vm260_vm1, %v242_v57  ;;  %v294_v40 = vld [vmem:[#allocation2 + $0x177] sm:$0x1] }
  0x38   : > { %262 = vst.msk [vmem:[#allocation2 + $0x18] sm:$0x1] %vm260_vm1, %v243_v58  ;;  %310 = vst.msk [vmem:[#allocation2 + $0x149] sm:$0x1] %vm260_vm1, %v292_v60  ;;  %471 = vrot.lane.b32.xlu0 %v5553_v59, %s5286_s18  ;;  %v5580_v46 = vld [vmem:[#allocation2 + $0xc9] sm:$0xff]  ;;  %v5591_v51 = vld [vmem:[#allocation2 + $0x80] sm:$0xff] }
  0x39   : > { %348 = vst.msk [vmem:[#allocation3 + $0x8] sm:$0xff] %vm204_vm0, %v316_v61  ;;  %350 = vst.msk [vmem:[#allocation3 + $0x18] sm:$0xff] %vm204_vm0, %v5561_v63  ;;  %473 = vrot.lane.b32.xlu1 %v5557_v62, %s5286_s18  ;;  %v247_v48 = vld [vmem:[#allocation2 + $0x7a] sm:$0x1]  ;;  %v248_v52 = vld [vmem:[#allocation2 + $0x92] sm:$0x1] }
  0x3a   : > { %311 = vst.msk [vmem:[#allocation2 + $0x161] sm:$0x1] %vm260_vm1, %v293_v24  ;;  %263 = vst.msk [vmem:[#allocation2 + $0x30] sm:$0x1] %vm260_vm1, %v244_v26  ;;  %v5598_v57 = vld [vmem:[#allocation2 + $0x98] sm:$0xff]  ;;  %v5611_v61 = vld [vmem:[#allocation2 + $0xb0] sm:$0xff] }
  0x3b   : > { %352 = vst.msk [vmem:[#allocation3 + $0x28] sm:$0xff] %vm204_vm0, %v5566_v38  ;;  %354 = vst.msk [vmem:[#allocation3 + $0x38] sm:$0xff] %vm204_vm0, %v5578_v42  ;;  %v5604_v58 = vld [vmem:[#allocation2 + $0xd9] sm:$0xff]  ;;  %v249_v60 = vld [vmem:[#allocation2 + $0xaa] sm:$0x1] }
  0x3c   : > { %312 = vst.msk [vmem:[#allocation2 + $0x179] sm:$0x1] %vm260_vm1, %v294_v40  ;;  %264 = vst.msk [vmem:[#allocation2 + $0x48] sm:$0x1] %vm260_vm1, %v245_v41  ;;  %475 = vrot.lane.b32.xlu0 %v5568_v39, %s5286_s18  ;;  %v5613_v24 = vld [vmem:[#allocation2 + $0xe1] sm:$0xff]  ;;  %v5686_v20 = vld [vmem:[#allocation2 + $0x111] sm:$0xff] }
  0x3d   : > { %265 = vst.msk [vmem:[#allocation2 + $0x60] sm:$0x1] %vm260_vm1, %v246_v45  ;;  %266 = vst.msk [vmem:[#allocation2 + $0x78] sm:$0x1] %vm260_vm1, %v247_v48  ;;  %477 = vrot.lane.b32.xlu1 %v5580_v46, %s5286_s18  ;;  %v250_v26 = vld [vmem:[#allocation2 + $0xc2] sm:$0x1] }
  0x3e   : > { %356 = vst.msk [vmem:[#allocation3 + $0x48] sm:$0xff] %vm204_vm0, %v5586_v47  ;;  %v315_v55 = vld [vmem:[#allocation2] sm:$0xff]  ;;  %358 = vst.msk [vmem:[#allocation3 + $0x58] sm:$0xff] %vm204_vm0, %v5591_v51  ;;  %v5618_v40 = vld [vmem:[#allocation2 + $0xc8] sm:$0xff] }
  0x3f   : > { %v5593_v56 = vld [vmem:[#allocation2 + $0x18] sm:$0xff]  ;;  %267 = vst.msk [vmem:[#allocation2 + $0x90] sm:$0x1] %vm260_vm1, %v248_v52  ;;  %268 = vst.msk [vmem:[#allocation2 + $0xa8] sm:$0x1] %vm260_vm1, %v249_v60  ;;  %v5625_v48 = vld [vmem:[#allocation2 + $0xe0] sm:$0xff] }
  0x40   : > { %347 = vst.msk [vmem:[#allocation3] sm:$0xff] %vm204_vm0, %v315_v55  ;;  %349 = vst.msk [vmem:[#allocation3 + $0x10] sm:$0xff] %vm204_vm0, %v5593_v56  ;;  %v251_v45 = vld [vmem:[#allocation2 + $0xda] sm:$0x1]  ;;  %v5627_v52 = vld [vmem:[#allocation2 + $0xf1] sm:$0xff]  ;;  %479 = vrot.lane.b32.xlu0 %v5604_v58, %s5286_s18 }
  0x41   : > { %360 = vst.msk [vmem:[#allocation3 + $0x68] sm:$0xff] %vm204_vm0, %v5598_v57  ;;  %362 = vst.msk [vmem:[#allocation3 + $0x78] sm:$0xff] %vm204_vm0, %v5611_v61  ;;  %v5620_v41 = vld [vmem:[#allocation2 + $0x30] sm:$0xff]  ;;  %v5629_v55 = vld [vmem:[#allocation2 + $0xf9] sm:$0xff]  ;;  %481 = vrot.lane.b32.xlu1 %v5613_v24, %s5286_s18 }
  0x42   : > { %269 = vst.msk [vmem:[#allocation2 + $0xc0] sm:$0x1] %vm260_vm1, %v250_v26  ;;  %270 = vst.msk [vmem:[#allocation2 + $0xd8] sm:$0x1] %vm260_vm1, %v251_v45  ;;  %v252_v60 = vld [vmem:[#allocation2 + $0xf2] sm:$0x1] }
  0x43   : > { %364 = vst.msk [vmem:[#allocation3 + $0x88] sm:$0xff] %vm204_vm0, %v5618_v40  ;;  %351 = vst.msk [vmem:[#allocation3 + $0x20] sm:$0xff] %vm204_vm0, %v5620_v41  ;;  %v5636_v26 = vld [vmem:[#allocation2 + $0xf8] sm:$0xff]  ;;  %v5642_v37 = vld [vmem:[#allocation2 + $0x48] sm:$0xff] }
  0x44   : > { %366 = vst.msk [vmem:[#allocation3 + $0x98] sm:$0xff] %vm204_vm0, %v5625_v48  ;;  %v5644_v36 = vld [vmem:[#allocation2 + $0x60] sm:$0xff]  ;;  %368 = vst.msk [vmem:[#allocation3 + $0xa8] sm:$0xff] %vm204_vm0, %v5636_v26  ;;  %v253_v45 = vld [vmem:[#allocation2 + $0x10a] sm:$0x1]  ;;  %483 = vrot.lane.b32.xlu0 %v5627_v52, %s5286_s18 }
  0x45   : > { %271 = vst.msk [vmem:[#allocation2 + $0xf0] sm:$0x1] %vm260_vm1, %v252_v60  ;;  %v5653_v35 = vld [vmem:[#allocation2 + $0x78] sm:$0xff]  ;;  %272 = vst.msk [vmem:[#allocation2 + $0x108] sm:$0x1] %vm260_vm1, %v253_v45  ;;  %v5665_v31 = vld [vmem:[#allocation2 + $0x128] sm:$0xff]  ;;  %485 = vrot.lane.b32.xlu1 %v5629_v55, %s5286_s18 }
  0x46   : > { %353 = vst.msk [vmem:[#allocation3 + $0x30] sm:$0xff] %vm204_vm0, %v5642_v37  ;;  %355 = vst.msk [vmem:[#allocation3 + $0x40] sm:$0xff] %vm204_vm0, %v5644_v36  ;;  %v254_v33 = vld [vmem:[#allocation2 + $0x122] sm:$0x1]  ;;  %v5660_v60 = vld [vmem:[#allocation2 + $0x90] sm:$0xff] }
  0x47   : > { %357 = vst.msk [vmem:[#allocation3 + $0x50] sm:$0xff] %vm204_vm0, %v5653_v35  ;;  %370 = vst.msk [vmem:[#allocation3 + $0xb8] sm:$0xff] %vm204_vm0, %v5656_v34  ;;  %v255_v23 = vld [vmem:[#allocation2 + $0x13a] sm:$0x1]  ;;  %v5672_v45 = vld [vmem:[#allocation2 + $0x140] sm:$0xff] }
  0x48   : > { %273 = vst.msk [vmem:[#allocation2 + $0x120] sm:$0x1] %vm260_vm1, %v254_v33  ;;  %274 = vst.msk [vmem:[#allocation2 + $0x138] sm:$0x1] %vm260_vm1, %v255_v23  ;;  %v256_v22 = vld [vmem:[#allocation2 + $0x152] sm:$0x1] }
  0x49   : > { %359 = vst.msk [vmem:[#allocation3 + $0x60] sm:$0xff] %vm204_vm0, %v5660_v60  ;;  %372 = vst.msk [vmem:[#allocation3 + $0xc8] sm:$0xff] %vm204_vm0, %v5665_v31  ;;  %v257_v21 = vld [vmem:[#allocation2 + $0x16a] sm:$0x1]  ;;  %v5690_v19 = vld [vmem:[#allocation2 + $0xc0] sm:$0xff]  ;;  %489 = vrot.lane.b32.xlu1 %v5686_v20, %s5286_s18 }
  0x4a   : > { %v5678_v33 = vld [vmem:[#allocation2 + $0xa8] sm:$0xff]  ;;  %374 = vst.msk [vmem:[#allocation3 + $0xd8] sm:$0xff] %vm204_vm0, %v5672_v45  ;;  %363 = vst.msk [vmem:[#allocation3 + $0x80] sm:$0xff] %vm204_vm0, %v5690_v19  ;;  %v5694_v18 = vld [vmem:[#allocation2 + $0xd8] sm:$0xff] }
  0x4b   : > { %275 = vst.msk [vmem:[#allocation2 + $0x150] sm:$0x1] %vm260_vm1, %v256_v22  ;;  %276 = vst.msk [vmem:[#allocation2 + $0x168] sm:$0x1] %vm260_vm1, %v257_v21  ;;  %v5684_v23 = vld [vmem:[#allocation2 + $0x109] sm:$0xff]  ;;  %v5696_v17 = vld [vmem:[#allocation2 + $0x158] sm:$0xff] }
  0x4c   : > { %361 = vst.msk [vmem:[#allocation3 + $0x70] sm:$0xff] %vm204_vm0, %v5678_v33  ;;  %365 = vst.msk [vmem:[#allocation3 + $0x90] sm:$0xff] %vm204_vm0, %v5694_v18  ;;  %v5700_v21 = vld [vmem:[#allocation2 + $0xf0] sm:$0xff]  ;;  %487 = vrot.lane.b32.xlu0 %v5684_v23, %s5286_s18  ;;  %v5713_v16 = vld [vmem:[#allocation2 + $0x108] sm:$0xff] }
  0x4d   : > { %376 = vst.msk [vmem:[#allocation3 + $0xe8] sm:$0xff] %vm204_vm0, %v5696_v17  ;;  %v5705_v22 = vld [vmem:[%s5330_s17 + $0xf0] sm:$0xff]  ;;  %367 = vst.msk [vmem:[#allocation3 + $0xa0] sm:$0xff] %vm204_vm0, %v5700_v21  ;;  %v5717_v15 = vld [vmem:[#allocation2 + $0x121] sm:$0xff] }
  0x4e   : > { %8141 = vst [vmem:[#allocation34_spill] sm:$0xff] %v5705_v22  ;;  %235 = vst.msk [vmem:[#allocation2 + $0x181] sm:$0xff] %vm204_vm0, %v5705_v22  ;;  %v5719_v14 = vld [vmem:[#allocation2 + $0x129] sm:$0xff]  ;;  %v5747_v9 = vld [vmem:[#allocation2 + $0x139] sm:$0xff] }
  0x4f   : > { %369 = vst.msk [vmem:[#allocation3 + $0xb0] sm:$0xff] %vm204_vm0, %v5713_v16  ;;  %v5723_v13 = vld [vmem:[#allocation2 + $0x120] sm:$0xff]  ;;  %v5727_v12 = vld [vmem:[#allocation2 + $0x138] sm:$0xff]  ;;  %v5729_v11 = vld [vmem:[#allocation2 + $0x170] sm:$0xff]  ;;  %493 = vrot.lane.b32.xlu1 %v5719_v14, %s5286_s18 }
  0x50   : > { %371 = vst.msk [vmem:[#allocation3 + $0xc0] sm:$0xff] %vm204_vm0, %v5723_v13  ;;  %373 = vst.msk [vmem:[#allocation3 + $0xd0] sm:$0xff] %vm204_vm0, %v5727_v12  ;;  %491 = vrot.lane.b32.xlu0 %v5717_v15, %s5286_s18  ;;  %v5749_v8 = vld [vmem:[#allocation2 + $0x141] sm:$0xff]  ;;  %v5759_v5 = vld [vmem:[#allocation2 + $0x151] sm:$0xff] }
  0x51   : > { %378 = vst.msk [vmem:[#allocation3 + $0xf8] sm:$0xff] %vm204_vm0, %v5729_v11  ;;  %8142 = vst [vmem:[#allocation35_spill] sm:$0xff] %v5747_v9  ;;  %v5761_v4 = vld [vmem:[#allocation2 + $0x159] sm:$0xff]  ;;  %v5769_v2 = vld [vmem:[#allocation2 + $0x169] sm:$0xff] }
  0x52   : > { %v5733_v22 = vld [vmem:[#allocation2 + $0x150] sm:$0xff]  ;;  %v5735_v10 = vld [vmem:[#allocation2 + $0x168] sm:$0xff]  ;;  %8143 = vst [vmem:[#allocation36_spill] sm:$0xff] %v5749_v8  ;;  %8144 = vst [vmem:[#allocation37_spill] sm:$0xff] %v5757_v6 }
  0x53   : > { %375 = vst.msk [vmem:[#allocation3 + $0xe0] sm:$0xff] %vm204_vm0, %v5733_v22  ;;  %377 = vst.msk [vmem:[#allocation3 + $0xf0] sm:$0xff] %vm204_vm0, %v5735_v10  ;;  %497 = vrot.lane.b32.xlu1 %v5749_v8, %s5286_s18  ;;  %v5771_v0 = vld [vmem:[#allocation2 + $0x171] sm:$0xff]  ;;  %v5781_v1 = vld [vmem:[#allocation2 + $0x22] sm:$0xff] }
  0x54   : > { %495 = vrot.lane.b32.xlu0 %v5747_v9, %s5286_s18  ;;  %8145 = vst [vmem:[#allocation38_spill] sm:$0xff] %v5759_v5  ;;  %8146 = vst [vmem:[#allocation39_spill] sm:$0xff] %v5761_v4  ;;  %v573_v3 = vld [vmem:[#allocation2 + $0xa] sm:$0xff] }
  0x55   : > { %v258_v7 = vld [vmem:[#allocation2 + $0x182] sm:$0x1]  ;;  %236 = vst.msk [vmem:[#allocation2 + $0x189] sm:$0xff] %vm204_vm0, %v5757_v6  ;;  %8147 = vst [vmem:[#allocation40_spill] sm:$0xff] %v5769_v2  ;;  %v5779_v6 = vld [vmem:[#allocation2 + $0x1a] sm:$0xff] }
  0x56   : > { %277 = vst.msk [vmem:[#allocation2 + $0x180] sm:$0x1] %vm260_vm1, %v258_v7  ;;  %8148 = vst [vmem:[#allocation41_spill] sm:$0xff] %v5771_v0  ;;  %v572_v7 = vld [vmem:[#allocation2 + $0x2] sm:$0xff] }
  0x57   : > { %501 = vrot.lane.b32.xlu1 %v5761_v4, %s5286_s18  ;;  %8149 = vst [vmem:[#allocation42_spill] sm:$0xff] %v5779_v6  ;;  %8150 = vst [vmem:[#allocation43_spill] sm:$0xff] %v5781_v1  ;;  %v583_v4 = vld [vmem:[#allocation2 + $0x82] sm:$0xff] }
  0x58   : > { %499 = vrot.lane.b32.xlu0 %v5759_v5, %s5286_s18  ;;  %v585_v5 = vld [vmem:[#allocation2 + $0x9a] sm:$0xff] }
  0x5b   : > { %505 = vrot.lane.b32.xlu1 %v5771_v0, %s5286_s18  ;;  %v5789_v0 = vld [vmem:[#allocation2 + $0x3a] sm:$0xff] }
  0x5c   : > { %503 = vrot.lane.b32.xlu0 %v5769_v2, %s5286_s18  ;;  %v5787_v2 = vld [vmem:[#allocation2 + $0x32] sm:$0xff]  ;;  %8152 = vst [vmem:[#allocation45_spill] sm:$0xff] %v5789_v0 }
  0x5d   : > { %8151 = vst [vmem:[#allocation44_spill] sm:$0xff] %v5787_v2 }
  0x5f   : > { %638 = vrot.lane.b32.xlu1 %v573_v3, %s5287_s19  ;;  %v5795_v3 = vld [vmem:[#allocation2 + $0x4a] sm:$0xff] }
  0x60   : > { %636 = vrot.lane.b32.xlu0 %v572_v7, %s5287_s19  ;;  %8153 = vst [vmem:[#allocation46_spill] sm:$0xff] %v5795_v3  ;;  %v5797_v7 = vld [vmem:[#allocation2 + $0x52] sm:$0xff] }
  0x61   : > { %8154 = vst [vmem:[#allocation47_spill] sm:$0xff] %v5797_v7 }
  0x63   : > { %642 = vrot.lane.b32.xlu1 %v5781_v1, %s5287_s19  ;;  %v580_v1 = vld [vmem:[#allocation2 + $0x62] sm:$0xff] }
  0x64   : > { %640 = vrot.lane.b32.xlu0 %v5779_v6, %s5287_s19  ;;  %v581_v6 = vld [vmem:[#allocation2 + $0x6a] sm:$0xff] }
  0x67   : > { %646 = vrot.lane.b32.xlu1 %v5789_v0, %s5287_s19  ;;  %v584_v0 = vld [vmem:[#allocation2 + $0x92] sm:$0xff] }
  0x68   : > { %644 = vrot.lane.b32.xlu0 %v5787_v2, %s5287_s19  ;;  %v582_v2 = vld [vmem:[#allocation2 + $0x7a] sm:$0xff] }
  0x6b   : > { %650 = vrot.lane.b32.xlu1 %v5797_v7, %s5287_s19  ;;  %v587_v7 = vld [vmem:[#allocation2 + $0xb2] sm:$0xff] }
  0x6c   : > { %648 = vrot.lane.b32.xlu0 %v5795_v3, %s5287_s19  ;;  %v586_v3 = vld [vmem:[#allocation2 + $0xaa] sm:$0xff] }
  0x6f   : > { %654 = vrot.lane.b32.xlu1 %v581_v6, %s5287_s19  ;;  %v589_v6 = vld [vmem:[#allocation2 + $0xca] sm:$0xff] }
  0x70   : > { %652 = vrot.lane.b32.xlu0 %v580_v1, %s5287_s19  ;;  %v588_v1 = vld [vmem:[#allocation2 + $0xc2] sm:$0xff] }
  0x73   : > { %658 = vrot.lane.b32.xlu1 %v583_v4, %s5287_s19  ;;  %v591_v4 = vld [vmem:[#allocation2 + $0xe2] sm:$0xff] }
  0x74   : > { %656 = vrot.lane.b32.xlu0 %v582_v2, %s5287_s19  ;;  %v590_v2 = vld [vmem:[#allocation2 + $0xda] sm:$0xff] }
  0x77   : > { %662 = vrot.lane.b32.xlu1 %v585_v5, %s5287_s19  ;;  %v593_v5 = vld [vmem:[#allocation2 + $0xfa] sm:$0xff] }
  0x78   : > { %660 = vrot.lane.b32.xlu0 %v584_v0, %s5287_s19  ;;  %v592_v0 = vld [vmem:[#allocation2 + $0xf2] sm:$0xff] }
  0x7b   : > { %666 = vrot.lane.b32.xlu1 %v587_v7, %s5287_s19  ;;  %v595_v7 = vld [vmem:[#allocation2 + $0x112] sm:$0xff] }
  0x7c   : > { %664 = vrot.lane.b32.xlu0 %v586_v3, %s5287_s19  ;;  %v594_v3 = vld [vmem:[#allocation2 + $0x10a] sm:$0xff] }
  0x7f   : > { %670 = vrot.lane.b32.xlu1 %v589_v6, %s5287_s19  ;;  %v597_v6 = vld [vmem:[#allocation2 + $0x12a] sm:$0xff] }
  0x80   : > { %668 = vrot.lane.b32.xlu0 %v588_v1, %s5287_s19  ;;  %v596_v1 = vld [vmem:[#allocation2 + $0x122] sm:$0xff] }
  0x83   : > { %674 = vrot.lane.b32.xlu1 %v591_v4, %s5287_s19  ;;  %v599_v4 = vld [vmem:[#allocation2 + $0x142] sm:$0xff] }
  0x84   : > { %672 = vrot.lane.b32.xlu0 %v590_v2, %s5287_s19  ;;  %v598_v2 = vld [vmem:[#allocation2 + $0x13a] sm:$0xff] }
  0x87   : > { %678 = vrot.lane.b32.xlu1 %v593_v5, %s5287_s19  ;;  %v601_v5 = vld [vmem:[#allocation2 + $0x15a] sm:$0xff] }
  0x88   : > { %676 = vrot.lane.b32.xlu0 %v592_v0, %s5287_s19  ;;  %v600_v0 = vld [vmem:[#allocation2 + $0x152] sm:$0xff] }
  0x8b   : > { %682 = vrot.lane.b32.xlu1 %v595_v7, %s5287_s19 }
  0x8c   : > { %680 = vrot.lane.b32.xlu0 %v594_v3, %s5287_s19 }
  0x8e   : > { %v444_v8 = vpop.permute.xlu0 %443 }
  0x8f   : > { %686 = vrot.lane.b32.xlu1 %v597_v6, %s5287_s19  ;;  %v448_v9 = vpop.permute.xlu1 %447  ;;  %540 = vst.msk [vmem:[#allocation3] sm:$0xff] %vm539_vm2, %v444_v8  ;;  %v603_v8 = vld [vmem:[#allocation2 + $0x172] sm:$0xff] }
  0x90   : > { %684 = vrot.lane.b32.xlu0 %v596_v1, %s5287_s19  ;;  %542 = vst.msk [vmem:[#allocation3 + $0x10] sm:$0xff] %vm539_vm2, %v448_v9  ;;  %v602_v1 = vld [vmem:[#allocation2 + $0x16a] sm:$0xff] }
  0x92   : > { %v446_v3 = vpop.permute.xlu0 %445 }
  0x93   : > { %690 = vrot.lane.b32.xlu1 %v599_v4, %s5287_s19  ;;  %v450_v7 = vpop.permute.xlu1 %449  ;;  %541 = vst.msk [vmem:[#allocation3 + $0x8] sm:$0xff] %vm539_vm2, %v446_v3 }
  0x94   : > { %688 = vrot.lane.b32.xlu0 %v598_v2, %s5287_s19  ;;  %543 = vst.msk [vmem:[#allocation3 + $0x18] sm:$0xff] %vm539_vm2, %v450_v7 }
  0x96   : > { %v452_v6 = vpop.permute.xlu0 %451 }
  0x97   : > { %694 = vrot.lane.b32.xlu1 %v601_v5, %s5287_s19  ;;  %v454_v9 = vpop.permute.xlu1 %453  ;;  %544 = vst.msk [vmem:[#allocation3 + $0x20] sm:$0xff] %vm539_vm2, %v452_v6 }
  0x98   : > { %692 = vrot.lane.b32.xlu0 %v600_v0, %s5287_s19  ;;  %545 = vst.msk [vmem:[#allocation3 + $0x28] sm:$0xff] %vm539_vm2, %v454_v9 }
  0x9a   : > { %v456_v2 = vpop.permute.xlu0 %455 }
  0x9b   : > { %698 = vrot.lane.b32.xlu1 %v603_v8, %s5287_s19  ;;  %v458_v4 = vpop.permute.xlu1 %457  ;;  %546 = vst.msk [vmem:[#allocation3 + $0x30] sm:$0xff] %vm539_vm2, %v456_v2 }
  0x9c   : > { %696 = vrot.lane.b32.xlu0 %v602_v1, %s5287_s19  ;;  %547 = vst.msk [vmem:[#allocation3 + $0x38] sm:$0xff] %vm539_vm2, %v458_v4 }
  0x9e   : > { %v460_v0 = vpop.permute.xlu0 %459 }
  0x9f   : > { %831 = vrot.lane.b32.xlu1 %v5561_v63, %s5288_s20  ;;  %v462_v5 = vpop.permute.xlu1 %461  ;;  %548 = vst.msk [vmem:[#allocation3 + $0x40] sm:$0xff] %vm539_vm2, %v460_v0 }
  0xa0   : > { %829 = vrot.lane.b32.xlu0 %v5593_v56, %s5288_s20  ;;  %549 = vst.msk [vmem:[#allocation3 + $0x48] sm:$0xff] %vm539_vm2, %v462_v5 }
  0xa2   : > { %v464_v3 = vpop.permute.xlu0 %463 }
  0xa3   : > { %835 = vrot.lane.b32.xlu1 %v5566_v38, %s5288_s20  ;;  %v466_v7 = vpop.permute.xlu1 %465  ;;  %550 = vst.msk [vmem:[#allocation3 + $0x50] sm:$0xff] %vm539_vm2, %v464_v3 }
  0xa4   : > { %833 = vrot.lane.b32.xlu0 %v5620_v41, %s5288_s20  ;;  %551 = vst.msk [vmem:[#allocation3 + $0x58] sm:$0xff] %vm539_vm2, %v466_v7 }
  0xa6   : > { %v468_v63 = vpop.permute.xlu0 %467 }
  0xa7   : > { %839 = vrot.lane.b32.xlu1 %v5578_v42, %s5288_s20  ;;  %v470_v56 = vpop.permute.xlu1 %469  ;;  %552 = vst.msk [vmem:[#allocation3 + $0x60] sm:$0xff] %vm539_vm2, %v468_v63 }
  0xa8   : > { %837 = vrot.lane.b32.xlu0 %v5642_v37, %s5288_s20  ;;  %553 = vst.msk [vmem:[#allocation3 + $0x68] sm:$0xff] %vm539_vm2, %v470_v56 }
  0xaa   : > { %v472_v1 = vpop.permute.xlu0 %471 }
  0xab   : > { %843 = vrot.lane.b32.xlu1 %v5586_v47, %s5288_s20  ;;  %v474_v8 = vpop.permute.xlu1 %473  ;;  %554 = vst.msk [vmem:[#allocation3 + $0x70] sm:$0xff] %vm539_vm2, %v472_v1 }
  0xac   : > { %841 = vrot.lane.b32.xlu0 %v5644_v36, %s5288_s20  ;;  %555 = vst.msk [vmem:[#allocation3 + $0x78] sm:$0xff] %vm539_vm2, %v474_v8 }
  0xae   : > { %v476_v6 = vpop.permute.xlu0 %475 }
  0xaf   : > { %847 = vrot.lane.b32.xlu1 %v5591_v51, %s5288_s20  ;;  %v478_v9 = vpop.permute.xlu1 %477  ;;  %556 = vst.msk [vmem:[#allocation3 + $0x80] sm:$0xff] %vm539_vm2, %v476_v6 }
  0xb0   : > { %845 = vrot.lane.b32.xlu0 %v5653_v35, %s5288_s20  ;;  %557 = vst.msk [vmem:[#allocation3 + $0x88] sm:$0xff] %vm539_vm2, %v478_v9 }
  0xb2   : > { %v480_v2 = vpop.permute.xlu0 %479 }
  0xb3   : > { %851 = vrot.lane.b32.xlu1 %v5598_v57, %s5288_s20  ;;  %v482_v4 = vpop.permute.xlu1 %481  ;;  %558 = vst.msk [vmem:[#allocation3 + $0x90] sm:$0xff] %vm539_vm2, %v480_v2 }
  0xb4   : > { %849 = vrot.lane.b32.xlu0 %v5660_v60, %s5288_s20  ;;  %559 = vst.msk [vmem:[#allocation3 + $0x98] sm:$0xff] %vm539_vm2, %v482_v4 }
  0xb6   : > { %v484_v0 = vpop.permute.xlu0 %483 }
  0xb7   : > { %855 = vrot.lane.b32.xlu1 %v5611_v61, %s5288_s20  ;;  %v486_v5 = vpop.permute.xlu1 %485  ;;  %560 = vst.msk [vmem:[#allocation3 + $0xa0] sm:$0xff] %vm539_vm2, %v484_v0 }
  0xb8   : > { %853 = vrot.lane.b32.xlu0 %v5678_v33, %s5288_s20  ;;  %561 = vst.msk [vmem:[#allocation3 + $0xa8] sm:$0xff] %vm539_vm2, %v486_v5 }
  0xbb   : > { %859 = vrot.lane.b32.xlu1 %v5618_v40, %s5288_s20  ;;  %v490_v7 = vpop.permute.xlu1 %489 }
  0xbc   : > { %857 = vrot.lane.b32.xlu0 %v5690_v19, %s5288_s20  ;;  %563 = vst.msk [vmem:[#allocation3 + $0xb8] sm:$0xff] %vm539_vm2, %v490_v7 }
  0xbe   : > { %v488_v3 = vpop.permute.xlu0 %487 }
  0xbf   : > { %562 = vst.msk [vmem:[#allocation3 + $0xb0] sm:$0xff] %vm539_vm2, %v488_v3  ;;  %863 = vrot.lane.b32.xlu1 %v5625_v48, %s5288_s20 }
  0xc0   : > { %861 = vrot.lane.b32.xlu0 %v5694_v18, %s5288_s20 }
  0xc1   : > { %v494_v56 = vpop.permute.xlu1 %493 }
  0xc2   : > { %v492_v63 = vpop.permute.xlu0 %491  ;;  %565 = vst.msk [vmem:[#allocation3 + $0xc8] sm:$0xff] %vm539_vm2, %v494_v56 }
  0xc3   : > { %564 = vst.msk [vmem:[#allocation3 + $0xc0] sm:$0xff] %vm539_vm2, %v492_v63  ;;  %867 = vrot.lane.b32.xlu1 %v5636_v26, %s5288_s20 }
  0xc4   : > { %865 = vrot.lane.b32.xlu0 %v5700_v21, %s5288_s20 }
  0xc5   : > { %v498_v8 = vpop.permute.xlu1 %497 }
  0xc6   : > { %v496_v1 = vpop.permute.xlu0 %495  ;;  %567 = vst.msk [vmem:[#allocation3 + $0xd8] sm:$0xff] %vm539_vm2, %v498_v8  ;;  %v8160_v8 = vld [vmem:[#allocation41_spill] sm:$0xff] }
  0xc7   : > { %566 = vst.msk [vmem:[#allocation3 + $0xd0] sm:$0xff] %vm539_vm2, %v496_v1  ;;  %871 = vrot.lane.b32.xlu1 %v5656_v34, %s5288_s20  ;;  %v8159_v1 = vld [vmem:[#allocation40_spill] sm:$0xff] }
  0xc8   : > { %869 = vrot.lane.b32.xlu0 %v5713_v16, %s5288_s20 }
  0xc9   : > { %v502_v9 = vpop.permute.xlu1 %501 }
  0xca   : > { %v500_v6 = vpop.permute.xlu0 %499  ;;  %569 = vst.msk [vmem:[#allocation3 + $0xe8] sm:$0xff] %vm539_vm2, %v502_v9  ;;  %v989_v9 = vld [vmem:[#allocation2 + $0x189] sm:$0xff] }
  0xcb   : > { %568 = vst.msk [vmem:[#allocation3 + $0xe0] sm:$0xff] %vm539_vm2, %v500_v6  ;;  %875 = vrot.lane.b32.xlu1 %v5665_v31, %s5288_s20  ;;  %v988_v6 = vld [vmem:[#allocation2 + $0x181] sm:$0xff] }
  0xcc   : > { %873 = vrot.lane.b32.xlu0 %v5723_v13, %s5288_s20 }
  0xcd   : > { %v506_v21 = vpop.permute.xlu1 %505 }
  0xce   : > { %v504_v26 = vpop.permute.xlu0 %503  ;;  %571 = vst.msk [vmem:[#allocation3 + $0xf8] sm:$0xff] %vm539_vm2, %v506_v21 }
  0xcf   : > { %570 = vst.msk [vmem:[#allocation3 + $0xf0] sm:$0xff] %vm539_vm2, %v504_v26  ;;  %879 = vrot.lane.b32.xlu1 %v5672_v45, %s5288_s20  ;;  %v796_v45 = vld [vmem:[#allocation2 + $0x188] sm:$0xff] }
  0xd0   : > { %877 = vrot.lane.b32.xlu0 %v5727_v12, %s5288_s20  ;;  %v795_v12 = vld [vmem:[#allocation2 + $0x180] sm:$0xff] }
  0xd1   : > { %v639_v34 = vpop.permute.xlu1 %638 }
  0xd2   : > { %v637_v16 = vpop.permute.xlu0 %636  ;;  %734 = vst.msk [vmem:[#allocation3 + $0x8] sm:$0xff] %vm732_vm3, %v639_v34 }
  0xd3   : > { %733 = vst.msk [vmem:[#allocation3] sm:$0xff] %vm732_vm3, %v637_v16  ;;  %883 = vrot.lane.b32.xlu1 %v5696_v17, %s5288_s20 }
  0xd4   : > { %881 = vrot.lane.b32.xlu0 %v5733_v22, %s5288_s20 }
  0xd5   : > { %v643_v31 = vpop.permute.xlu1 %642 }
  0xd6   : > { %v641_v13 = vpop.permute.xlu0 %640  ;;  %736 = vst.msk [vmem:[#allocation3 + $0x18] sm:$0xff] %vm732_vm3, %v643_v31  ;;  %v8162_v31 = vld [vmem:[#allocation43_spill] sm:$0xff] }
  0xd7   : > { %735 = vst.msk [vmem:[#allocation3 + $0x10] sm:$0xff] %vm732_vm3, %v641_v13  ;;  %887 = vrot.lane.b32.xlu1 %v5729_v11, %s5288_s20  ;;  %v8161_v13 = vld [vmem:[#allocation42_spill] sm:$0xff] }
  0xd8   : > { %885 = vrot.lane.b32.xlu0 %v5735_v10, %s5288_s20 }
  0xd9   : > { %v647_v4 = vpop.permute.xlu1 %646 }
  0xda   : > { %v645_v2 = vpop.permute.xlu0 %644  ;;  %738 = vst.msk [vmem:[#allocation3 + $0x28] sm:$0xff] %vm732_vm3, %v647_v4  ;;  %v8164_v4 = vld [vmem:[#allocation45_spill] sm:$0xff] }
  0xdb   : > { %737 = vst.msk [vmem:[#allocation3 + $0x20] sm:$0xff] %vm732_vm3, %v645_v2  ;;  %891 = vrot.lane.b32.xlu1 %v796_v45, %s5288_s20  ;;  %v8163_v2 = vld [vmem:[#allocation44_spill] sm:$0xff] }
  0xdc   : > { %889 = vrot.lane.b32.xlu0 %v795_v12, %s5288_s20 }
  0xdd   : > { %v651_v22 = vpop.permute.xlu1 %650 }
  0xde   : > { %v649_v17 = vpop.permute.xlu0 %648  ;;  %740 = vst.msk [vmem:[#allocation3 + $0x38] sm:$0xff] %vm732_vm3, %v651_v22 }
  0xdf   : > { %739 = vst.msk [vmem:[#allocation3 + $0x30] sm:$0xff] %vm732_vm3, %v649_v17  ;;  %1024 = vrot.lane.b32.xlu1 %v5461_v27, %s5289_s21  ;;  %v1960_v17 = vld [vmem:[%s8062_s1 + $0x20] sm:$0xf] }
  0xe0   : > { %1022 = vrot.lane.b32.xlu0 %v5450_v25, %s5289_s21  ;;  %5142 = vmatprep.subr.msk.mxu0 %vm2058_vm5, %v1960_v17 }
  0xe1   : > { %v655_v11 = vpop.permute.xlu1 %654  ;;  %5143 = vmatpush3.msk.msra.mxu0 %vm2058_vm5, %v1960_v17 }
  0xe2   : > { %v653_v10 = vpop.permute.xlu0 %652  ;;  %742 = vst.msk [vmem:[#allocation3 + $0x48] sm:$0xff] %vm732_vm3, %v655_v11  ;;  %v1959_v11 = vld [vmem:[%s8062_s1 + $0x18] sm:$0xff] }
  0xe3   : > { %741 = vst.msk [vmem:[#allocation3 + $0x40] sm:$0xff] %vm732_vm3, %v653_v10  ;;  %1028 = vrot.lane.b32.xlu1 %v5468_v29, %s5289_s21  ;;  %5144 = vmatprep.subr.mxu0 %v1959_v11 }
  0xe4   : > { %1026 = vrot.lane.b32.xlu0 %v5466_v28, %s5289_s21  ;;  %5145 = vmatpush3.msra.mxu0 %v1959_v11 }
  0xe5   : > { %v659_v5 = vpop.permute.xlu1 %658 }
  0xe6   : > { %v657_v0 = vpop.permute.xlu0 %656  ;;  %744 = vst.msk [vmem:[#allocation3 + $0x58] sm:$0xff] %vm732_vm3, %v659_v5  ;;  %v8166_v5 = vld [vmem:[#allocation47_spill] sm:$0xff] }
  0xe7   : > { %743 = vst.msk [vmem:[#allocation3 + $0x50] sm:$0xff] %vm732_vm3, %v657_v0  ;;  %1032 = vrot.lane.b32.xlu1 %v5479_v32, %s5289_s21  ;;  %v8165_v0 = vld [vmem:[#allocation46_spill] sm:$0xff] }
  0xe8   : > { %1030 = vrot.lane.b32.xlu0 %v5470_v30, %s5289_s21 }
  0xe9   : > { %v663_v27 = vpop.permute.xlu1 %662 }
  0xea   : > { %v661_v25 = vpop.permute.xlu0 %660  ;;  %746 = vst.msk [vmem:[#allocation3 + $0x68] sm:$0xff] %vm732_vm3, %v663_v27 }
  0xeb   : > { %745 = vst.msk [vmem:[#allocation3 + $0x60] sm:$0xff] %vm732_vm3, %v661_v25  ;;  %1036 = vrot.lane.b32.xlu1 %v5521_v44, %s5289_s21  ;;  %v1958_v25 = vld [vmem:[%s8062_s1 + $0x10] sm:$0xff] }
  0xec   : > { %1034 = vrot.lane.b32.xlu0 %v5519_v43, %s5289_s21  ;;  %5146 = vmatprep.subr.mxu0 %v1958_v25 }
  0xed   : > { %v667_v29 = vpop.permute.xlu1 %666  ;;  %5147 = vmatpush3.msra.mxu0 %v1958_v25 }
  0xee   : > { %v665_v28 = vpop.permute.xlu0 %664  ;;  %748 = vst.msk [vmem:[#allocation3 + $0x78] sm:$0xff] %vm732_vm3, %v667_v29  ;;  %v1957_v29 = vld [vmem:[%s8062_s1 + $0x8] sm:$0xff] }
  0xef   : > { %747 = vst.msk [vmem:[#allocation3 + $0x70] sm:$0xff] %vm732_vm3, %v665_v28  ;;  %1040 = vrot.lane.b32.xlu1 %v5535_v50, %s5289_s21  ;;  %5148 = vmatprep.subr.mxu0 %v1957_v29 }
  0xf0   : > { %1038 = vrot.lane.b32.xlu0 %v5533_v49, %s5289_s21  ;;  %5149 = vmatpush3.msra.mxu0 %v1957_v29 }
  0xf1   : > { %v671_v32 = vpop.permute.xlu1 %670 }
  0xf2   : > { %v669_v30 = vpop.permute.xlu0 %668  ;;  %750 = vst.msk [vmem:[#allocation3 + $0x88] sm:$0xff] %vm732_vm3, %v671_v32  ;;  %v1539_v32 = vld [vmem:[#allocation2 + $0x39] sm:$0xff] }
  0xf3   : > { %749 = vst.msk [vmem:[#allocation3 + $0x80] sm:$0xff] %vm732_vm3, %v669_v30  ;;  %1044 = vrot.lane.b32.xlu1 %v5545_v54, %s5289_s21  ;;  %v1538_v30 = vld [vmem:[#allocation2 + $0x31] sm:$0xff] }
  0xf4   : > { %1042 = vrot.lane.b32.xlu0 %v5543_v53, %s5289_s21 }
  0xf5   : > { %v675_v44 = vpop.permute.xlu1 %674 }
  0xf6   : > { %v673_v43 = vpop.permute.xlu0 %672  ;;  %752 = vst.msk [vmem:[#allocation3 + $0x98] sm:$0xff] %vm732_vm3, %v675_v44 }
  0xf7   : > { %751 = vst.msk [vmem:[#allocation3 + $0x90] sm:$0xff] %vm732_vm3, %v673_v43  ;;  %1048 = vrot.lane.b32.xlu1 %v5557_v62, %s5289_s21 }
  0xf8   : > { %1046 = vrot.lane.b32.xlu0 %v5553_v59, %s5289_s21 }
  0xf9   : > { %v679_v50 = vpop.permute.xlu1 %678 }
  0xfa   : > { %v677_v49 = vpop.permute.xlu0 %676  ;;  %754 = vst.msk [vmem:[#allocation3 + $0xa8] sm:$0xff] %vm732_vm3, %v679_v50 }
  0xfb   : > { %753 = vst.msk [vmem:[#allocation3 + $0xa0] sm:$0xff] %vm732_vm3, %v677_v49  ;;  %1052 = vrot.lane.b32.xlu1 %v5580_v46, %s5289_s21  ;;  %v1956_v49 = vld [vmem:[%s8062_s1] sm:$0xff] }
  0xfc   : > { %1050 = vrot.lane.b32.xlu0 %v5568_v39, %s5289_s21  ;;  %5150 = vmatprep.subr.mxu0 %v1956_v49 }
  0xfd   : > { %v683_v54 = vpop.permute.xlu1 %682  ;;  %5151 = vmatpush3.msra.mxu0 %v1956_v49 }
  0xfe   : > { %v681_v53 = vpop.permute.xlu0 %680  ;;  %756 = vst.msk [vmem:[#allocation3 + $0xb8] sm:$0xff] %vm732_vm3, %v683_v54  ;;  %v1540_v54 = vld [vmem:[#allocation2 + $0x49] sm:$0xff] }
  0xff   : > { %755 = vst.msk [vmem:[#allocation3 + $0xb0] sm:$0xff] %vm732_vm3, %v681_v53  ;;  %1056 = vrot.lane.b32.xlu1 %v5613_v24, %s5289_s21 }
 0x100   : > { %1054 = vrot.lane.b32.xlu0 %v5604_v58, %s5289_s21 }
 0x101   : > { %v687_v62 = vpop.permute.xlu1 %686 }
 0x102   : > { %v685_v59 = vpop.permute.xlu0 %684  ;;  %758 = vst.msk [vmem:[#allocation3 + $0xc8] sm:$0xff] %vm732_vm3, %v687_v62 }
 0x103   : > { %757 = vst.msk [vmem:[#allocation3 + $0xc0] sm:$0xff] %vm732_vm3, %v685_v59  ;;  %1060 = vrot.lane.b32.xlu1 %v5629_v55, %s5289_s21  ;;  %v1541_v59 = vld [vmem:[#allocation2 + $0x51] sm:$0xff] }
 0x104   : > { %1058 = vrot.lane.b32.xlu0 %v5627_v52, %s5289_s21 }
 0x105   : > { %v691_v46 = vpop.permute.xlu1 %690 }
 0x106   : > { %v689_v39 = vpop.permute.xlu0 %688  ;;  %760 = vst.msk [vmem:[#allocation3 + $0xd8] sm:$0xff] %vm732_vm3, %v691_v46  ;;  %v1733_v46 = vld [vmem:[#allocation2 + $0x4a] sm:$0xff] }
 0x107   : > { %759 = vst.msk [vmem:[#allocation3 + $0xd0] sm:$0xff] %vm732_vm3, %v689_v39  ;;  %1064 = vrot.lane.b32.xlu1 %v5686_v20, %s5289_s21  ;;  %v8155_v20 = vld [vmem:[#allocation35_spill] sm:$0xff] }
 0x108   : > { %1062 = vrot.lane.b32.xlu0 %v5684_v23, %s5289_s21  ;;  %v8156_v23 = vld [vmem:[#allocation36_spill] sm:$0xff] }
 0x109   : > { %v695_v24 = vpop.permute.xlu1 %694 }
 0x10a   : > { %v693_v58 = vpop.permute.xlu0 %692  ;;  %762 = vst.msk [vmem:[#allocation3 + $0xe8] sm:$0xff] %vm732_vm3, %v695_v24 }
 0x10b   : > { %761 = vst.msk [vmem:[#allocation3 + $0xe0] sm:$0xff] %vm732_vm3, %v693_v58  ;;  %1068 = vrot.lane.b32.xlu1 %v5719_v14, %s5289_s21  ;;  %v8157_v14 = vld [vmem:[#allocation38_spill] sm:$0xff]  ;;  %v1734_v58 = vld [vmem:[#allocation2 + $0x52] sm:$0xff] }
 0x10c   : > { %1066 = vrot.lane.b32.xlu0 %v5717_v15, %s5289_s21  ;;  %v8158_v15 = vld [vmem:[#allocation39_spill] sm:$0xff] }
 0x10d   : > { %v699_v55 = vpop.permute.xlu1 %698 }
 0x10e   : > { %v697_v52 = vpop.permute.xlu0 %696  ;;  %764 = vst.msk [vmem:[#allocation3 + $0xf8] sm:$0xff] %vm732_vm3, %v699_v55  ;;  %v1542_v55 = vld [vmem:[#allocation2 + $0x61] sm:$0xff] }
 0x10f   : > { %763 = vst.msk [vmem:[#allocation3 + $0xf0] sm:$0xff] %vm732_vm3, %v697_v52  ;;  %1072 = vrot.lane.b32.xlu1 %v8156_v23, %s5289_s21 }
 0x110   : > { %1070 = vrot.lane.b32.xlu0 %v8155_v20, %s5289_s21  ;;  %v1543_v20 = vld [vmem:[#allocation2 + $0x69] sm:$0xff] }
 0x111   : > { %v832_v7 = vpop.permute.xlu1 %831 }
 0x112   : > { %v830_v3 = vpop.permute.xlu0 %829  ;;  %927 = vst.msk [vmem:[#allocation3 + $0x8] sm:$0xff] %vm925_vm4, %v832_v7  ;;  %v1735_v7 = vld [vmem:[#allocation2 + $0x62] sm:$0xff] }
 0x113   : > { %926 = vst.msk [vmem:[#allocation3] sm:$0xff] %vm925_vm4, %v830_v3  ;;  %1076 = vrot.lane.b32.xlu1 %v8158_v15, %s5289_s21 }
 0x114   : > { %1074 = vrot.lane.b32.xlu0 %v8157_v14, %s5289_s21 }
 0x115   : > { %v836_v56 = vpop.permute.xlu1 %835 }
 0x116   : > { %v834_v63 = vpop.permute.xlu0 %833  ;;  %929 = vst.msk [vmem:[#allocation3 + $0x18] sm:$0xff] %vm925_vm4, %v836_v56 }
 0x117   : > { %928 = vst.msk [vmem:[#allocation3 + $0x10] sm:$0xff] %vm925_vm4, %v834_v63  ;;  %1080 = vrot.lane.b32.xlu1 %v8160_v8, %s5289_s21  ;;  %v1544_v8 = vld [vmem:[#allocation2 + $0x79] sm:$0xff] }
 0x118   : > { %1078 = vrot.lane.b32.xlu0 %v8159_v1, %s5289_s21 }
 0x119   : > { %v840_v21 = vpop.permute.xlu1 %839 }
 0x11a   : > { %v838_v26 = vpop.permute.xlu0 %837  ;;  %931 = vst.msk [vmem:[#allocation3 + $0x28] sm:$0xff] %vm925_vm4, %v840_v21  ;;  %v1737_v21 = vld [vmem:[#allocation2 + $0x7a] sm:$0xff] }
 0x11b   : > { %930 = vst.msk [vmem:[#allocation3 + $0x20] sm:$0xff] %vm925_vm4, %v838_v26  ;;  %1084 = vrot.lane.b32.xlu1 %v989_v9, %s5289_s21 }
 0x11c   : > { %1082 = vrot.lane.b32.xlu0 %v988_v6, %s5289_s21  ;;  %v1545_v6 = vld [vmem:[#allocation2 + $0x81] sm:$0xff] }
 0x11d   : > { %v844_v34 = vpop.permute.xlu1 %843 }
 0x11e   : > { %v842_v16 = vpop.permute.xlu0 %841  ;;  %933 = vst.msk [vmem:[#allocation3 + $0x38] sm:$0xff] %vm925_vm4, %v844_v34 }
 0x11f   : > { %932 = vst.msk [vmem:[#allocation3 + $0x30] sm:$0xff] %vm925_vm4, %v842_v16  ;;  %1217 = vrot.lane.b32.xlu1 %v8162_v31, %s5290_s22 }
 0x120   : > { %1215 = vrot.lane.b32.xlu0 %v8161_v13, %s5290_s22 }
 0x121   : > { %v848_v45 = vpop.permute.xlu1 %847 }
 0x122   : > { %v846_v12 = vpop.permute.xlu0 %845  ;;  %935 = vst.msk [vmem:[#allocation3 + $0x48] sm:$0xff] %vm925_vm4, %v848_v45  ;;  %v1546_v45 = vld [vmem:[#allocation2 + $0x91] sm:$0xff] }
 0x123   : > { %934 = vst.msk [vmem:[#allocation3 + $0x40] sm:$0xff] %vm925_vm4, %v846_v12  ;;  %1221 = vrot.lane.b32.xlu1 %v8164_v4, %s5290_s22 }
 0x124   : > { %1219 = vrot.lane.b32.xlu0 %v8163_v2, %s5290_s22 }
 0x125   : > { %v852_v10 = vpop.permute.xlu1 %851 }
 0x126   : > { %v850_v22 = vpop.permute.xlu0 %849  ;;  %937 = vst.msk [vmem:[#allocation3 + $0x58] sm:$0xff] %vm925_vm4, %v852_v10 }
 0x127   : > { %936 = vst.msk [vmem:[#allocation3 + $0x50] sm:$0xff] %vm925_vm4, %v850_v22  ;;  %1225 = vrot.lane.b32.xlu1 %v8166_v5, %s5290_s22  ;;  %v1739_v22 = vld [vmem:[#allocation2 + $0x92] sm:$0xff] }
 0x128   : > { %1223 = vrot.lane.b32.xlu0 %v8165_v0, %s5290_s22 }
 0x129   : > { %v856_v28 = vpop.permute.xlu1 %855 }
 0x12a   : > { %v854_v27 = vpop.permute.xlu0 %853  ;;  %939 = vst.msk [vmem:[#allocation3 + $0x68] sm:$0xff] %vm925_vm4, %v856_v28  ;;  %v1549_v28 = vld [vmem:[#allocation2 + $0xb1] sm:$0xff] }
 0x12b   : > { %938 = vst.msk [vmem:[#allocation3 + $0x60] sm:$0xff] %vm925_vm4, %v854_v27  ;;  %1411 = vrot.lane.b32.xlu1 %v5566_v38, %s5291_s4  ;;  %v1548_v27 = vld [vmem:[#allocation2 + $0xa9] sm:$0xff] }
 0x12c   : > { %1409 = vrot.lane.b32.xlu0 %v5620_v41, %s5291_s4 }
 0x12d   : > { %v860_v44 = vpop.permute.xlu1 %859 }
 0x12e   : > { %v858_v43 = vpop.permute.xlu0 %857  ;;  %941 = vst.msk [vmem:[#allocation3 + $0x78] sm:$0xff] %vm925_vm4, %v860_v44 }
 0x12f   : > { %940 = vst.msk [vmem:[#allocation3 + $0x70] sm:$0xff] %vm925_vm4, %v858_v43  ;;  %1604 = vrot.lane.b32.xlu1 %v1539_v32, %s5292_s7  ;;  %v1741_v32 = vld [vmem:[#allocation2 + $0xaa] sm:$0xff] }
 0x130   : > { %1602 = vrot.lane.b32.xlu0 %v1538_v30, %s5292_s7 }
 0x131   : > { %v864_v41 = vpop.permute.xlu1 %863 }
 0x132   : > { %v862_v38 = vpop.permute.xlu0 %861  ;;  %943 = vst.msk [vmem:[#allocation3 + $0x88] sm:$0xff] %vm925_vm4, %v864_v41 }
 0x133   : > { %942 = vst.msk [vmem:[#allocation3 + $0x80] sm:$0xff] %vm925_vm4, %v862_v38  ;;  %1797 = vrot.lane.b32.xlu1 %v8164_v4, %s5293_s8 }
 0x134   : > { %1795 = vrot.lane.b32.xlu0 %v8163_v2, %s5293_s8  ;;  %v1547_v2 = vld [vmem:[#allocation2 + $0x99] sm:$0xff] }
 0x135   : > { %v868_v53 = vpop.permute.xlu1 %867 }
 0x136   : > { %v866_v50 = vpop.permute.xlu0 %865  ;;  %945 = vst.msk [vmem:[#allocation3 + $0x98] sm:$0xff] %vm925_vm4, %v868_v53  ;;  %v1551_v53 = vld [vmem:[#allocation2 + $0xc9] sm:$0xff] }
 0x137   : > { %944 = vst.msk [vmem:[#allocation3 + $0x90] sm:$0xff] %vm925_vm4, %v866_v50  ;;  %1415 = vrot.lane.b32.xlu1 %v5578_v42, %s5291_s4  ;;  %v1550_v50 = vld [vmem:[#allocation2 + $0xc1] sm:$0xff] }
 0x138   : > { %1413 = vrot.lane.b32.xlu0 %v5642_v37, %s5291_s4 }
 0x139   : > { %v872_v39 = vpop.permute.xlu1 %871 }
 0x13a   : > { %v870_v62 = vpop.permute.xlu0 %869  ;;  %947 = vst.msk [vmem:[#allocation3 + $0xa8] sm:$0xff] %vm925_vm4, %v872_v39  ;;  %v1743_v39 = vld [vmem:[#allocation2 + $0xc2] sm:$0xff] }
 0x13b   : > { %946 = vst.msk [vmem:[#allocation3 + $0xa0] sm:$0xff] %vm925_vm4, %v870_v62  ;;  %1608 = vrot.lane.b32.xlu1 %v1541_v59, %s5292_s7  ;;  %v295_v62 = vld [vmem:[#allocation2 + $0x18f] sm:$0x1] }
 0x13c   : > { %1606 = vrot.lane.b32.xlu0 %v1540_v54, %s5292_s7  ;;  %313 = vst.msk [vmem:[#allocation2 + $0x191] sm:$0x1] %vm260_vm1, %v295_v62 }
 0x13d   : > { %v876_v52 = vpop.permute.xlu1 %875 }
 0x13e   : > { %v874_v24 = vpop.permute.xlu0 %873  ;;  %949 = vst.msk [vmem:[#allocation3 + $0xb8] sm:$0xff] %vm925_vm4, %v876_v52 }
 0x13f   : > { %948 = vst.msk [vmem:[#allocation3 + $0xb0] sm:$0xff] %vm925_vm4, %v874_v24  ;;  %1801 = vrot.lane.b32.xlu1 %v1734_v58, %s5293_s8  ;;  %v1744_v58 = vld [vmem:[#allocation2 + $0xca] sm:$0xff] }
 0x140   : > { %1799 = vrot.lane.b32.xlu0 %v1733_v46, %s5293_s8 }
 0x141   : > { %v880_v42 = vpop.permute.xlu1 %879 }
 0x142   : > { %v878_v37 = vpop.permute.xlu0 %877  ;;  %951 = vst.msk [vmem:[#allocation3 + $0xc8] sm:$0xff] %vm925_vm4, %v880_v42 }
 0x143   : > { %950 = vst.msk [vmem:[#allocation3 + $0xc0] sm:$0xff] %vm925_vm4, %v878_v37  ;;  %1419 = vrot.lane.b32.xlu1 %v5586_v47, %s5291_s4 }
 0x144   : > { %1417 = vrot.lane.b32.xlu0 %v5644_v36, %s5291_s4  ;;  %v1736_v36 = vld [vmem:[#allocation2 + $0x6a] sm:$0xff] }
 0x145   : > { %v884_v3 = vpop.permute.xlu1 %883 }
 0x146   : > { %v882_v23 = vpop.permute.xlu0 %881  ;;  %953 = vst.msk [vmem:[#allocation3 + $0xd8] sm:$0xff] %vm925_vm4, %v884_v3 }
 0x147   : > { %952 = vst.msk [vmem:[#allocation3 + $0xd0] sm:$0xff] %vm925_vm4, %v882_v23  ;;  %1612 = vrot.lane.b32.xlu1 %v1543_v20, %s5292_s7  ;;  %v1552_v20 = vld [vmem:[#allocation2 + $0xd9] sm:$0xff]  ;;  %v1553_v23 = vld [vmem:[#allocation2 + $0xe1] sm:$0xff] }
 0x148   : > { %1610 = vrot.lane.b32.xlu0 %v1542_v55, %s5292_s7  ;;  %v296_v55 = vld [vmem:[#allocation2 + $0x1a7] sm:$0x1] }
 0x149   : > { %v888_v15 = vpop.permute.xlu1 %887  ;;  %314 = vst.msk [vmem:[#allocation2 + $0x1a9] sm:$0x1] %vm260_vm1, %v296_v55 }
 0x14a   : > { %v886_v14 = vpop.permute.xlu0 %885  ;;  %955 = vst.msk [vmem:[#allocation3 + $0xe8] sm:$0xff] %vm925_vm4, %v888_v15 }
 0x14b   : > { %954 = vst.msk [vmem:[#allocation3 + $0xe0] sm:$0xff] %vm925_vm4, %v886_v14  ;;  %1227 = vrot.lane.b32.xlu1 %v1735_v7, %s5290_s22  ;;  %v1745_v14 = vld [vmem:[#allocation2 + $0xda] sm:$0xff] }
 0x14c   : > { %1803 = vrot.lane.b32.xlu0 %v1735_v7, %s5293_s8 }
 0x14d   : > { %v892_v63 = vpop.permute.xlu1 %891 }
 0x14e   : > { %v890_v47 = vpop.permute.xlu0 %889  ;;  %957 = vst.msk [vmem:[#allocation3 + $0xf8] sm:$0xff] %vm925_vm4, %v892_v63  ;;  %v1361_v63 = vld [vmem:[#allocation2 + $0xf0] sm:$0xff] }
 0x14f   : > { %956 = vst.msk [vmem:[#allocation3 + $0xf0] sm:$0xff] %vm925_vm4, %v890_v47  ;;  %1229 = vrot.lane.b32.xlu1 %v1736_v36, %s5290_s22 }
 0x150   : > { %1805 = vrot.lane.b32.xlu0 %v1736_v36, %s5293_s8 }
 0x151   : > { %v1025_v1 = vpop.permute.xlu1 %1024 }
 0x152   : > { %v1023_v56 = vpop.permute.xlu0 %1022  ;;  %1120 = vst.msk [vmem:[#allocation3 + $0x8] sm:$0xff] %vm1118_vm6, %v1025_v1 }
 0x153   : > { %1119 = vst.msk [vmem:[#allocation3] sm:$0xff] %vm1118_vm6, %v1023_v56  ;;  %1423 = vrot.lane.b32.xlu1 %v5591_v51, %s5291_s4  ;;  %v1362_v56 = vld [vmem:[#allocation2 + $0xf8] sm:$0xff] }
 0x154   : > { %1421 = vrot.lane.b32.xlu0 %v5653_v35, %s5291_s4  ;;  %v1738_v35 = vld [vmem:[#allocation2 + $0x82] sm:$0xff] }
 0x155   : > { %v1029_v26 = vpop.permute.xlu1 %1028 }
 0x156   : > { %v1027_v9 = vpop.permute.xlu0 %1026  ;;  %1122 = vst.msk [vmem:[#allocation3 + $0x18] sm:$0xff] %vm1118_vm6, %v1029_v26 }
 0x157   : > { %1121 = vst.msk [vmem:[#allocation3 + $0x10] sm:$0xff] %vm1118_vm6, %v1027_v9  ;;  %1616 = vrot.lane.b32.xlu1 %v1545_v6, %s5292_s7  ;;  %v1554_v6 = vld [vmem:[#allocation2 + $0xf1] sm:$0xff]  ;;  %v1555_v9 = vld [vmem:[#allocation2 + $0xf9] sm:$0xff] }
 0x158   : > { %1614 = vrot.lane.b32.xlu0 %v1544_v8, %s5292_s7 }
 0x159   : > { %v1033_v34 = vpop.permute.xlu1 %1032 }
 0x15a   : > { %v1031_v16 = vpop.permute.xlu0 %1030  ;;  %1124 = vst.msk [vmem:[#allocation3 + $0x28] sm:$0xff] %vm1118_vm6, %v1033_v34 }
 0x15b   : > { %1123 = vst.msk [vmem:[#allocation3 + $0x20] sm:$0xff] %vm1118_vm6, %v1031_v16  ;;  %1231 = vrot.lane.b32.xlu1 %v1737_v21, %s5290_s22  ;;  %v1747_v16 = vld [vmem:[#allocation2 + $0xf2] sm:$0xff] }
 0x15c   : > { %1807 = vrot.lane.b32.xlu0 %v1737_v21, %s5293_s8 }
 0x15d   : > { %v1037_v13 = vpop.permute.xlu1 %1036 }
 0x15e   : > { %v1035_v51 = vpop.permute.xlu0 %1034  ;;  %1126 = vst.msk [vmem:[#allocation3 + $0x38] sm:$0xff] %vm1118_vm6, %v1037_v13 }
 0x15f   : > { %1125 = vst.msk [vmem:[#allocation3 + $0x30] sm:$0xff] %vm1118_vm6, %v1035_v51  ;;  %1233 = vrot.lane.b32.xlu1 %v1738_v35, %s5290_s22  ;;  %v1748_v51 = vld [vmem:[#allocation2 + $0xfa] sm:$0xff] }
 0x160   : > { %1809 = vrot.lane.b32.xlu0 %v1738_v35, %s5293_s8 }
 0x161   : > { %v1041_v12 = vpop.permute.xlu1 %1040 }
 0x162   : > { %v1039_v31 = vpop.permute.xlu0 %1038  ;;  %1128 = vst.msk [vmem:[#allocation3 + $0x48] sm:$0xff] %vm1118_vm6, %v1041_v12 }
 0x163   : > { %1127 = vst.msk [vmem:[#allocation3 + $0x40] sm:$0xff] %vm1118_vm6, %v1039_v31  ;;  %1427 = vrot.lane.b32.xlu1 %v5598_v57, %s5291_s4  ;;  %v1740_v57 = vld [vmem:[#allocation2 + $0x9a] sm:$0xff] }
 0x164   : > { %1425 = vrot.lane.b32.xlu0 %v5660_v60, %s5291_s4 }
 0x165   : > { %v1045_v17 = vpop.permute.xlu1 %1044 }
 0x166   : > { %v1043_v4 = vpop.permute.xlu0 %1042  ;;  %1130 = vst.msk [vmem:[#allocation3 + $0x58] sm:$0xff] %vm1118_vm6, %v1045_v17 }
 0x167   : > { %1129 = vst.msk [vmem:[#allocation3 + $0x50] sm:$0xff] %vm1118_vm6, %v1043_v4  ;;  %1620 = vrot.lane.b32.xlu1 %v1547_v2, %s5292_s7  ;;  %v1363_v2 = vld [vmem:[#allocation2 + $0x108] sm:$0xff] }
 0x168   : > { %1618 = vrot.lane.b32.xlu0 %v1546_v45, %s5292_s7 }
 0x169   : > { %v1049_v11 = vpop.permute.xlu1 %1048 }
 0x16a   : > { %v1047_v10 = vpop.permute.xlu0 %1046  ;;  %1132 = vst.msk [vmem:[#allocation3 + $0x68] sm:$0xff] %vm1118_vm6, %v1049_v11 }
 0x16b   : > { %1131 = vst.msk [vmem:[#allocation3 + $0x60] sm:$0xff] %vm1118_vm6, %v1047_v10  ;;  %1235 = vrot.lane.b32.xlu1 %v1739_v22, %s5290_s22  ;;  %v1556_v10 = vld [vmem:[#allocation2 + $0x109] sm:$0xff] }
 0x16c   : > { %1811 = vrot.lane.b32.xlu0 %v1739_v22, %s5293_s8  ;;  %v1364_v22 = vld [vmem:[#allocation2 + $0x110] sm:$0xff] }
 0x16d   : > { %v1053_v0 = vpop.permute.xlu1 %1052 }
 0x16e   : > { %v1051_v60 = vpop.permute.xlu0 %1050  ;;  %1134 = vst.msk [vmem:[#allocation3 + $0x78] sm:$0xff] %vm1118_vm6, %v1053_v0  ;;  %v1749_v0 = vld [vmem:[#allocation2 + $0x10a] sm:$0xff] }
 0x16f   : > { %1133 = vst.msk [vmem:[#allocation3 + $0x70] sm:$0xff] %vm1118_vm6, %v1051_v60  ;;  %1237 = vrot.lane.b32.xlu1 %v1740_v57, %s5290_s22  ;;  %v1557_v60 = vld [vmem:[#allocation2 + $0x111] sm:$0xff] }
 0x170   : > { %1813 = vrot.lane.b32.xlu0 %v1740_v57, %s5293_s8 }
 0x171   : > { %v1057_v25 = vpop.permute.xlu1 %1056 }
 0x172   : > { %v1055_v5 = vpop.permute.xlu0 %1054  ;;  %1136 = vst.msk [vmem:[#allocation3 + $0x88] sm:$0xff] %vm1118_vm6, %v1057_v25 }
 0x173   : > { %1135 = vst.msk [vmem:[#allocation3 + $0x80] sm:$0xff] %vm1118_vm6, %v1055_v5  ;;  %1431 = vrot.lane.b32.xlu1 %v5611_v61, %s5291_s4  ;;  %v1742_v61 = vld [vmem:[#allocation2 + $0xb2] sm:$0xff] }
 0x174   : > { %1429 = vrot.lane.b32.xlu0 %v5678_v33, %s5291_s4 }
 0x175   : > { %v1061_v30 = vpop.permute.xlu1 %1060 }
 0x176   : > { %v1059_v29 = vpop.permute.xlu0 %1058  ;;  %1138 = vst.msk [vmem:[#allocation3 + $0x98] sm:$0xff] %vm1118_vm6, %v1061_v30 }
 0x177   : > { %1137 = vst.msk [vmem:[#allocation3 + $0x90] sm:$0xff] %vm1118_vm6, %v1059_v29  ;;  %1624 = vrot.lane.b32.xlu1 %v1549_v28, %s5292_s7  ;;  %v1750_v29 = vld [vmem:[#allocation2 + $0x112] sm:$0xff] }
 0x178   : > { %1622 = vrot.lane.b32.xlu0 %v1548_v27, %s5292_s7 }
 0x179   : > { %v1065_v44 = vpop.permute.xlu1 %1064 }
 0x17a   : > { %v1063_v43 = vpop.permute.xlu0 %1062  ;;  %1140 = vst.msk [vmem:[#allocation3 + $0xa8] sm:$0xff] %vm1118_vm6, %v1065_v44 }
 0x17b   : > { %1139 = vst.msk [vmem:[#allocation3 + $0xa0] sm:$0xff] %vm1118_vm6, %v1063_v43  ;;  %1239 = vrot.lane.b32.xlu1 %v1741_v32, %s5290_s22  ;;  %v1365_v43 = vld [vmem:[#allocation2 + $0x120] sm:$0xff] }
 0x17c   : > { %1815 = vrot.lane.b32.xlu0 %v1741_v32, %s5293_s8 }
 0x17d   : > { %v1069_v49 = vpop.permute.xlu1 %1068 }
 0x17e   : > { %v1067_v33 = vpop.permute.xlu0 %1066  ;;  %1142 = vst.msk [vmem:[#allocation3 + $0xb8] sm:$0xff] %vm1118_vm6, %v1069_v49  ;;  %v1558_v49 = vld [vmem:[#allocation2 + $0x121] sm:$0xff] }
 0x17f   : > { %1141 = vst.msk [vmem:[#allocation3 + $0xb0] sm:$0xff] %vm1118_vm6, %v1067_v33  ;;  %1241 = vrot.lane.b32.xlu1 %v1742_v61, %s5290_s22  ;;  %v1366_v33 = vld [vmem:[#allocation2 + $0x128] sm:$0xff] }
 0x180   : > { %1817 = vrot.lane.b32.xlu0 %v1742_v61, %s5293_s8 }
 0x181   : > { %v1073_v41 = vpop.permute.xlu1 %1072 }
 0x182   : > { %v1071_v38 = vpop.permute.xlu0 %1070  ;;  %1144 = vst.msk [vmem:[#allocation3 + $0xc8] sm:$0xff] %vm1118_vm6, %v1073_v41 }
 0x183   : > { %1143 = vst.msk [vmem:[#allocation3 + $0xc0] sm:$0xff] %vm1118_vm6, %v1071_v38  ;;  %1435 = vrot.lane.b32.xlu1 %v5618_v40, %s5291_s4  ;;  %v259_v40 = vld [vmem:[#allocation2 + $0x19a] sm:$0x1] }
 0x184   : > { %1433 = vrot.lane.b32.xlu0 %v5690_v19, %s5291_s4  ;;  %278 = vst.msk [vmem:[#allocation2 + $0x198] sm:$0x1] %vm260_vm1, %v259_v40 }
 0x185   : > { %v1077_v59 = vpop.permute.xlu1 %1076 }
 0x186   : > { %v1075_v54 = vpop.permute.xlu0 %1074  ;;  %1146 = vst.msk [vmem:[#allocation3 + $0xd8] sm:$0xff] %vm1118_vm6, %v1077_v59 }
 0x187   : > { %1145 = vst.msk [vmem:[#allocation3 + $0xd0] sm:$0xff] %vm1118_vm6, %v1075_v54  ;;  %1628 = vrot.lane.b32.xlu1 %v1551_v53, %s5292_s7  ;;  %v1559_v53 = vld [vmem:[#allocation2 + $0x129] sm:$0xff] }
 0x188   : > { %1626 = vrot.lane.b32.xlu0 %v1550_v50, %s5292_s7  ;;  %v1751_v54 = vld [vmem:[#allocation2 + $0x122] sm:$0xff] }
 0x189   : > { %v1081_v46 = vpop.permute.xlu1 %1080 }
 0x18a   : > { %v1079_v19 = vpop.permute.xlu0 %1078  ;;  %1148 = vst.msk [vmem:[#allocation3 + $0xe8] sm:$0xff] %vm1118_vm6, %v1081_v46 }
 0x18b   : > { %1147 = vst.msk [vmem:[#allocation3 + $0xe0] sm:$0xff] %vm1118_vm6, %v1079_v19  ;;  %1243 = vrot.lane.b32.xlu1 %v1743_v39, %s5290_s22  ;;  %v1752_v19 = vld [vmem:[#allocation2 + $0x12a] sm:$0xff] }
 0x18c   : > { %1819 = vrot.lane.b32.xlu0 %v1743_v39, %s5293_s8 }
 0x18d   : > { %v1085_v52 = vpop.permute.xlu1 %1084 }
 0x18e   : > { %v1083_v24 = vpop.permute.xlu0 %1082  ;;  %1150 = vst.msk [vmem:[#allocation3 + $0xf8] sm:$0xff] %vm1118_vm6, %v1085_v52 }
 0x18f   : > { %1149 = vst.msk [vmem:[#allocation3 + $0xf0] sm:$0xff] %vm1118_vm6, %v1083_v24  ;;  %1245 = vrot.lane.b32.xlu1 %v1744_v58, %s5290_s22 }
 0x190   : > { %1821 = vrot.lane.b32.xlu0 %v1744_v58, %s5293_s8  ;;  %v1367_v58 = vld [vmem:[#allocation2 + $0x138] sm:$0xff] }
 0x191   : > { %v1218_v42 = vpop.permute.xlu1 %1217 }
 0x192   : > { %v1216_v37 = vpop.permute.xlu0 %1215  ;;  %1313 = vst.msk [vmem:[#allocation3 + $0x8] sm:$0xff] %vm1311_vm7, %v1218_v42  ;;  %v1560_v42 = vld [vmem:[#allocation2 + $0x139] sm:$0xff] }
 0x193   : > { %1312 = vst.msk [vmem:[#allocation3] sm:$0xff] %vm1311_vm7, %v1216_v37  ;;  %1439 = vrot.lane.b32.xlu1 %v5625_v48, %s5291_s4  ;;  %v1746_v48 = vld [vmem:[#allocation2 + $0xe2] sm:$0xff] }
 0x194   : > { %1437 = vrot.lane.b32.xlu0 %v5694_v18, %s5291_s4  ;;  %v1368_v37 = vld [vmem:[#allocation2 + $0x140] sm:$0xff] }
 0x195   : > { %v1222_v7 = vpop.permute.xlu1 %1221 }
 0x196   : > { %v1220_v3 = vpop.permute.xlu0 %1219  ;;  %1315 = vst.msk [vmem:[#allocation3 + $0x18] sm:$0xff] %vm1311_vm7, %v1222_v7  ;;  %v1753_v7 = vld [vmem:[#allocation2 + $0x13a] sm:$0xff] }
 0x197   : > { %1314 = vst.msk [vmem:[#allocation3 + $0x10] sm:$0xff] %vm1311_vm7, %v1220_v3  ;;  %1632 = vrot.lane.b32.xlu1 %v1553_v23, %s5292_s7  ;;  %v1561_v3 = vld [vmem:[#allocation2 + $0x141] sm:$0xff] }
 0x198   : > { %1630 = vrot.lane.b32.xlu0 %v1552_v20, %s5292_s7 }
 0x199   : > { %v1226_v15 = vpop.permute.xlu1 %1225 }
 0x19a   : > { %v1224_v18 = vpop.permute.xlu0 %1223  ;;  %1317 = vst.msk [vmem:[#allocation3 + $0x28] sm:$0xff] %vm1311_vm7, %v1226_v15 }
 0x19b   : > { %1316 = vst.msk [vmem:[#allocation3 + $0x20] sm:$0xff] %vm1311_vm7, %v1224_v18  ;;  %1247 = vrot.lane.b32.xlu1 %v1745_v14, %s5290_s22 }
 0x19c   : > { %1823 = vrot.lane.b32.xlu0 %v1745_v14, %s5293_s8 }
 0x19d   : > { %v1412_v47 = vpop.permute.xlu1 %1411 }
 0x19e   : > { %v1410_v36 = vpop.permute.xlu0 %1409  ;;  %1507 = vst.msk [vmem:[#allocation3 + $0x8] sm:$0xff] %vm1505_vm8, %v1412_v47 }
 0x19f   : > { %1506 = vst.msk [vmem:[#allocation3] sm:$0xff] %vm1505_vm8, %v1410_v36  ;;  %1249 = vrot.lane.b32.xlu1 %v1746_v48, %s5290_s22 }
 0x1a0   : > { %1825 = vrot.lane.b32.xlu0 %v1746_v48, %s5293_s8  ;;  %v1754_v48 = vld [vmem:[#allocation2 + $0x142] sm:$0xff] }
 0x1a1   : > { %v1605_v8 = vpop.permute.xlu1 %1604 }
 0x1a2   : > { %v1603_v1 = vpop.permute.xlu0 %1602  ;;  %1700 = vst.msk [vmem:[#allocation3 + $0x8] sm:$0xff] %vm1698_vm9, %v1605_v8  ;;  %v1370_v8 = vld [vmem:[#allocation2 + $0x158] sm:$0xff] }
 0x1a3   : > { %1699 = vst.msk [vmem:[#allocation3] sm:$0xff] %vm1698_vm9, %v1603_v1  ;;  %1443 = vrot.lane.b32.xlu1 %v1362_v56, %s5291_s4 }
 0x1a4   : > { %1441 = vrot.lane.b32.xlu0 %v1361_v63, %s5291_s4  ;;  %v1369_v63 = vld [vmem:[#allocation2 + $0x150] sm:$0xff] }
 0x1a5   : > { %v1798_v21 = vpop.permute.xlu1 %1797 }
 0x1a6   : > { %v1796_v26 = vpop.permute.xlu0 %1795  ;;  %1893 = vst.msk [vmem:[#allocation3 + $0x8] sm:$0xff] %vm1891_vm10, %v1798_v21 }
 0x1a7   : > { %1892 = vst.msk [vmem:[#allocation3] sm:$0xff] %vm1891_vm10, %v1796_v26  ;;  %1636 = vrot.lane.b32.xlu1 %v1555_v9, %s5292_s7 }
 0x1a8   : > { %1634 = vrot.lane.b32.xlu0 %v1554_v6, %s5292_s7  ;;  %v1562_v6 = vld [vmem:[#allocation2 + $0x151] sm:$0xff] }
 0x1a9   : > { %v1416_v35 = vpop.permute.xlu1 %1415 }
 0x1aa   : > { %v1414_v34 = vpop.permute.xlu0 %1413  ;;  %1509 = vst.msk [vmem:[#allocation3 + $0x18] sm:$0xff] %vm1505_vm8, %v1416_v35 }
 0x1ab   : > { %1508 = vst.msk [vmem:[#allocation3 + $0x10] sm:$0xff] %vm1505_vm8, %v1414_v34  ;;  %1251 = vrot.lane.b32.xlu1 %v1747_v16, %s5290_s22  ;;  %v1755_v34 = vld [vmem:[#allocation2 + $0x152] sm:$0xff] }
 0x1ac   : > { %1827 = vrot.lane.b32.xlu0 %v1747_v16, %s5293_s8  ;;  %v1563_v16 = vld [vmem:[#allocation2 + $0x159] sm:$0xff] }
 0x1ad   : > { %v1609_v31 = vpop.permute.xlu1 %1608  ;;  %v1925_v45 = vld [vmem:[#allocation3 + $0x8] sm:$0xff] }
 0x1ae   : > { %v1607_v13 = vpop.permute.xlu0 %1606  ;;  %v1924_v12 = vld [vmem:[#allocation3] sm:$0xff]  ;;  %1702 = vst.msk [vmem:[#allocation3 + $0x18] sm:$0xff] %vm1698_vm9, %v1609_v31  ;;  %v1756_v31 = vld [vmem:[#allocation2 + $0x15a] sm:$0xff] }
 0x1af   : > { %1701 = vst.msk [vmem:[#allocation3 + $0x10] sm:$0xff] %vm1698_vm9, %v1607_v13  ;;  %5152 = vmatprep.mubr.msk.f32.mxu0 %vm1961_vm11, %v1924_v12  ;;  %1253 = vrot.lane.b32.xlu1 %v1748_v51, %s5290_s22 }
 0x1b0   : > { %1829 = vrot.lane.b32.xlu0 %v1748_v51, %s5293_s8  ;;  %5153 = vmatmul.mubr.msk.f32.vlgmr.msra.gmra.mxu0 %vm1961_vm11, %v1925_v45 }
 0x1b1   : > { %v1802_v17 = vpop.permute.xlu1 %1801 }
 0x1b2   : > { %v1800_v4 = vpop.permute.xlu0 %1799  ;;  %1895 = vst.msk [vmem:[#allocation3 + $0x18] sm:$0xff] %vm1891_vm10, %v1802_v17 }
 0x1b3   : > { %1894 = vst.msk [vmem:[#allocation3 + $0x10] sm:$0xff] %vm1891_vm10, %v1800_v4  ;;  %1447 = vrot.lane.b32.xlu1 %v1364_v22, %s5291_s4  ;;  %v1372_v22 = vld [vmem:[#allocation2 + $0x170] sm:$0xff] }
 0x1b4   : > { %1445 = vrot.lane.b32.xlu0 %v1363_v2, %s5291_s4  ;;  %v1371_v2 = vld [vmem:[#allocation2 + $0x168] sm:$0xff] }
 0x1b5   : > { %v1420_v57 = vpop.permute.xlu1 %1419 }
 0x1b6   : > { %v1418_v11 = vpop.permute.xlu0 %1417  ;;  %1511 = vst.msk [vmem:[#allocation3 + $0x28] sm:$0xff] %vm1505_vm8, %v1420_v57 }
 0x1b7   : > { %1510 = vst.msk [vmem:[#allocation3 + $0x20] sm:$0xff] %vm1505_vm8, %v1418_v11  ;;  %1640 = vrot.lane.b32.xlu1 %v1557_v60, %s5292_s7 }
 0x1b8   : > { %1638 = vrot.lane.b32.xlu0 %v1556_v10, %s5292_s7  ;;  %v1564_v10 = vld [vmem:[#allocation2 + $0x169] sm:$0xff] }
 0x1b9   : > { %v1613_v25 = vpop.permute.xlu1 %1612  ;;  %v1927_v28 = vld [vmem:[#allocation3 + $0x18] sm:$0xff] }
 0x1ba   : > { %v1611_v5 = vpop.permute.xlu0 %1610  ;;  %v1926_v27 = vld [vmem:[#allocation3 + $0x10] sm:$0xff]  ;;  %1704 = vst.msk [vmem:[#allocation3 + $0x28] sm:$0xff] %vm1698_vm9, %v1613_v25 }
 0x1bb   : > { %1703 = vst.msk [vmem:[#allocation3 + $0x20] sm:$0xff] %vm1698_vm9, %v1611_v5  ;;  %5155 = vmatprep.mubr.msk.f32.mxu0 %vm1961_vm11, %v1926_v27  ;;  %1255 = vrot.lane.b32.xlu1 %v1749_v0, %s5290_s22  ;;  %v1757_v5 = vld [vmem:[#allocation2 + $0x16a] sm:$0xff] }
 0x1bc   : > { %1831 = vrot.lane.b32.xlu0 %v1749_v0, %s5293_s8  ;;  %5156 = vmatmul.mubr.msk.f32.gmra.mxu0 %vm1961_vm11, %v1927_v28  ;;  %v1565_v0 = vld [vmem:[#allocation2 + $0x171] sm:$0xff] }
 0x1bd   : > { %v1228_v32 = vpop.permute.xlu1 %1227 }
 0x1be   : > { %v1804_v30 = vpop.permute.xlu0 %1803  ;;  %1318 = vst.msk [vmem:[#allocation3 + $0x30] sm:$0xff] %vm1311_vm7, %v1228_v32 }
 0x1bf   : > { %1896 = vst.msk [vmem:[#allocation3 + $0x20] sm:$0xff] %vm1891_vm10, %v1804_v30  ;;  %1257 = vrot.lane.b32.xlu1 %v1750_v29, %s5290_s22 }
 0x1c0   : > { %1833 = vrot.lane.b32.xlu0 %v1750_v29, %s5293_s8  ;;  %v1758_v29 = vld [vmem:[#allocation2 + $0x172] sm:$0xff] }
 0x1c1   : > { %v1230_v61 = vpop.permute.xlu1 %1229 }
 0x1c2   : > { %v1806_v44 = vpop.permute.xlu0 %1805  ;;  %1319 = vst.msk [vmem:[#allocation3 + $0x38] sm:$0xff] %vm1311_vm7, %v1230_v61 }
 0x1c3   : > { %1897 = vst.msk [vmem:[#allocation3 + $0x28] sm:$0xff] %vm1891_vm10, %v1806_v44  ;;  %1451 = vrot.lane.b32.xlu1 %v1366_v33, %s5291_s4  ;;  %v1374_v33 = vld [vmem:[#allocation2 + $0x188] sm:$0xff] }
 0x1c4   : > { %1449 = vrot.lane.b32.xlu0 %v1365_v43, %s5291_s4  ;;  %v1373_v43 = vld [vmem:[#allocation2 + $0x180] sm:$0xff] }
 0x1c5   : > { %v1424_v41 = vpop.permute.xlu1 %1423 }
 0x1c6   : > { %v1422_v38 = vpop.permute.xlu0 %1421  ;;  %v1928_v50 = vld [vmem:[#allocation3 + $0x20] sm:$0xff]  ;;  %1513 = vst.msk [vmem:[#allocation3 + $0x38] sm:$0xff] %vm1505_vm8, %v1424_v41 }
 0x1c7   : > { %1512 = vst.msk [vmem:[#allocation3 + $0x30] sm:$0xff] %vm1505_vm8, %v1422_v38  ;;  %5158 = vmatprep.mubr.msk.f32.mxu0 %vm1961_vm11, %v1928_v50  ;;  %1644 = vrot.lane.b32.xlu1 %v1559_v53, %s5292_s7  ;;  %v1567_v53 = vld [vmem:[#allocation2 + $0x189] sm:$0xff] }
 0x1c8   : > { %1642 = vrot.lane.b32.xlu0 %v1558_v49, %s5292_s7  ;;  %v1566_v49 = vld [vmem:[#allocation2 + $0x181] sm:$0xff] }
 0x1c9   : > { %v1617_v62 = vpop.permute.xlu1 %1616 }
 0x1ca   : > { %v1615_v59 = vpop.permute.xlu0 %1614  ;;  %v1929_v39 = vld [vmem:[#allocation3 + $0x28] sm:$0xff]  ;;  %1706 = vst.msk [vmem:[#allocation3 + $0x38] sm:$0xff] %vm1698_vm9, %v1617_v62 }
 0x1cb   : > { %1705 = vst.msk [vmem:[#allocation3 + $0x30] sm:$0xff] %vm1698_vm9, %v1615_v59  ;;  %5159 = vmatmul.mubr.msk.f32.gmra.mxu0 %vm1961_vm11, %v1929_v39  ;;  %1259 = vrot.lane.b32.xlu1 %v1751_v54, %s5290_s22 }
 0x1cc   : > { %1835 = vrot.lane.b32.xlu0 %v1751_v54, %s5293_s8  ;;  %v1759_v54 = vld [vmem:[#allocation2 + $0x182] sm:$0xff] }
 0x1cd   : > { %v1232_v40 = vpop.permute.xlu1 %1231 }
 0x1ce   : > { %v1808_v46 = vpop.permute.xlu0 %1807  ;;  %1320 = vst.msk [vmem:[#allocation3 + $0x40] sm:$0xff] %vm1311_vm7, %v1232_v40 }
 0x1cf   : > { %1898 = vst.msk [vmem:[#allocation3 + $0x30] sm:$0xff] %vm1891_vm10, %v1808_v46  ;;  %1261 = vrot.lane.b32.xlu1 %v1752_v19, %s5290_s22 }
 0x1d0   : > { %1837 = vrot.lane.b32.xlu0 %v1752_v19, %s5293_s8  ;;  %v1760_v19 = vld [vmem:[#allocation2 + $0x18a] sm:$0xff] }
 0x1d1   : > { %v1234_v52 = vpop.permute.xlu1 %1233 }
 0x1d2   : > { %v1810_v24 = vpop.permute.xlu0 %1809  ;;  %1321 = vst.msk [vmem:[#allocation3 + $0x48] sm:$0xff] %vm1311_vm7, %v1234_v52 }
 0x1d3   : > { %1899 = vst.msk [vmem:[#allocation3 + $0x38] sm:$0xff] %vm1891_vm10, %v1810_v24  ;;  %1455 = vrot.lane.b32.xlu1 %v1368_v37, %s5291_s4  ;;  %v1376_v37 = vld [vmem:[#allocation2 + $0x1a0] sm:$0xff] }
 0x1d4   : > { %1453 = vrot.lane.b32.xlu0 %v1367_v58, %s5291_s4  ;;  %v1375_v58 = vld [vmem:[#allocation2 + $0x198] sm:$0xff] }
 0x1d5   : > { %v1428_v20 = vpop.permute.xlu1 %1427 }
 0x1d6   : > { %v1426_v55 = vpop.permute.xlu0 %1425  ;;  %v1930_v23 = vld [vmem:[#allocation3 + $0x30] sm:$0xff]  ;;  %1515 = vst.msk [vmem:[#allocation3 + $0x48] sm:$0xff] %vm1505_vm8, %v1428_v20 }
 0x1d7   : > { %1514 = vst.msk [vmem:[#allocation3 + $0x40] sm:$0xff] %vm1505_vm8, %v1426_v55  ;;  %5161 = vmatprep.mubr.msk.f32.mxu0 %vm1961_vm11, %v1930_v23  ;;  %1648 = vrot.lane.b32.xlu1 %v1561_v3, %s5292_s7  ;;  %v1569_v3 = vld [vmem:[#allocation2 + $0x1a1] sm:$0xff] }
 0x1d8   : > { %1646 = vrot.lane.b32.xlu0 %v1560_v42, %s5292_s7  ;;  %v1568_v42 = vld [vmem:[#allocation2 + $0x199] sm:$0xff] }
 0x1d9   : > { %v1621_v18 = vpop.permute.xlu1 %1620 }
 0x1da   : > { %v1619_v14 = vpop.permute.xlu0 %1618  ;;  %v1931_v15 = vld [vmem:[#allocation3 + $0x38] sm:$0xff]  ;;  %1708 = vst.msk [vmem:[#allocation3 + $0x48] sm:$0xff] %vm1698_vm9, %v1621_v18 }
 0x1db   : > { %1707 = vst.msk [vmem:[#allocation3 + $0x40] sm:$0xff] %vm1698_vm9, %v1619_v14  ;;  %5162 = vmatmul.mubr.msk.f32.gmra.mxu0 %vm1961_vm11, %v1931_v15  ;;  %1263 = vrot.lane.b32.xlu1 %v1753_v7, %s5290_s22 }
 0x1dc   : > { %1839 = vrot.lane.b32.xlu0 %v1753_v7, %s5293_s8  ;;  %v1761_v7 = vld [vmem:[#allocation2 + $0x19a] sm:$0xff] }
 0x1dd   : > { %v1236_v47 = vpop.permute.xlu1 %1235 }
 0x1de   : > { %v1812_v36 = vpop.permute.xlu0 %1811  ;;  %1322 = vst.msk [vmem:[#allocation3 + $0x50] sm:$0xff] %vm1311_vm7, %v1236_v47 }
 0x1df   : > { %1900 = vst.msk [vmem:[#allocation3 + $0x40] sm:$0xff] %vm1891_vm10, %v1812_v36  ;;  %1265 = vrot.lane.b32.xlu1 %v1754_v48, %s5290_s22 }
 0x1e0   : > { %1841 = vrot.lane.b32.xlu0 %v1754_v48, %s5293_s8  ;;  %v1762_v48 = vld [vmem:[#allocation2 + $0x1a2] sm:$0xff] }
 0x1e1   : > { %v1238_v1 = vpop.permute.xlu1 %1237 }
 0x1e2   : > { %v1814_v56 = vpop.permute.xlu0 %1813  ;;  %1323 = vst.msk [vmem:[#allocation3 + $0x58] sm:$0xff] %vm1311_vm7, %v1238_v1 }
 0x1e3   : > { %1901 = vst.msk [vmem:[#allocation3 + $0x48] sm:$0xff] %vm1891_vm10, %v1814_v56  ;;  %1459 = vrot.lane.b32.xlu1 %v1370_v8, %s5291_s4 }
 0x1e4   : > { %1457 = vrot.lane.b32.xlu0 %v1369_v63, %s5291_s4 }
 0x1e5   : > { %v1432_v26 = vpop.permute.xlu1 %1431 }
 0x1e6   : > { %v1430_v9 = vpop.permute.xlu0 %1429  ;;  %v1932_v21 = vld [vmem:[#allocation3 + $0x40] sm:$0xff]  ;;  %1517 = vst.msk [vmem:[#allocation3 + $0x58] sm:$0xff] %vm1505_vm8, %v1432_v26 }
 0x1e7   : > { %1516 = vst.msk [vmem:[#allocation3 + $0x50] sm:$0xff] %vm1505_vm8, %v1430_v9  ;;  %5164 = vmatprep.mubr.msk.f32.mxu0 %vm1961_vm11, %v1932_v21  ;;  %1652 = vrot.lane.b32.xlu1 %v1563_v16, %s5292_s7 }
 0x1e8   : > { %1650 = vrot.lane.b32.xlu0 %v1562_v6, %s5292_s7 }
 0x1e9   : > { %v1625_v51 = vpop.permute.xlu1 %1624 }
 0x1ea   : > { %v1623_v35 = vpop.permute.xlu0 %1622  ;;  %v1933_v13 = vld [vmem:[#allocation3 + $0x48] sm:$0xff]  ;;  %1710 = vst.msk [vmem:[#allocation3 + $0x58] sm:$0xff] %vm1698_vm9, %v1625_v51 }
 0x1eb   : > { %1709 = vst.msk [vmem:[#allocation3 + $0x50] sm:$0xff] %vm1698_vm9, %v1623_v35  ;;  %5165 = vmatmul.mubr.msk.f32.gmra.mxu0 %vm1961_vm11, %v1933_v13  ;;  %1267 = vrot.lane.b32.xlu1 %v1755_v34, %s5290_s22 }
 0x1ec   : > { %1843 = vrot.lane.b32.xlu0 %v1755_v34, %s5293_s8 }
 0x1ed   : > { %v1240_v45 = vpop.permute.xlu1 %1239 }
 0x1ee   : > { %v1816_v12 = vpop.permute.xlu0 %1815  ;;  %1324 = vst.msk [vmem:[#allocation3 + $0x60] sm:$0xff] %vm1311_vm7, %v1240_v45 }
 0x1ef   : > { %1902 = vst.msk [vmem:[#allocation3 + $0x50] sm:$0xff] %vm1891_vm10, %v1816_v12  ;;  %1269 = vrot.lane.b32.xlu1 %v1756_v31, %s5290_s22 }
 0x1f0   : > { %1845 = vrot.lane.b32.xlu0 %v1756_v31, %s5293_s8 }
 0x1f1   : > { %v1242_v17 = vpop.permute.xlu1 %1241 }
 0x1f2   : > { %v1818_v4 = vpop.permute.xlu0 %1817  ;;  %1325 = vst.msk [vmem:[#allocation3 + $0x68] sm:$0xff] %vm1311_vm7, %v1242_v17 }
 0x1f3   : > { %1903 = vst.msk [vmem:[#allocation3 + $0x58] sm:$0xff] %vm1891_vm10, %v1818_v4  ;;  %1463 = vrot.lane.b32.xlu1 %v1372_v22, %s5291_s4 }
 0x1f4   : > { %1461 = vrot.lane.b32.xlu0 %v1371_v2, %s5291_s4 }
 0x1f5   : > { %v1436_v57 = vpop.permute.xlu1 %1435 }
 0x1f6   : > { %v1434_v11 = vpop.permute.xlu0 %1433  ;;  %v1934_v60 = vld [vmem:[#allocation3 + $0x50] sm:$0xff]  ;;  %1519 = vst.msk [vmem:[#allocation3 + $0x68] sm:$0xff] %vm1505_vm8, %v1436_v57 }
 0x1f7   : > { %1518 = vst.msk [vmem:[#allocation3 + $0x60] sm:$0xff] %vm1505_vm8, %v1434_v11  ;;  %5167 = vmatprep.mubr.msk.f32.mxu0 %vm1961_vm11, %v1934_v60  ;;  %1656 = vrot.lane.b32.xlu1 %v1565_v0, %s5292_s7 }
 0x1f8   : > { %1654 = vrot.lane.b32.xlu0 %v1564_v10, %s5292_s7 }
 0x1f9   : > { %v1629_v27 = vpop.permute.xlu1 %1628 }
 0x1fa   : > { %v1627_v25 = vpop.permute.xlu0 %1626  ;;  %v1935_v28 = vld [vmem:[#allocation3 + $0x58] sm:$0xff]  ;;  %1712 = vst.msk [vmem:[#allocation3 + $0x68] sm:$0xff] %vm1698_vm9, %v1629_v27 }
 0x1fb   : > { %1711 = vst.msk [vmem:[#allocation3 + $0x60] sm:$0xff] %vm1698_vm9, %v1627_v25  ;;  %5168 = vmatmul.mubr.msk.f32.gmra.mxu0 %vm1961_vm11, %v1935_v28  ;;  %1271 = vrot.lane.b32.xlu1 %v1757_v5, %s5290_s22 }
 0x1fc   : > { %1847 = vrot.lane.b32.xlu0 %v1757_v5, %s5293_s8 }
 0x1fd   : > { %v1244_v32 = vpop.permute.xlu1 %1243 }
 0x1fe   : > { %v1820_v30 = vpop.permute.xlu0 %1819  ;;  %1326 = vst.msk [vmem:[#allocation3 + $0x70] sm:$0xff] %vm1311_vm7, %v1244_v32 }
 0x1ff   : > { %1904 = vst.msk [vmem:[#allocation3 + $0x60] sm:$0xff] %vm1891_vm10, %v1820_v30  ;;  %1273 = vrot.lane.b32.xlu1 %v1758_v29, %s5290_s22 }
 0x200   : > { %1849 = vrot.lane.b32.xlu0 %v1758_v29, %s5293_s8 }
 0x201   : > { %v1246_v61 = vpop.permute.xlu1 %1245 }
 0x202   : > { %v1822_v44 = vpop.permute.xlu0 %1821  ;;  %1327 = vst.msk [vmem:[#allocation3 + $0x78] sm:$0xff] %vm1311_vm7, %v1246_v61 }
 0x203   : > { %1905 = vst.msk [vmem:[#allocation3 + $0x68] sm:$0xff] %vm1891_vm10, %v1822_v44  ;;  %1467 = vrot.lane.b32.xlu1 %v1374_v33, %s5291_s4 }
 0x204   : > { %1465 = vrot.lane.b32.xlu0 %v1373_v43, %s5291_s4 }
 0x205   : > { %v1440_v41 = vpop.permute.xlu1 %1439 }
 0x206   : > { %v1438_v38 = vpop.permute.xlu0 %1437  ;;  %v1936_v50 = vld [vmem:[#allocation3 + $0x60] sm:$0xff]  ;;  %1521 = vst.msk [vmem:[#allocation3 + $0x78] sm:$0xff] %vm1505_vm8, %v1440_v41 }
 0x207   : > { %1520 = vst.msk [vmem:[#allocation3 + $0x70] sm:$0xff] %vm1505_vm8, %v1438_v38  ;;  %5170 = vmatprep.mubr.msk.f32.mxu0 %vm1961_vm11, %v1936_v50  ;;  %1660 = vrot.lane.b32.xlu1 %v1567_v53, %s5292_s7 }
 0x208   : > { %1658 = vrot.lane.b32.xlu0 %v1566_v49, %s5292_s7 }
 0x209   : > { %v1633_v62 = vpop.permute.xlu1 %1632 }
 0x20a   : > { %v1631_v59 = vpop.permute.xlu0 %1630  ;;  %v1937_v39 = vld [vmem:[#allocation3 + $0x68] sm:$0xff]  ;;  %1714 = vst.msk [vmem:[#allocation3 + $0x78] sm:$0xff] %vm1698_vm9, %v1633_v62 }
 0x20b   : > { %1713 = vst.msk [vmem:[#allocation3 + $0x70] sm:$0xff] %vm1698_vm9, %v1631_v59  ;;  %5171 = vmatmul.mubr.msk.f32.gmra.mxu0 %vm1961_vm11, %v1937_v39  ;;  %1275 = vrot.lane.b32.xlu1 %v1759_v54, %s5290_s22 }
 0x20c   : > { %1851 = vrot.lane.b32.xlu0 %v1759_v54, %s5293_s8 }
 0x20d   : > { %v1248_v40 = vpop.permute.xlu1 %1247 }
 0x20e   : > { %v1824_v46 = vpop.permute.xlu0 %1823  ;;  %1328 = vst.msk [vmem:[#allocation3 + $0x80] sm:$0xff] %vm1311_vm7, %v1248_v40 }
 0x20f   : > { %1906 = vst.msk [vmem:[#allocation3 + $0x70] sm:$0xff] %vm1891_vm10, %v1824_v46  ;;  %1277 = vrot.lane.b32.xlu1 %v1760_v19, %s5290_s22 }
 0x210   : > { %1853 = vrot.lane.b32.xlu0 %v1760_v19, %s5293_s8 }
 0x211   : > { %v1250_v52 = vpop.permute.xlu1 %1249 }
 0x212   : > { %v1826_v24 = vpop.permute.xlu0 %1825  ;;  %1329 = vst.msk [vmem:[#allocation3 + $0x88] sm:$0xff] %vm1311_vm7, %v1250_v52 }
 0x213   : > { %1907 = vst.msk [vmem:[#allocation3 + $0x78] sm:$0xff] %vm1891_vm10, %v1826_v24  ;;  %1471 = vrot.lane.b32.xlu1 %v1376_v37, %s5291_s4 }
 0x214   : > { %1469 = vrot.lane.b32.xlu0 %v1375_v58, %s5291_s4 }
 0x215   : > { %v1444_v20 = vpop.permute.xlu1 %1443 }
 0x216   : > { %v1442_v55 = vpop.permute.xlu0 %1441  ;;  %v1938_v23 = vld [vmem:[#allocation3 + $0x70] sm:$0xff]  ;;  %1523 = vst.msk [vmem:[#allocation3 + $0x88] sm:$0xff] %vm1505_vm8, %v1444_v20 }
 0x217   : > { %1522 = vst.msk [vmem:[#allocation3 + $0x80] sm:$0xff] %vm1505_vm8, %v1442_v55  ;;  %5173 = vmatprep.mubr.msk.f32.mxu0 %vm1961_vm11, %v1938_v23  ;;  %1664 = vrot.lane.b32.xlu1 %v1569_v3, %s5292_s7 }
 0x218   : > { %1662 = vrot.lane.b32.xlu0 %v1568_v42, %s5292_s7 }
 0x219   : > { %v1637_v18 = vpop.permute.xlu1 %1636 }
 0x21a   : > { %v1635_v14 = vpop.permute.xlu0 %1634  ;;  %v1939_v15 = vld [vmem:[#allocation3 + $0x78] sm:$0xff]  ;;  %1716 = vst.msk [vmem:[#allocation3 + $0x88] sm:$0xff] %vm1698_vm9, %v1637_v18 }
 0x21b   : > { %1715 = vst.msk [vmem:[#allocation3 + $0x80] sm:$0xff] %vm1698_vm9, %v1635_v14  ;;  %5174 = vmatmul.mubr.msk.f32.gmra.mxu0 %vm1961_vm11, %v1939_v15  ;;  %1857 = vrot.lane.b32.xlu1 %v1762_v48, %s5293_s8 }
 0x21c   : > { %1855 = vrot.lane.b32.xlu0 %v1761_v7, %s5293_s8 }
 0x21d   : > { %v1252_v47 = vpop.permute.xlu1 %1251 }
 0x21e   : > { %v1828_v36 = vpop.permute.xlu0 %1827  ;;  %1330 = vst.msk [vmem:[#allocation3 + $0x90] sm:$0xff] %vm1311_vm7, %v1252_v47 }
 0x21f   : > { %1908 = vst.msk [vmem:[#allocation3 + $0x80] sm:$0xff] %vm1891_vm10, %v1828_v36 }
 0x221   : > { %v1254_v56 = vpop.permute.xlu1 %1253 }
 0x222   : > { %v1830_v63 = vpop.permute.xlu0 %1829  ;;  %1331 = vst.msk [vmem:[#allocation3 + $0x98] sm:$0xff] %vm1311_vm7, %v1254_v56 }
 0x223   : > { %1909 = vst.msk [vmem:[#allocation3 + $0x88] sm:$0xff] %vm1891_vm10, %v1830_v63 }
 0x225   : > { %v1448_v6 = vpop.permute.xlu1 %1447 }
 0x226   : > { %v1446_v1 = vpop.permute.xlu0 %1445  ;;  %v1940_v8 = vld [vmem:[#allocation3 + $0x80] sm:$0xff]  ;;  %1525 = vst.msk [vmem:[#allocation3 + $0x98] sm:$0xff] %vm1505_vm8, %v1448_v6 }
 0x227   : > { %1524 = vst.msk [vmem:[#allocation3 + $0x90] sm:$0xff] %vm1505_vm8, %v1446_v1  ;;  %5176 = vmatprep.mubr.msk.f32.mxu0 %vm1961_vm11, %v1940_v8 }
 0x229   : > { %v1641_v21 = vpop.permute.xlu1 %1640 }
 0x22a   : > { %v1639_v9 = vpop.permute.xlu0 %1638  ;;  %v1941_v26 = vld [vmem:[#allocation3 + $0x88] sm:$0xff]  ;;  %1718 = vst.msk [vmem:[#allocation3 + $0x98] sm:$0xff] %vm1698_vm9, %v1641_v21 }
 0x22b   : > { %1717 = vst.msk [vmem:[#allocation3 + $0x90] sm:$0xff] %vm1698_vm9, %v1639_v9  ;;  %5177 = vmatmul.mubr.msk.f32.gmra.mxu0 %vm1961_vm11, %v1941_v26 }
 0x22d   : > { %v1256_v34 = vpop.permute.xlu1 %1255 }
 0x22e   : > { %v1832_v16 = vpop.permute.xlu0 %1831  ;;  %1332 = vst.msk [vmem:[#allocation3 + $0xa0] sm:$0xff] %vm1311_vm7, %v1256_v34 }
 0x22f   : > { %1910 = vst.msk [vmem:[#allocation3 + $0x90] sm:$0xff] %vm1891_vm10, %v1832_v16 }
 0x231   : > { %v1258_v51 = vpop.permute.xlu1 %1257 }
 0x232   : > { %v1834_v35 = vpop.permute.xlu0 %1833  ;;  %1333 = vst.msk [vmem:[#allocation3 + $0xa8] sm:$0xff] %vm1311_vm7, %v1258_v51 }
 0x233   : > { %1911 = vst.msk [vmem:[#allocation3 + $0x98] sm:$0xff] %vm1891_vm10, %v1834_v35 }
 0x235   : > { %v1452_v12 = vpop.permute.xlu1 %1451 }
 0x236   : > { %v1450_v13 = vpop.permute.xlu0 %1449  ;;  %v1942_v31 = vld [vmem:[#allocation3 + $0x90] sm:$0xff]  ;;  %1527 = vst.msk [vmem:[#allocation3 + $0xa8] sm:$0xff] %vm1505_vm8, %v1452_v12 }
 0x237   : > { %1526 = vst.msk [vmem:[#allocation3 + $0xa0] sm:$0xff] %vm1505_vm8, %v1450_v13  ;;  %5179 = vmatprep.mubr.msk.f32.mxu0 %vm1961_vm11, %v1942_v31 }
 0x239   : > { %v1645_v4 = vpop.permute.xlu1 %1644 }
 0x23a   : > { %v1643_v45 = vpop.permute.xlu0 %1642  ;;  %v1943_v2 = vld [vmem:[#allocation3 + $0x98] sm:$0xff]  ;;  %1720 = vst.msk [vmem:[#allocation3 + $0xa8] sm:$0xff] %vm1698_vm9, %v1645_v4 }
 0x23b   : > { %1719 = vst.msk [vmem:[#allocation3 + $0xa0] sm:$0xff] %vm1698_vm9, %v1643_v45  ;;  %5180 = vmatmul.mubr.msk.f32.gmra.mxu0 %vm1961_vm11, %v1943_v2 }
 0x23d   : > { %v1260_v22 = vpop.permute.xlu1 %1259 }
 0x23e   : > { %v1836_v17 = vpop.permute.xlu0 %1835  ;;  %1334 = vst.msk [vmem:[#allocation3 + $0xb0] sm:$0xff] %vm1311_vm7, %v1260_v22 }
 0x23f   : > { %1912 = vst.msk [vmem:[#allocation3 + $0xa0] sm:$0xff] %vm1891_vm10, %v1836_v17 }
 0x241   : > { %v1262_v11 = vpop.permute.xlu1 %1261 }
 0x242   : > { %v1838_v10 = vpop.permute.xlu0 %1837  ;;  %1335 = vst.msk [vmem:[#allocation3 + $0xb8] sm:$0xff] %vm1311_vm7, %v1262_v11 }
 0x243   : > { %1913 = vst.msk [vmem:[#allocation3 + $0xa8] sm:$0xff] %vm1891_vm10, %v1838_v10 }
 0x245   : > { %v1456_v0 = vpop.permute.xlu1 %1455 }
 0x246   : > { %v1454_v57 = vpop.permute.xlu0 %1453  ;;  %v1944_v60 = vld [vmem:[#allocation3 + $0xa0] sm:$0xff]  ;;  %1529 = vst.msk [vmem:[#allocation3 + $0xb8] sm:$0xff] %vm1505_vm8, %v1456_v0 }
 0x247   : > { %1528 = vst.msk [vmem:[#allocation3 + $0xb0] sm:$0xff] %vm1505_vm8, %v1454_v57  ;;  %5182 = vmatprep.mubr.msk.f32.mxu0 %vm1961_vm11, %v1944_v60 }
 0x249   : > { %v1649_v27 = vpop.permute.xlu1 %1648 }
 0x24a   : > { %v1647_v5 = vpop.permute.xlu0 %1646  ;;  %v1945_v25 = vld [vmem:[#allocation3 + $0xa8] sm:$0xff]  ;;  %1722 = vst.msk [vmem:[#allocation3 + $0xb8] sm:$0xff] %vm1698_vm9, %v1649_v27 }
 0x24b   : > { %1721 = vst.msk [vmem:[#allocation3 + $0xb0] sm:$0xff] %vm1698_vm9, %v1647_v5  ;;  %5183 = vmatmul.mubr.msk.f32.gmra.mxu0 %vm1961_vm11, %v1945_v25 }
 0x24d   : > { %v1264_v29 = vpop.permute.xlu1 %1263 }
 0x24e   : > { %v1840_v28 = vpop.permute.xlu0 %1839  ;;  %1336 = vst.msk [vmem:[#allocation3 + $0xc0] sm:$0xff] %vm1311_vm7, %v1264_v29 }
 0x24f   : > { %1914 = vst.msk [vmem:[#allocation3 + $0xb0] sm:$0xff] %vm1891_vm10, %v1840_v28 }
 0x251   : > { %v1266_v32 = vpop.permute.xlu1 %1265 }
 0x252   : > { %v1842_v30 = vpop.permute.xlu0 %1841  ;;  %1337 = vst.msk [vmem:[#allocation3 + $0xc8] sm:$0xff] %vm1311_vm7, %v1266_v32 }
 0x253   : > { %1915 = vst.msk [vmem:[#allocation3 + $0xb8] sm:$0xff] %vm1891_vm10, %v1842_v30 }
 0x255   : > { %v1460_v61 = vpop.permute.xlu1 %1459 }
 0x256   : > { %v1458_v43 = vpop.permute.xlu0 %1457  ;;  %v1946_v44 = vld [vmem:[#allocation3 + $0xb0] sm:$0xff]  ;;  %1531 = vst.msk [vmem:[#allocation3 + $0xc8] sm:$0xff] %vm1505_vm8, %v1460_v61 }
 0x257   : > { %1530 = vst.msk [vmem:[#allocation3 + $0xc0] sm:$0xff] %vm1505_vm8, %v1458_v43  ;;  %5185 = vmatprep.mubr.msk.f32.mxu0 %vm1961_vm11, %v1946_v44 }
 0x259   : > { %v1653_v38 = vpop.permute.xlu1 %1652 }
 0x25a   : > { %v1651_v33 = vpop.permute.xlu0 %1650  ;;  %v1947_v49 = vld [vmem:[#allocation3 + $0xb8] sm:$0xff]  ;;  %1724 = vst.msk [vmem:[#allocation3 + $0xc8] sm:$0xff] %vm1698_vm9, %v1653_v38 }
 0x25b   : > { %1723 = vst.msk [vmem:[#allocation3 + $0xc0] sm:$0xff] %vm1698_vm9, %v1651_v33  ;;  %5186 = vmatmul.mubr.msk.f32.gmra.mxu0 %vm1961_vm11, %v1947_v49 }
 0x25d   : > { %v1268_v50 = vpop.permute.xlu1 %1267 }
 0x25e   : > { %v1844_v41 = vpop.permute.xlu0 %1843  ;;  %1338 = vst.msk [vmem:[#allocation3 + $0xd0] sm:$0xff] %vm1311_vm7, %v1268_v50 }
 0x25f   : > { %1916 = vst.msk [vmem:[#allocation3 + $0xc0] sm:$0xff] %vm1891_vm10, %v1844_v41 }
 0x261   : > { %v1270_v54 = vpop.permute.xlu1 %1269 }
 0x262   : > { %v1846_v53 = vpop.permute.xlu0 %1845  ;;  %1339 = vst.msk [vmem:[#allocation3 + $0xd8] sm:$0xff] %vm1311_vm7, %v1270_v54 }
 0x263   : > { %1917 = vst.msk [vmem:[#allocation3 + $0xc8] sm:$0xff] %vm1891_vm10, %v1846_v53 }
 0x265   : > { %v1464_v39 = vpop.permute.xlu1 %1463 }
 0x266   : > { %v1462_v59 = vpop.permute.xlu0 %1461  ;;  %v1948_v62 = vld [vmem:[#allocation3 + $0xc0] sm:$0xff]  ;;  %1533 = vst.msk [vmem:[#allocation3 + $0xd8] sm:$0xff] %vm1505_vm8, %v1464_v39 }
 0x267   : > { %1532 = vst.msk [vmem:[#allocation3 + $0xd0] sm:$0xff] %vm1505_vm8, %v1462_v59  ;;  %5188 = vmatprep.mubr.msk.f32.mxu0 %vm1961_vm11, %v1948_v62 }
 0x269   : > { %v1657_v40 = vpop.permute.xlu1 %1656 }
 0x26a   : > { %v1655_v19 = vpop.permute.xlu0 %1654  ;;  %v1949_v46 = vld [vmem:[#allocation3 + $0xc8] sm:$0xff]  ;;  %1726 = vst.msk [vmem:[#allocation3 + $0xd8] sm:$0xff] %vm1698_vm9, %v1657_v40 }
 0x26b   : > { %1725 = vst.msk [vmem:[#allocation3 + $0xd0] sm:$0xff] %vm1698_vm9, %v1655_v19  ;;  %5189 = vmatmul.mubr.msk.f32.gmra.mxu0 %vm1961_vm11, %v1949_v46 }
 0x26d   : > { %v1272_v24 = vpop.permute.xlu1 %1271 }
 0x26e   : > { %v1848_v58 = vpop.permute.xlu0 %1847  ;;  %1340 = vst.msk [vmem:[#allocation3 + $0xe0] sm:$0xff] %vm1311_vm7, %v1272_v24 }
 0x26f   : > { %1918 = vst.msk [vmem:[#allocation3 + $0xd0] sm:$0xff] %vm1891_vm10, %v1848_v58 }
 0x270   : > { %v6411_v16 = vpop.f32.mrf.mxu0 }
 0x271   : > { %v1274_v37 = vpop.permute.xlu1 %1273  ;;  %v2357_v12 = vmul.f32 %v6411_v16, %v6411_v16  ;;  %v2288_v4 = vsel %vm204_vm0, %v6411_v16, 0.0 }
 0x272   : > { %v1850_v52 = vpop.permute.xlu0 %1849  ;;  %1341 = vst.msk [vmem:[#allocation3 + $0xe8] sm:$0xff] %vm1311_vm7, %v1274_v37  ;;  %v6413_v34 = vpop.f32.mrf.mxu0 }
 0x273   : > { %1919 = vst.msk [vmem:[#allocation3 + $0xd8] sm:$0xff] %vm1891_vm10, %v1850_v52  ;;  %v2356_v13 = vmul.f32 %v6413_v34, %v6413_v34  ;;  %v2287_v45 = vsel %vm204_vm0, %v6413_v34, 0.0  ;;  %v2389_v57 = vsel %vm204_vm0, %v2357_v12, 0.0 }
 0x274   : > { %v2289_v10 = vadd.f32 %v2288_v4, %v2287_v45 }
 0x275   : > { %v1468_v20 = vpop.permute.xlu1 %1467  ;;  %v2388_v17 = vsel %vm204_vm0, %v2356_v13, 0.0 }
 0x276   : > { %v1466_v42 = vpop.permute.xlu0 %1465  ;;  %v1950_v55 = vld [vmem:[#allocation3 + $0xd0] sm:$0xff]  ;;  %1535 = vst.msk [vmem:[#allocation3 + $0xe8] sm:$0xff] %vm1505_vm8, %v1468_v20  ;;  %v2390_v0 = vadd.f32 %v2389_v57, %v2388_v17 }
 0x277   : > { %1534 = vst.msk [vmem:[#allocation3 + $0xe0] sm:$0xff] %vm1505_vm8, %v1466_v42  ;;  %5191 = vmatprep.mubr.msk.f32.mxu0 %vm1961_vm11, %v1950_v55 }
 0x279   : > { %v1661_v7 = vpop.permute.xlu1 %1660 }
 0x27a   : > { %v1659_v23 = vpop.permute.xlu0 %1658  ;;  %v1951_v3 = vld [vmem:[#allocation3 + $0xd8] sm:$0xff]  ;;  %1728 = vst.msk [vmem:[#allocation3 + $0xe8] sm:$0xff] %vm1698_vm9, %v1661_v7 }
 0x27b   : > { %1727 = vst.msk [vmem:[#allocation3 + $0xe0] sm:$0xff] %vm1698_vm9, %v1659_v23  ;;  %5192 = vmatmul.mubr.msk.f32.gmra.mxu0 %vm1961_vm11, %v1951_v3 }
 0x27c   : > { %v6415_v35 = vpop.f32.mrf.mxu0 }
 0x27d   : > { %v1276_v18 = vpop.permute.xlu1 %1275  ;;  %v2359_v27 = vmul.f32 %v6415_v35, %v6415_v35  ;;  %v2292_v30 = vsel %vm204_vm0, %v6415_v35, 0.0 }
 0x27e   : > { %v1852_v14 = vpop.permute.xlu0 %1851  ;;  %1342 = vst.msk [vmem:[#allocation3 + $0xf0] sm:$0xff] %vm1311_vm7, %v1276_v18  ;;  %v6417_v51 = vpop.f32.mrf.mxu0 }
 0x27f   : > { %1920 = vst.msk [vmem:[#allocation3 + $0xe0] sm:$0xff] %vm1891_vm10, %v1852_v14  ;;  %v2358_v2 = vmul.f32 %v6417_v51, %v6417_v51  ;;  %v2290_v22 = vsel %vm204_vm0, %v6417_v51, 0.0  ;;  %v2393_v61 = vsel %vm204_vm0, %v2359_v27, 0.0 }
 0x280   : > { %v2291_v5 = vadd.f32 %v2290_v22, %v2289_v10 }
 0x281   : > { %v1278_v48 = vpop.permute.xlu1 %1277  ;;  %v2391_v60 = vsel %vm204_vm0, %v2358_v2, 0.0 }
 0x282   : > { %v1854_v15 = vpop.permute.xlu0 %1853  ;;  %1343 = vst.msk [vmem:[#allocation3 + $0xf8] sm:$0xff] %vm1311_vm7, %v1278_v48  ;;  %v2392_v29 = vadd.f32 %v2391_v60, %v2390_v0  ;;  %v2293_v43 = vadd.f32 %v2292_v30, %v2291_v5 }
 0x283   : > { %1921 = vst.msk [vmem:[#allocation3 + $0xe8] sm:$0xff] %vm1891_vm10, %v1854_v15 }
 0x284   : > { %v2394_v38 = vadd.f32 %v2393_v61, %v2392_v29 }
 0x285   : > { %v1472_v63 = vpop.permute.xlu1 %1471 }
 0x286   : > { %v1470_v36 = vpop.permute.xlu0 %1469  ;;  %v1952_v47 = vld [vmem:[#allocation3 + $0xe0] sm:$0xff]  ;;  %1537 = vst.msk [vmem:[#allocation3 + $0xf8] sm:$0xff] %vm1505_vm8, %v1472_v63 }
 0x287   : > { %1536 = vst.msk [vmem:[#allocation3 + $0xf0] sm:$0xff] %vm1505_vm8, %v1470_v36  ;;  %5194 = vmatprep.mubr.msk.f32.mxu0 %vm1961_vm11, %v1952_v47 }
 0x289   : > { %v1665_v8 = vpop.permute.xlu1 %1664 }
 0x28a   : > { %v1663_v56 = vpop.permute.xlu0 %1662  ;;  %v1953_v1 = vld [vmem:[#allocation3 + $0xe8] sm:$0xff]  ;;  %1730 = vst.msk [vmem:[#allocation3 + $0xf8] sm:$0xff] %vm1698_vm9, %v1665_v8 }
 0x28b   : > { %1729 = vst.msk [vmem:[#allocation3 + $0xf0] sm:$0xff] %vm1698_vm9, %v1663_v56  ;;  %5195 = vmatmul.mubr.msk.f32.gmra.mxu0 %vm1961_vm11, %v1953_v1  ;;  %v6421_v31 = vpop.f32.mrf.mxu0 }
 0x28c   : > { %v2361_v50 = vmul.f32 %v6421_v31, %v6421_v31  ;;  %v2296_v59 = vsel %vm204_vm0, %v6421_v31, 0.0 }
 0x28d   : > { %v1858_v9 = vpop.permute.xlu1 %1857  ;;  %v6434_v11 = vpop.f32.mrf.mxu0 }
 0x28e   : > { %v1856_v6 = vpop.permute.xlu0 %1855  ;;  %1923 = vst.msk [vmem:[#allocation3 + $0xf8] sm:$0xff] %vm1891_vm10, %v1858_v9  ;;  %v2360_v28 = vmul.f32 %v6434_v11, %v6434_v11  ;;  %v2294_v32 = vsel %vm204_vm0, %v6434_v11, 0.0  ;;  %v2397_v46 = vsel %vm204_vm0, %v2361_v50, 0.0 }
 0x28f   : > { %1922 = vst.msk [vmem:[#allocation3 + $0xf0] sm:$0xff] %vm1891_vm10, %v1856_v6  ;;  %v2295_v49 = vadd.f32 %v2294_v32, %v2293_v43 }
 0x290   : > { %v2395_v33 = vsel %vm204_vm0, %v2360_v28, 0.0 }
 0x291   : > { %v2396_v54 = vadd.f32 %v2395_v33, %v2394_v38  ;;  %v2297_v39 = vadd.f32 %v2296_v59, %v2295_v49 }
 0x293   : > { %v2398_v24 = vadd.f32 %v2397_v46, %v2396_v54 }
 0x295   : > { %v1955_v21 = vld [vmem:[#allocation3 + $0xf8] sm:$0xff] }
 0x296   : > { %v1954_v26 = vld [vmem:[#allocation3 + $0xf0] sm:$0xff] }
 0x297   : > { %5197 = vmatprep.mubr.msk.f32.mxu0 %vm1961_vm11, %v1954_v26 }
 0x298   : > { %5198 = vmatmul.mubr.msk.f32.gmra.mxu0 %vm1961_vm11, %v1955_v21 }
 0x29b   : > { %v6438_v25 = vpop.f32.mrf.mxu0 }
 0x29c   : > { %v2363_v37 = vmul.f32 %v6438_v25, %v6438_v25  ;;  %v2300_v20 = vsel %vm204_vm0, %v6438_v25, 0.0 }
 0x29d   : > { %v6448_v44 = vpop.f32.mrf.mxu0 }
 0x29e   : > { %v2362_v53 = vmul.f32 %v6448_v44, %v6448_v44  ;;  %v2298_v62 = vsel %vm204_vm0, %v6448_v44, 0.0  ;;  %v2401_v14 = vsel %vm204_vm0, %v2363_v37, 0.0 }
 0x29f   : > { %v2299_v58 = vadd.f32 %v2298_v62, %v2297_v39 }
 0x2a0   : > { %v2399_v40 = vsel %vm204_vm0, %v2362_v53, 0.0 }
 0x2a1   : > { %v2400_v55 = vadd.f32 %v2399_v40, %v2398_v24  ;;  %v2301_v3 = vadd.f32 %v2300_v20, %v2299_v58 }
 0x2a3   : > { %v2402_v48 = vadd.f32 %v2401_v14, %v2400_v55 }
 0x2ab   : > { %v6452_v41 = vpop.f32.mrf.mxu0 }
 0x2ac   : > { %v2365_v47 = vmul.f32 %v6452_v41, %v6452_v41  ;;  %v2304_v1 = vsel %vm204_vm0, %v6452_v41, 0.0 }
 0x2ad   : > { %v6462_v19 = vpop.f32.mrf.mxu0 }
 0x2ae   : > { %v2364_v42 = vmul.f32 %v6462_v19, %v6462_v19  ;;  %v2302_v23 = vsel %vm204_vm0, %v6462_v19, 0.0  ;;  %v2405_v26 = vsel %vm204_vm0, %v2365_v47, 0.0 }
 0x2af   : > { %v2303_v15 = vadd.f32 %v2302_v23, %v2301_v3 }
 0x2b0   : > { %v2403_v18 = vsel %vm204_vm0, %v2364_v42, 0.0 }
 0x2b1   : > { %v2404_v56 = vadd.f32 %v2403_v18, %v2402_v48  ;;  %v2305_v6 = vadd.f32 %v2304_v1, %v2303_v15 }
 0x2b3   : > { %v2406_v12 = vadd.f32 %v2405_v26, %v2404_v56 }
 0x2bb   : > { %v6466_v52 = vpop.f32.mrf.mxu0 }
 0x2bc   : > { %v2367_v2 = vmul.f32 %v6466_v52, %v6466_v52  ;;  %v2308_v22 = vsel %vm204_vm0, %v6466_v52, 0.0 }
 0x2bd   : > { %v6476_v7 = vpop.f32.mrf.mxu0 }
 0x2be   : > { %v2366_v63 = vmul.f32 %v6476_v7, %v6476_v7  ;;  %v2306_v8 = vsel %vm204_vm0, %v6476_v7, 0.0  ;;  %v2409_v0 = vsel %vm204_vm0, %v2367_v2, 0.0 }
 0x2bf   : > { %v2307_v13 = vadd.f32 %v2306_v8, %v2305_v6 }
 0x2c0   : > { %v2407_v21 = vsel %vm204_vm0, %v2366_v63, 0.0 }
 0x2c1   : > { %v2408_v17 = vadd.f32 %v2407_v21, %v2406_v12  ;;  %v2309_v57 = vadd.f32 %v2308_v22, %v2307_v13 }
 0x2c3   : > { %v2410_v28 = vadd.f32 %v2409_v0, %v2408_v17 }
 0x2cb   : > { %v6480_v36 = vpop.f32.mrf.mxu0 }
 0x2cc   : > { %v2369_v30 = vmul.f32 %v6480_v36, %v6480_v36  ;;  %v2312_v61 = vsel %vm204_vm0, %v6480_v36, 0.0 }
 0x2cd   : > { %v6490_v9 = vpop.f32.mrf.mxu0 }
 0x2ce   : > { %v2368_v4 = vmul.f32 %v6490_v9, %v6490_v9  ;;  %v2310_v10 = vsel %vm204_vm0, %v6490_v9, 0.0  ;;  %v2413_v50 = vsel %vm204_vm0, %v2369_v30, 0.0 }
 0x2cf   : > { %v2311_v27 = vadd.f32 %v2310_v10, %v2309_v57 }
 0x2d0   : > { %v2411_v5 = vsel %vm204_vm0, %v2368_v4, 0.0 }
 0x2d1   : > { %v2412_v43 = vadd.f32 %v2411_v5, %v2410_v28  ;;  %v2313_v49 = vadd.f32 %v2312_v61, %v2311_v27 }
 0x2d3   : > { %v2414_v59 = vadd.f32 %v2413_v50, %v2412_v43 }
 0x2db   : > { %v6494_v45 = vpop.f32.mrf.mxu0 }
 0x2dc   : > { %v2371_v39 = vmul.f32 %v6494_v45, %v6494_v45  ;;  %v2316_v58 = vsel %vm204_vm0, %v6494_v45, 0.0 }
 0x2dd   : > { %v6504_v60 = vpop.f32.mrf.mxu0 }
 0x2de   : > { %v2370_v32 = vmul.f32 %v6504_v60, %v6504_v60  ;;  %v2314_v33 = vsel %vm204_vm0, %v6504_v60, 0.0  ;;  %v2417_v55 = vsel %vm204_vm0, %v2371_v39, 0.0 }
 0x2df   : > { %v2315_v54 = vadd.f32 %v2314_v33, %v2313_v49 }
 0x2e0   : > { %v2415_v53 = vsel %vm204_vm0, %v2370_v32, 0.0 }
 0x2e1   : > { %v2416_v40 = vadd.f32 %v2415_v53, %v2414_v59  ;;  %v2317_v37 = vadd.f32 %v2316_v58, %v2315_v54 }
 0x2e3   : > { %v2418_v3 = vadd.f32 %v2417_v55, %v2416_v40 }
 0x2eb   : > { %v6508_v29 = vpop.f32.mrf.mxu0 }
 0x2ec   : > { %v2373_v18 = vmul.f32 %v6508_v29, %v6508_v29  ;;  %v2320_v47 = vsel %vm204_vm0, %v6508_v29, 0.0 }
 0x2ed   : > { %v6518_v38 = vpop.f32.mrf.mxu0 }
 0x2ee   : > { %v2372_v46 = vmul.f32 %v6518_v38, %v6518_v38  ;;  %v2318_v24 = vsel %vm204_vm0, %v6518_v38, 0.0  ;;  %v2421_v8 = vsel %vm204_vm0, %v2373_v18, 0.0 }
 0x2ef   : > { %v2319_v23 = vadd.f32 %v2318_v24, %v2317_v37 }
 0x2f0   : > { %v2419_v20 = vsel %vm204_vm0, %v2372_v46, 0.0 }
 0x2f1   : > { %v2420_v48 = vadd.f32 %v2419_v20, %v2418_v3  ;;  %v2321_v56 = vadd.f32 %v2320_v47, %v2319_v23 }
 0x2f3   : > { %v2422_v21 = vadd.f32 %v2421_v8, %v2420_v48 }
 0x2fb   : > { %v6522_v62 = vpop.f32.mrf.mxu0 }
 0x2fc   : > { %v2375_v12 = vmul.f32 %v6522_v62, %v6522_v62  ;;  %v2324_v17 = vsel %vm204_vm0, %v6522_v62, 0.0 }
 0x2fd   : > { %v6532_v42 = vpop.f32.mrf.mxu0 }
 0x2fe   : > { %v2374_v15 = vmul.f32 %v6532_v42, %v6532_v42  ;;  %v2322_v63 = vsel %vm204_vm0, %v6532_v42, 0.0  ;;  %v2425_v0 = vsel %vm204_vm0, %v2375_v12, 0.0 }
 0x2ff   : > { %v2323_v26 = vadd.f32 %v2322_v63, %v2321_v56 }
 0x300   : > { %v2423_v6 = vsel %vm204_vm0, %v2374_v15, 0.0 }
 0x301   : > { %v2424_v4 = vadd.f32 %v2423_v6, %v2422_v21  ;;  %v2325_v10 = vadd.f32 %v2324_v17, %v2323_v26 }
 0x303   : > { %v2426_v28 = vadd.f32 %v2425_v0, %v2424_v4 }
 0x30b   : > { %v6536_v14 = vpop.f32.mrf.mxu0 }
 0x30c   : > { %v2377_v32 = vmul.f32 %v6536_v14, %v6536_v14  ;;  %v2328_v33 = vsel %vm204_vm0, %v6536_v14, 0.0 }
 0x30d   : > { %v6546_v1 = vpop.f32.mrf.mxu0 }
 0x30e   : > { %v2376_v2 = vmul.f32 %v6546_v1, %v6546_v1  ;;  %v2326_v22 = vsel %vm204_vm0, %v6546_v1, 0.0  ;;  %v2429_v54 = vsel %vm204_vm0, %v2377_v32, 0.0 }
 0x30f   : > { %v2327_v27 = vadd.f32 %v2326_v22, %v2325_v10 }
 0x310   : > { %v2427_v5 = vsel %vm204_vm0, %v2376_v2, 0.0 }
 0x311   : > { %v2428_v61 = vadd.f32 %v2427_v5, %v2426_v28  ;;  %v2329_v50 = vadd.f32 %v2328_v33, %v2327_v27 }
 0x313   : > { %v2430_v46 = vadd.f32 %v2429_v54, %v2428_v61 }
 0x31b   : > { %v6550_v13 = vpop.f32.mrf.mxu0 }
 0x31c   : > { %v2379_v58 = vmul.f32 %v6550_v13, %v6550_v13  ;;  %v2332_v55 = vsel %vm204_vm0, %v6550_v13, 0.0 }
 0x31d   : > { %v6560_v57 = vpop.f32.mrf.mxu0 }
 0x31e   : > { %v2378_v43 = vmul.f32 %v6560_v57, %v6560_v57  ;;  %v2330_v49 = vsel %vm204_vm0, %v6560_v57, 0.0  ;;  %v2433_v18 = vsel %vm204_vm0, %v2379_v58, 0.0 }
 0x31f   : > { %v2331_v39 = vadd.f32 %v2330_v49, %v2329_v50 }
 0x320   : > { %v2431_v59 = vsel %vm204_vm0, %v2378_v43, 0.0 }
 0x321   : > { %v2432_v37 = vadd.f32 %v2431_v59, %v2430_v46  ;;  %v2333_v23 = vadd.f32 %v2332_v55, %v2331_v39 }
 0x323   : > { %v2434_v47 = vadd.f32 %v2433_v18, %v2432_v37 }
 0x32b   : > { %v6564_v30 = vpop.f32.mrf.mxu0 }
 0x32c   : > { %v2381_v63 = vmul.f32 %v6564_v30, %v6564_v30  ;;  %v2336_v26 = vsel %vm204_vm0, %v6564_v30, 0.0 }
 0x32d   : > { %v6574_v53 = vpop.f32.mrf.mxu0 }
 0x32e   : > { %v2380_v24 = vmul.f32 %v6574_v53, %v6574_v53  ;;  %v2334_v20 = vsel %vm204_vm0, %v6574_v53, 0.0  ;;  %v2437_v4 = vsel %vm204_vm0, %v2381_v63, 0.0 }
 0x32f   : > { %v2335_v48 = vadd.f32 %v2334_v20, %v2333_v23 }
 0x330   : > { %v2435_v15 = vsel %vm204_vm0, %v2380_v24, 0.0 }
 0x331   : > { %v2436_v6 = vadd.f32 %v2435_v15, %v2434_v47  ;;  %v2337_v12 = vadd.f32 %v2336_v26, %v2335_v48 }
 0x333   : > { %v2438_v10 = vadd.f32 %v2437_v4, %v2436_v6 }
 0x33b   : > { %v6578_v40 = vpop.f32.mrf.mxu0 }
 0x33c   : > { %v2383_v0 = vmul.f32 %v6578_v40, %v6578_v40  ;;  %v2340_v28 = vsel %vm204_vm0, %v6578_v40, 0.0 }
 0x33d   : > { %v6588_v3 = vpop.f32.mrf.mxu0 }
 0x33e   : > { %v2382_v56 = vmul.f32 %v6588_v3, %v6588_v3  ;;  %v2338_v21 = vsel %vm204_vm0, %v6588_v3, 0.0  ;;  %v2441_v61 = vsel %vm204_vm0, %v2383_v0, 0.0 }
 0x33f   : > { %v2339_v22 = vadd.f32 %v2338_v21, %v2337_v12 }
 0x340   : > { %v2439_v17 = vsel %vm204_vm0, %v2382_v56, 0.0 }
 0x341   : > { %v2440_v27 = vadd.f32 %v2439_v17, %v2438_v10  ;;  %v2341_v43 = vadd.f32 %v2340_v28, %v2339_v22 }
 0x343   : > { %v2442_v50 = vadd.f32 %v2441_v61, %v2440_v27 }
 0x34b   : > { %v6596_v8 = vpop.f32.mrf.mxu0 }
 0x34c   : > { %v2385_v54 = vmul.f32 %v6596_v8, %v6596_v8  ;;  %v2344_v46 = vsel %vm204_vm0, %v6596_v8, 0.0 }
 0x34d   : > { %v6602_v2 = vpop.f32.mrf.mxu0 }
 0x34e   : > { %v2384_v5 = vmul.f32 %v6602_v2, %v6602_v2  ;;  %v2342_v32 = vsel %vm204_vm0, %v6602_v2, 0.0  ;;  %v2445_v37 = vsel %vm204_vm0, %v2385_v54, 0.0 }
 0x34f   : > { %v2343_v49 = vadd.f32 %v2342_v32, %v2341_v43 }
 0x350   : > { %v2443_v33 = vsel %vm204_vm0, %v2384_v5, 0.0 }
 0x351   : > { %v2444_v59 = vadd.f32 %v2443_v33, %v2442_v50  ;;  %v2345_v24 = vadd.f32 %v2344_v46, %v2343_v49 }
 0x353   : > { %v2446_v15 = vadd.f32 %v2445_v37, %v2444_v59 }
 0x358   : > { %v6618_v39 = vpop.f32.mrf.mxu0 }
 0x359   : > { %v2387_v55 = vmul.f32 %v6618_v39, %v6618_v39  ;;  %v2348_v48 = vsel %vm204_vm0, %v6618_v39, 0.0 }
 0x35a   : > { %v6622_v58 = vpop.f32.mrf.mxu0 }
 0x35b   : > { %v2346_v20 = vsel %vm204_vm0, %v6622_v58, 0.0  ;;  %v2386_v23 = vmul.f32 %v6622_v58, %v6622_v58  ;;  %v2449_v6 = vsel %vm204_vm0, %v2387_v55, 0.0 }
 0x35c   : > { %v2347_v18 = vadd.f32 %v2346_v20, %v2345_v24 }
 0x35d   : > { %v2447_v47 = vsel %vm204_vm0, %v2386_v23, 0.0 }
 0x35e   : > { %v2349_v63 = vadd.f32 %v2348_v48, %v2347_v18  ;;  %v2448_v56 = vadd.f32 %v2447_v47, %v2446_v15 }
 0x360   : > { %v2350_v26 = vrot.slane %v2349_v63, 4  ;;  %v2450_v21 = vadd.f32 %v2449_v6, %v2448_v56 }
 0x362   : > { %v2351_v12 = vadd.f32 %v2350_v26, %v2349_v63  ;;  %v2451_v4 = vrot.slane %v2450_v21, 4 }
 0x364   : > { %v2352_v17 = vrot.slane %v2351_v12, 2  ;;  %v2452_v22 = vadd.f32 %v2451_v4, %v2450_v21 }
 0x366   : > { %v2353_v10 = vadd.f32 %v2352_v17, %v2351_v12  ;;  %v2453_v0 = vrot.slane %v2452_v22, 2 }
 0x368   : > { %v2354_v5 = vrot.slane %v2353_v10, 1  ;;  %v2454_v27 = vadd.f32 %v2453_v0, %v2452_v22 }
 0x36a   : > { %v2355_v28 = vadd.f32 %v2354_v5, %v2353_v10  ;;  %v2455_v32 = vrot.slane %v2454_v27, 1 }
 0x36c   : > { %v2456_v43 = vadd.f32 %v2455_v32, %v2454_v27  ;;  %v6635_v61 = vmul.f32 0.00390625, %v2355_v28 }
 0x36e   : > { %v2458_v33 = vmul.f32 0.00390625, %v2456_v43  ;;  %v2459_v49 = vmul.f32 %v6635_v61, %v6635_v61  ;;  %v2492_v46 = vsub.f32 %v6622_v58, %v6635_v61  ;;  %v2462_v24 = vsub.f32 %v6413_v34, %v6635_v61 }
 0x36f   : > { %v2463_v37 = vsub.f32 %v6411_v16, %v6635_v61  ;;  %v2464_v55 = vsub.f32 %v6417_v51, %v6635_v61  ;;  %v2465_v20 = vsub.f32 %v6415_v35, %v6635_v61  ;;  %v2466_v23 = vsub.f32 %v6434_v11, %v6635_v61 }
 0x370   : > { %v2460_v50 = vsub.f32 %v2458_v33, %v2459_v49  ;;  %v2467_v18 = vsub.f32 %v6421_v31, %v6635_v61  ;;  %v2468_v58 = vsub.f32 %v6448_v44, %v6635_v61  ;;  %v2469_v34 = vsub.f32 %v6438_v25, %v6635_v61 }
 0x371   : > { %v2470_v16 = vsub.f32 %v6462_v19, %v6635_v61  ;;  %v2471_v51 = vsub.f32 %v6452_v41, %v6635_v61  ;;  %v2472_v35 = vsub.f32 %v6476_v7, %v6635_v61  ;;  %v2473_v11 = vsub.f32 %v6466_v52, %v6635_v61 }
 0x372   : > { %v2461_v54 = vmax.f32 %v2460_v50, 0.0  ;;  %v2474_v31 = vsub.f32 %v6490_v9, %v6635_v61  ;;  %v2475_v44 = vsub.f32 %v6480_v36, %v6635_v61  ;;  %v2476_v25 = vsub.f32 %v6504_v60, %v6635_v61 }
 0x373   : > { %v2477_v19 = vsub.f32 %v6494_v45, %v6635_v61  ;;  %v2478_v41 = vsub.f32 %v6518_v38, %v6635_v61  ;;  %v2479_v7 = vsub.f32 %v6508_v29, %v6635_v61  ;;  %v2480_v52 = vsub.f32 %v6532_v42, %v6635_v61 }
 0x374   : > { %v2494_v59 = vadd.f32 1e-05, %v2461_v54  ;;  %v2481_v9 = vsub.f32 %v6522_v62, %v6635_v61  ;;  %v2482_v36 = vsub.f32 %v6546_v1, %v6635_v61  ;;  %v2483_v60 = vsub.f32 %v6536_v14, %v6635_v61 }
 0x375   : > { %v2484_v45 = vsub.f32 %v6560_v57, %v6635_v61  ;;  %v2485_v38 = vsub.f32 %v6550_v13, %v6635_v61  ;;  %v2486_v29 = vsub.f32 %v6574_v53, %v6635_v61  ;;  %v2487_v42 = vsub.f32 %v6564_v30, %v6635_v61 }
 0x376   : > { %5274 = vrsqrt.f32 %v2494_v59  ;;  %v2488_v62 = vsub.f32 %v6588_v3, %v6635_v61  ;;  %v2489_v1 = vsub.f32 %v6578_v40, %v6635_v61  ;;  %v2490_v14 = vsub.f32 %v6602_v2, %v6635_v61 }
 0x377   : > { %v2491_v57 = vsub.f32 %v6596_v8, %v6635_v61  ;;  %v2493_v13 = vsub.f32 %v6618_v39, %v6635_v61 }
 0x383   : > { %v5275_v15 = vpop.eup %5274 }
 0x384   : > { %v2526_v53 = vmul.f32 %v5275_v15, %v2492_v46  ;;  %v2499_v48 = vmul.f32 %v5275_v15, %v2465_v20  ;;  %v2496_v47 = vmul.f32 %v5275_v15, %v2462_v24  ;;  %v2497_v30 = vmul.f32 %v5275_v15, %v2463_v37 }
 0x385   : > { %v2498_v63 = vmul.f32 %v5275_v15, %v2464_v55  ;;  %v2500_v56 = vmul.f32 %v5275_v15, %v2466_v23  ;;  %v2501_v3 = vmul.f32 %v5275_v15, %v2467_v18  ;;  %v2502_v6 = vmul.f32 %v5275_v15, %v2468_v58 }
 0x386   : > { %v2558_v26 = vmax.f32 %v2526_v53, 0.0  ;;  %v2531_v21 = vmax.f32 %v2499_v48, 0.0  ;;  %v2503_v40 = vmul.f32 %v5275_v15, %v2469_v34  ;;  %v2504_v12 = vmul.f32 %v5275_v15, %v2470_v16 }
 0x387   : > { %v2505_v4 = vmul.f32 %v5275_v15, %v2471_v51  ;;  %v2506_v2 = vmul.f32 %v5275_v15, %v2472_v35  ;;  %v2507_v17 = vmul.f32 %v5275_v15, %v2473_v11  ;;  %v2508_v22 = vmul.f32 %v5275_v15, %v2474_v31 }
 0x388   : > { %2590 = vst.msk [vmem:[#allocation2 + $0x181] sm:$0xff] %vm204_vm0, %v2558_v26  ;;  %2593 = vst.msk [vmem:[#allocation2 + $0x9] sm:$0xff] %vm204_vm0, %v2531_v21  ;;  %v2509_v8 = vmul.f32 %v5275_v15, %v2475_v44  ;;  %v2510_v39 = vmul.f32 %v5275_v15, %v2476_v25  ;;  %v6705_v10 = vmul.f32 %v5275_v15, %v2477_v19  ;;  %v2530_v55 = vmax.f32 %v2498_v63, 0.0 }
 0x389   : > { %v6707_v0 = vmul.f32 %v5275_v15, %v2478_v41  ;;  %2563 = vst.msk [vmem:[#allocation2 + $0x39] sm:$0xff] %vm204_vm0, %v2531_v21  ;;  %v6710_v5 = vmul.f32 %v5275_v15, %v2479_v7  ;;  %v6712_v27 = vmul.f32 %v5275_v15, %v2480_v52  ;;  %v6714_v28 = vmul.f32 %v5275_v15, %v2481_v9 }
 0x38a   : > { %v6716_v32 = vmul.f32 %v5275_v15, %v2482_v36  ;;  %v6718_v43 = vmul.f32 %v5275_v15, %v2483_v60  ;;  %v6720_v61 = vmul.f32 %v5275_v15, %v2484_v45  ;;  %v6722_v33 = vmul.f32 %v5275_v15, %v2485_v38  ;;  %2592 = vst.msk [vmem:[#allocation2 + $0x1] sm:$0xff] %vm204_vm0, %v2530_v55 }
 0x38b   : > { %v6724_v49 = vmul.f32 %v5275_v15, %v2486_v29  ;;  %v6726_v50 = vmul.f32 %v5275_v15, %v2487_v42  ;;  %v6728_v54 = vmul.f32 %v5275_v15, %v2488_v62  ;;  %v6730_v59 = vmul.f32 %v5275_v15, %v2489_v1  ;;  %2562 = vst.msk [vmem:[#allocation2 + $0x31] sm:$0xff] %vm204_vm0, %v2530_v55 }
 0x38c   : > { %v6732_v46 = vmul.f32 %v5275_v15, %v2490_v14  ;;  %v6734_v24 = vmul.f32 %v5275_v15, %v2491_v57  ;;  %v6736_v37 = vmul.f32 %v5275_v15, %v2493_v13  ;;  %v2528_v20 = vmax.f32 %v2496_v47, 0.0 }
 0x38d   : > { %v2529_v23 = vmax.f32 %v2497_v30, 0.0  ;;  %v2532_v18 = vmax.f32 %v2500_v56, 0.0  ;;  %v2533_v58 = vmax.f32 %v2501_v3, 0.0  ;;  %v2534_v34 = vmax.f32 %v2502_v6, 0.0 }
 0x38e   : > { %v2535_v16 = vmax.f32 %v2503_v40, 0.0  ;;  %v2536_v51 = vmax.f32 %v2504_v12, 0.0  ;;  %v2537_v35 = vmax.f32 %v2505_v4, 0.0  ;;  %v2538_v11 = vmax.f32 %v2506_v2, 0.0  ;;  %2560 = vst.msk [vmem:[#allocation2 + $0x19] sm:$0xff] %vm204_vm0, %v2528_v20 }
 0x38f   : > { %v2733_v31 = vld [vmem:[#allocation2 + $0x9] sm:$0xff]  ;;  %v2539_v44 = vmax.f32 %v2507_v17, 0.0  ;;  %v2540_v25 = vmax.f32 %v2508_v22, 0.0  ;;  %v2541_v19 = vmax.f32 %v2509_v8, 0.0  ;;  %v2542_v41 = vmax.f32 %v2510_v39, 0.0  ;;  %2561 = vst.msk [vmem:[#allocation2 + $0x21] sm:$0xff] %vm204_vm0, %v2529_v23 }
 0x390   : > { %2564 = vst.msk [vmem:[#allocation2 + $0x49] sm:$0xff] %vm204_vm0, %v2532_v18  ;;  %2565 = vst.msk [vmem:[#allocation2 + $0x51] sm:$0xff] %vm204_vm0, %v2533_v58  ;;  %2798 = vrot.lane.b32.xlu1 %v2733_v31, %s5286_s18  ;;  %v2543_v7 = vmax.f32 %v6705_v10, 0.0  ;;  %v2544_v52 = vmax.f32 %v6707_v0, 0.0  ;;  %v2545_v9 = vmax.f32 %v6710_v5, 0.0  ;;  %v2546_v36 = vmax.f32 %v6712_v27, 0.0 }
 0x391   : > { %2566 = vst.msk [vmem:[#allocation2 + $0x61] sm:$0xff] %vm204_vm0, %v2534_v34  ;;  %2567 = vst.msk [vmem:[#allocation2 + $0x69] sm:$0xff] %vm204_vm0, %v2535_v16  ;;  %v2632_v60 = vld [vmem:[#allocation2 + $0xf] sm:$0x1]  ;;  %v2547_v45 = vmax.f32 %v6714_v28, 0.0  ;;  %v2548_v38 = vmax.f32 %v6716_v32, 0.0 }
 0x392   : > { %2568 = vst.msk [vmem:[#allocation2 + $0x79] sm:$0xff] %vm204_vm0, %v2536_v51  ;;  %2569 = vst.msk [vmem:[#allocation2 + $0x81] sm:$0xff] %vm204_vm0, %v2537_v35  ;;  %v2549_v29 = vmax.f32 %v6718_v43, 0.0  ;;  %v2550_v42 = vmax.f32 %v6720_v61, 0.0  ;;  %v2634_v62 = vld [vmem:[#allocation2 + $0x3f] sm:$0x1] }
 0x393   : > { %2570 = vst.msk [vmem:[#allocation2 + $0x91] sm:$0xff] %vm204_vm0, %v2538_v11  ;;  %2571 = vst.msk [vmem:[#allocation2 + $0x99] sm:$0xff] %vm204_vm0, %v2539_v44  ;;  %v2551_v15 = vmax.f32 %v6722_v33, 0.0  ;;  %v2552_v1 = vmax.f32 %v6724_v49, 0.0  ;;  %v2553_v14 = vmax.f32 %v6726_v50, 0.0  ;;  %v2554_v57 = vmax.f32 %v6728_v54, 0.0 }
 0x394   : > { %2572 = vst.msk [vmem:[#allocation2 + $0xa9] sm:$0xff] %vm204_vm0, %v2540_v25  ;;  %2573 = vst.msk [vmem:[#allocation2 + $0xb1] sm:$0xff] %vm204_vm0, %v2541_v19  ;;  %v2612_v13 = vld [vmem:[#allocation2 + $0x182] sm:$0x1]  ;;  %v2555_v53 = vmax.f32 %v6730_v59, 0.0  ;;  %v2556_v48 = vmax.f32 %v6732_v46, 0.0 }
 0x395   : > { %2574 = vst.msk [vmem:[#allocation2 + $0xc1] sm:$0xff] %vm204_vm0, %v2542_v41  ;;  %2575 = vst.msk [vmem:[#allocation2 + $0xc9] sm:$0xff] %vm204_vm0, %v2543_v7  ;;  %v2557_v47 = vmax.f32 %v6734_v24, 0.0  ;;  %v2559_v30 = vmax.f32 %v6736_v37, 0.0  ;;  %v2732_v63 = vld [vmem:[#allocation2 + $0x1] sm:$0xff]  ;;  %v6796_v3 = vld [vmem:[#allocation2 + $0x19] sm:$0xff] }
 0x396   : > { %2650 = vst.msk [vmem:[#allocation2 + $0x11] sm:$0x1] %vm260_vm1, %v2632_v60  ;;  %2652 = vst.msk [vmem:[#allocation2 + $0x41] sm:$0x1] %vm260_vm1, %v2634_v62  ;;  %2796 = vrot.lane.b32.xlu0 %v2732_v63, %s5286_s18  ;;  %v6792_v56 = vld [vmem:[#allocation2 + $0x21] sm:$0xff]  ;;  %v6800_v6 = vld [vmem:[#allocation2 + $0x39] sm:$0xff] }
 0x397   : > { %2576 = vst.msk [vmem:[#allocation2 + $0xd9] sm:$0xff] %vm204_vm0, %v2544_v52  ;;  %2577 = vst.msk [vmem:[#allocation2 + $0xe1] sm:$0xff] %vm204_vm0, %v2545_v9  ;;  %2802 = vrot.lane.b32.xlu1 %v6792_v56, %s5286_s18  ;;  %v6804_v26 = vld [vmem:[#allocation2 + $0x31] sm:$0xff]  ;;  %v2633_v40 = vld [vmem:[#allocation2 + $0x27] sm:$0x1] }
 0x398   : > { %2578 = vst.msk [vmem:[#allocation2 + $0xf1] sm:$0xff] %vm204_vm0, %v2546_v36  ;;  %2579 = vst.msk [vmem:[#allocation2 + $0xf9] sm:$0xff] %vm204_vm0, %v2547_v45  ;;  %v6808_v21 = vld [vmem:[#allocation2 + $0x51] sm:$0xff]  ;;  %v6813_v12 = vld [vmem:[#allocation2 + $0x49] sm:$0xff] }
 0x399   : > { %2580 = vst.msk [vmem:[#allocation2 + $0x109] sm:$0xff] %vm204_vm0, %v2548_v38  ;;  %2581 = vst.msk [vmem:[#allocation2 + $0x111] sm:$0xff] %vm204_vm0, %v2549_v29  ;;  %v2635_v4 = vld [vmem:[#allocation2 + $0x57] sm:$0x1]  ;;  %v2636_v2 = vld [vmem:[#allocation2 + $0x6f] sm:$0x1] }
 0x39a   : > { %2582 = vst.msk [vmem:[#allocation2 + $0x121] sm:$0xff] %vm204_vm0, %v2550_v42  ;;  %2583 = vst.msk [vmem:[#allocation2 + $0x129] sm:$0xff] %vm204_vm0, %v2551_v15  ;;  %2800 = vrot.lane.b32.xlu0 %v6796_v3, %s5286_s18  ;;  %v6817_v17 = vld [vmem:[#allocation2 + $0x69] sm:$0xff]  ;;  %v2637_v22 = vld [vmem:[#allocation2 + $0x87] sm:$0x1] }
 0x39b   : > { %2630 = vst.msk [vmem:[#allocation2 + $0x180] sm:$0x1] %vm260_vm1, %v2612_v13  ;;  %2806 = vrot.lane.b32.xlu1 %v6800_v6, %s5286_s18  ;;  %2651 = vst.msk [vmem:[#allocation2 + $0x29] sm:$0x1] %vm260_vm1, %v2633_v40  ;;  %v2638_v8 = vld [vmem:[#allocation2 + $0x9f] sm:$0x1] }
 0x39c   : > { %2584 = vst.msk [vmem:[#allocation2 + $0x139] sm:$0xff] %vm204_vm0, %v2552_v1  ;;  %2585 = vst.msk [vmem:[#allocation2 + $0x141] sm:$0xff] %vm204_vm0, %v2553_v14  ;;  %v2639_v39 = vld [vmem:[#allocation2 + $0xb7] sm:$0x1]  ;;  %v2640_v10 = vld [vmem:[#allocation2 + $0xcf] sm:$0x1] }
 0x39d   : > { %2586 = vst.msk [vmem:[#allocation2 + $0x151] sm:$0xff] %vm204_vm0, %v2554_v57  ;;  %2587 = vst.msk [vmem:[#allocation2 + $0x159] sm:$0xff] %vm204_vm0, %v2555_v53  ;;  %v6826_v0 = vld [vmem:[#allocation2 + $0x61] sm:$0xff]  ;;  %v6839_v50 = vld [vmem:[#allocation2 + $0x79] sm:$0xff] }
 0x39e   : > { %2588 = vst.msk [vmem:[#allocation2 + $0x169] sm:$0xff] %vm204_vm0, %v2556_v48  ;;  %2589 = vst.msk [vmem:[#allocation2 + $0x171] sm:$0xff] %vm204_vm0, %v2557_v47  ;;  %2804 = vrot.lane.b32.xlu0 %v6804_v26, %s5286_s18  ;;  %v2641_v5 = vld [vmem:[#allocation2 + $0xe7] sm:$0x1]  ;;  %v2669_v61 = vld [vmem:[#allocation2 + $0x8] sm:$0xff] }
 0x39f   : > { %2591 = vst.msk [vmem:[#allocation2 + $0x189] sm:$0xff] %vm204_vm0, %v2559_v30  ;;  %2594 = vst.msk [vmem:[#allocation2 + $0x199] sm:$0xff] %vm204_vm0, %v2556_v48  ;;  %2810 = vrot.lane.b32.xlu1 %v6808_v21, %s5286_s18  ;;  %v2642_v27 = vld [vmem:[#allocation2 + $0xff] sm:$0x1]  ;;  %v6831_v28 = vld [vmem:[#allocation2 + $0x81] sm:$0xff] }
 0x3a0   : > { %2595 = vst.msk [vmem:[#allocation2 + $0x1a1] sm:$0xff] %vm204_vm0, %v2557_v47  ;;  %v2643_v32 = vld [vmem:[#allocation2 + $0x117] sm:$0x1]  ;;  %v2596_v33 = vld [vmem:[#allocation2 + $0x2] sm:$0x1]  ;;  %2701 = vst.msk [vmem:[#allocation3 + $0x8] sm:$0xff] %vm204_vm0, %v2669_v61 }
 0x3a1   : > { %2653 = vst.msk [vmem:[#allocation2 + $0x59] sm:$0x1] %vm260_vm1, %v2635_v4  ;;  %2654 = vst.msk [vmem:[#allocation2 + $0x71] sm:$0x1] %vm260_vm1, %v2636_v2  ;;  %v2644_v43 = vld [vmem:[#allocation2 + $0x12f] sm:$0x1] }
 0x3a2   : > { %2808 = vrot.lane.b32.xlu0 %v6813_v12, %s5286_s18  ;;  %2655 = vst.msk [vmem:[#allocation2 + $0x89] sm:$0x1] %vm260_vm1, %v2637_v22  ;;  %2656 = vst.msk [vmem:[#allocation2 + $0xa1] sm:$0x1] %vm260_vm1, %v2638_v8  ;;  %v6846_v54 = vld [vmem:[#allocation2 + $0x99] sm:$0xff]  ;;  %v6858_v55 = vld [vmem:[#allocation2 + $0x91] sm:$0xff] }
 0x3a3   : > { %2814 = vrot.lane.b32.xlu1 %v6817_v17, %s5286_s18  ;;  %2657 = vst.msk [vmem:[#allocation2 + $0xb9] sm:$0x1] %vm260_vm1, %v2639_v39  ;;  %2658 = vst.msk [vmem:[#allocation2 + $0xd1] sm:$0x1] %vm260_vm1, %v2640_v10  ;;  %v2645_v49 = vld [vmem:[#allocation2 + $0x147] sm:$0x1] }
 0x3a4   : > { %2659 = vst.msk [vmem:[#allocation2 + $0xe9] sm:$0x1] %vm260_vm1, %v2641_v5  ;;  %2660 = vst.msk [vmem:[#allocation2 + $0x101] sm:$0x1] %vm260_vm1, %v2642_v27  ;;  %v6848_v59 = vld [vmem:[#allocation2 + $0x20] sm:$0xff]  ;;  %v6856_v37 = vld [vmem:[#allocation2 + $0x38] sm:$0xff] }
 0x3a5   : > { %2661 = vst.msk [vmem:[#allocation2 + $0x119] sm:$0x1] %vm260_vm1, %v2643_v32  ;;  %2662 = vst.msk [vmem:[#allocation2 + $0x131] sm:$0x1] %vm260_vm1, %v2644_v43  ;;  %v2597_v46 = vld [vmem:[#allocation2 + $0x1a] sm:$0x1] }
 0x3a6   : > { %2812 = vrot.lane.b32.xlu0 %v6826_v0, %s5286_s18  ;;  %2614 = vst.msk [vmem:[#allocation2] sm:$0x1] %vm260_vm1, %v2596_v33  ;;  %2663 = vst.msk [vmem:[#allocation2 + $0x149] sm:$0x1] %vm260_vm1, %v2645_v49  ;;  %v2646_v24 = vld [vmem:[#allocation2 + $0x15f] sm:$0x1] }
 0x3a7   : > { %2818 = vrot.lane.b32.xlu1 %v6831_v28, %s5286_s18  ;;  %2703 = vst.msk [vmem:[#allocation3 + $0x18] sm:$0xff] %vm204_vm0, %v6848_v59  ;;  %2705 = vst.msk [vmem:[#allocation3 + $0x28] sm:$0xff] %vm204_vm0, %v6856_v37  ;;  %v2598_v20 = vld [vmem:[#allocation2 + $0x32] sm:$0x1]  ;;  %v2647_v18 = vld [vmem:[#allocation2 + $0x177] sm:$0x1] }
 0x3a8   : > { %2615 = vst.msk [vmem:[#allocation2 + $0x18] sm:$0x1] %vm260_vm1, %v2597_v46  ;;  %2664 = vst.msk [vmem:[#allocation2 + $0x161] sm:$0x1] %vm260_vm1, %v2646_v24  ;;  %v2747_v23 = vld [vmem:[#allocation2 + $0xb1] sm:$0xff]  ;;  %v2746_v58 = vld [vmem:[#allocation2 + $0xa9] sm:$0xff] }
 0x3a9   : > { %2616 = vst.msk [vmem:[#allocation2 + $0x30] sm:$0x1] %vm260_vm1, %v2598_v20  ;;  %2665 = vst.msk [vmem:[#allocation2 + $0x179] sm:$0x1] %vm260_vm1, %v2647_v18  ;;  %v6867_v34 = vld [vmem:[#allocation2 + $0x50] sm:$0xff]  ;;  %v6872_v11 = vld [vmem:[#allocation2 + $0x68] sm:$0xff] }
 0x3aa   : > { %2816 = vrot.lane.b32.xlu0 %v6839_v50, %s5286_s18  ;;  %v2599_v16 = vld [vmem:[#allocation2 + $0x4a] sm:$0x1]  ;;  %2707 = vst.msk [vmem:[#allocation3 + $0x38] sm:$0xff] %vm204_vm0, %v6867_v34  ;;  %2709 = vst.msk [vmem:[#allocation3 + $0x48] sm:$0xff] %vm204_vm0, %v6872_v11  ;;  %v2600_v31 = vld [vmem:[#allocation2 + $0x62] sm:$0x1] }
 0x3ab   : > { %2822 = vrot.lane.b32.xlu1 %v6846_v54, %s5286_s18  ;;  %v2749_v51 = vld [vmem:[#allocation2 + $0xc9] sm:$0xff]  ;;  %2617 = vst.msk [vmem:[#allocation2 + $0x48] sm:$0x1] %vm260_vm1, %v2599_v16  ;;  %v6877_v44 = vld [vmem:[#allocation2 + $0x80] sm:$0xff]  ;;  %v2601_v25 = vld [vmem:[#allocation2 + $0x7a] sm:$0x1] }
 0x3ac   : > { %2618 = vst.msk [vmem:[#allocation2 + $0x60] sm:$0x1] %vm260_vm1, %v2600_v31  ;;  %2619 = vst.msk [vmem:[#allocation2 + $0x78] sm:$0x1] %vm260_vm1, %v2601_v25  ;;  %v6886_v41 = vld [vmem:[#allocation2 + $0x98] sm:$0xff]  ;;  %v2748_v52 = vld [vmem:[#allocation2 + $0xc1] sm:$0xff] }
 0x3ad   : > { %v2668_v35 = vld [vmem:[#allocation2] sm:$0xff]  ;;  %2711 = vst.msk [vmem:[#allocation3 + $0x58] sm:$0xff] %vm204_vm0, %v6877_v44  ;;  %v2602_v7 = vld [vmem:[#allocation2 + $0x92] sm:$0x1]  ;;  %2713 = vst.msk [vmem:[#allocation3 + $0x68] sm:$0xff] %vm204_vm0, %v6886_v41 }
 0x3ae   : > { %2820 = vrot.lane.b32.xlu0 %v6858_v55, %s5286_s18  ;;  %2700 = vst.msk [vmem:[#allocation3] sm:$0xff] %vm204_vm0, %v2668_v35  ;;  %v6894_v9 = vld [vmem:[#allocation2 + $0xb0] sm:$0xff]  ;;  %v2603_v36 = vld [vmem:[#allocation2 + $0xaa] sm:$0x1]  ;;  %v2604_v45 = vld [vmem:[#allocation2 + $0xc2] sm:$0x1] }
 0x3af   : > { %2826 = vrot.lane.b32.xlu1 %v2747_v23, %s5286_s18  ;;  %v6880_v19 = vld [vmem:[#allocation2 + $0x18] sm:$0xff]  ;;  %2620 = vst.msk [vmem:[#allocation2 + $0x90] sm:$0x1] %vm260_vm1, %v2602_v7  ;;  %2621 = vst.msk [vmem:[#allocation2 + $0xa8] sm:$0x1] %vm260_vm1, %v2603_v36  ;;  %v6899_v60 = vld [vmem:[#allocation2 + $0xc8] sm:$0xff] }
 0x3b0   : > { %2702 = vst.msk [vmem:[#allocation3 + $0x10] sm:$0xff] %vm204_vm0, %v6880_v19  ;;  %2715 = vst.msk [vmem:[#allocation3 + $0x78] sm:$0xff] %vm204_vm0, %v6894_v9  ;;  %v6901_v38 = vld [vmem:[#allocation2 + $0xe0] sm:$0xff]  ;;  %v6903_v29 = vld [vmem:[#allocation2 + $0x30] sm:$0xff] }
 0x3b1   : > { %2717 = vst.msk [vmem:[#allocation3 + $0x88] sm:$0xff] %vm204_vm0, %v6899_v60  ;;  %2719 = vst.msk [vmem:[#allocation3 + $0x98] sm:$0xff] %vm204_vm0, %v6901_v38  ;;  %v2605_v42 = vld [vmem:[#allocation2 + $0xda] sm:$0x1]  ;;  %v2751_v15 = vld [vmem:[#allocation2 + $0xe1] sm:$0xff] }
 0x3b2   : > { %2824 = vrot.lane.b32.xlu0 %v2746_v58, %s5286_s18  ;;  %2622 = vst.msk [vmem:[#allocation2 + $0xc0] sm:$0x1] %vm260_vm1, %v2604_v45  ;;  %v6910_v62 = vld [vmem:[#allocation2 + $0xf8] sm:$0xff]  ;;  %2623 = vst.msk [vmem:[#allocation2 + $0xd8] sm:$0x1] %vm260_vm1, %v2605_v42  ;;  %v6918_v14 = vld [vmem:[#allocation2 + $0x110] sm:$0xff] }
 0x3b3   : > { %2830 = vrot.lane.b32.xlu1 %v2749_v51, %s5286_s18  ;;  %2704 = vst.msk [vmem:[#allocation3 + $0x20] sm:$0xff] %vm204_vm0, %v6903_v29  ;;  %2721 = vst.msk [vmem:[#allocation3 + $0xa8] sm:$0xff] %vm204_vm0, %v6910_v62  ;;  %v2606_v1 = vld [vmem:[#allocation2 + $0xf2] sm:$0x1]  ;;  %v2750_v57 = vld [vmem:[#allocation2 + $0xd9] sm:$0xff] }
 0x3b4   : > { %v6921_v13 = vld [vmem:[#allocation2 + $0x48] sm:$0xff]  ;;  %2624 = vst.msk [vmem:[#allocation2 + $0xf0] sm:$0x1] %vm260_vm1, %v2606_v1  ;;  %v2753_v47 = vld [vmem:[#allocation2 + $0xf9] sm:$0xff]  ;;  %v2608_v30 = vld [vmem:[#allocation2 + $0x122] sm:$0x1] }
 0x3b5   : > { %2723 = vst.msk [vmem:[#allocation3 + $0xb8] sm:$0xff] %vm204_vm0, %v6918_v14  ;;  %v2607_v53 = vld [vmem:[#allocation2 + $0x10a] sm:$0x1]  ;;  %2706 = vst.msk [vmem:[#allocation3 + $0x30] sm:$0xff] %vm204_vm0, %v6921_v13  ;;  %v2695_v63 = vld [vmem:[#allocation2 + $0x140] sm:$0xff] }
 0x3b6   : > { %2828 = vrot.lane.b32.xlu0 %v2748_v52, %s5286_s18  ;;  %v6926_v48 = vld [vmem:[#allocation2 + $0x128] sm:$0xff]  ;;  %2625 = vst.msk [vmem:[#allocation2 + $0x108] sm:$0x1] %vm260_vm1, %v2607_v53  ;;  %v2609_v40 = vld [vmem:[#allocation2 + $0x13a] sm:$0x1]  ;;  %v6933_v4 = vld [vmem:[#allocation2 + $0x60] sm:$0xff] }
 0x3b7   : > { %2834 = vrot.lane.b32.xlu1 %v2751_v15, %s5286_s18  ;;  %2725 = vst.msk [vmem:[#allocation3 + $0xc8] sm:$0xff] %vm204_vm0, %v6926_v48  ;;  %v6935_v2 = vld [vmem:[#allocation2 + $0x78] sm:$0xff]  ;;  %2727 = vst.msk [vmem:[#allocation3 + $0xd8] sm:$0xff] %vm204_vm0, %v2695_v63  ;;  %v6945_v8 = vld [vmem:[#allocation2 + $0x90] sm:$0xff] }
 0x3b8   : > { %2626 = vst.msk [vmem:[#allocation2 + $0x120] sm:$0x1] %vm260_vm1, %v2608_v30  ;;  %2627 = vst.msk [vmem:[#allocation2 + $0x138] sm:$0x1] %vm260_vm1, %v2609_v40  ;;  %v2697_v22 = vld [vmem:[#allocation2 + $0x158] sm:$0xff]  ;;  %v2699_v10 = vld [vmem:[#allocation2 + $0x170] sm:$0xff] }
 0x3b9   : > { %2708 = vst.msk [vmem:[#allocation3 + $0x40] sm:$0xff] %vm204_vm0, %v6933_v4  ;;  %2710 = vst.msk [vmem:[#allocation3 + $0x50] sm:$0xff] %vm204_vm0, %v6935_v2  ;;  %v2610_v39 = vld [vmem:[#allocation2 + $0x152] sm:$0x1]  ;;  %v6951_v5 = vld [vmem:[#allocation2 + $0xa8] sm:$0xff] }
 0x3ba   : > { %2832 = vrot.lane.b32.xlu0 %v2750_v57, %s5286_s18  ;;  %2729 = vst.msk [vmem:[#allocation3 + $0xe8] sm:$0xff] %vm204_vm0, %v2697_v22  ;;  %2712 = vst.msk [vmem:[#allocation3 + $0x60] sm:$0xff] %vm204_vm0, %v6945_v8  ;;  %v2611_v27 = vld [vmem:[#allocation2 + $0x16a] sm:$0x1]  ;;  %v6957_v32 = vld [vmem:[#allocation2 + $0xc0] sm:$0xff] }
 0x3bb   : > { %2838 = vrot.lane.b32.xlu1 %v2753_v47, %s5286_s18  ;;  %2628 = vst.msk [vmem:[#allocation2 + $0x150] sm:$0x1] %vm260_vm1, %v2610_v39  ;;  %2629 = vst.msk [vmem:[#allocation2 + $0x168] sm:$0x1] %vm260_vm1, %v2611_v27  ;;  %v2752_v43 = vld [vmem:[#allocation2 + $0xf1] sm:$0xff]  ;;  %v2754_v23 = vld [vmem:[#allocation2 + $0x109] sm:$0xff] }
 0x3bc   : > { %2731 = vst.msk [vmem:[#allocation3 + $0xf8] sm:$0xff] %vm204_vm0, %v2699_v10  ;;  %2714 = vst.msk [vmem:[#allocation3 + $0x70] sm:$0xff] %vm204_vm0, %v6951_v5  ;;  %v6962_v61 = vld [vmem:[#allocation2 + $0xd8] sm:$0xff]  ;;  %v6967_v49 = vld [vmem:[#allocation2 + $0xf0] sm:$0xff] }
 0x3bd   : > { %2716 = vst.msk [vmem:[#allocation3 + $0x80] sm:$0xff] %vm204_vm0, %v6957_v32  ;;  %v2755_v33 = vld [vmem:[#allocation2 + $0x111] sm:$0xff]  ;;  %2718 = vst.msk [vmem:[#allocation3 + $0x90] sm:$0xff] %vm204_vm0, %v6962_v61  ;;  %v6972_v46 = vld [vmem:[#allocation2 + $0x108] sm:$0xff] }
 0x3be   : > { %2836 = vrot.lane.b32.xlu0 %v2752_v43, %s5286_s18  ;;  %2720 = vst.msk [vmem:[#allocation3 + $0xa0] sm:$0xff] %vm204_vm0, %v6967_v49  ;;  %2722 = vst.msk [vmem:[#allocation3 + $0xb0] sm:$0xff] %vm204_vm0, %v6972_v46  ;;  %v2757_v18 = vld [vmem:[#allocation2 + $0x129] sm:$0xff]  ;;  %v2756_v51 = vld [vmem:[#allocation2 + $0x121] sm:$0xff] }
 0x3bf   : > { %2842 = vrot.lane.b32.xlu1 %v2755_v33, %s5286_s18  ;;  %v6976_v24 = vld [vmem:[#allocation2 + $0x120] sm:$0xff]  ;;  %v2694_v20 = vld [vmem:[#allocation2 + $0x138] sm:$0xff]  ;;  %v2648_v52 = vld [vmem:[#allocation2 + $0x18f] sm:$0x1] }
 0x3c0   : > { %2724 = vst.msk [vmem:[#allocation3 + $0xc0] sm:$0xff] %vm204_vm0, %v6976_v24  ;;  %2726 = vst.msk [vmem:[#allocation3 + $0xd0] sm:$0xff] %vm204_vm0, %v2694_v20  ;;  %v2759_v35 = vld [vmem:[#allocation2 + $0x141] sm:$0xff]  ;;  %v2758_v31 = vld [vmem:[#allocation2 + $0x139] sm:$0xff] }
 0x3c1   : > { %v2761_v25 = vld [vmem:[#allocation2 + $0x159] sm:$0xff]  ;;  %v2760_v7 = vld [vmem:[#allocation2 + $0x151] sm:$0xff]  ;;  %2666 = vst.msk [vmem:[#allocation2 + $0x191] sm:$0x1] %vm260_vm1, %v2648_v52  ;;  %v2649_v42 = vld [vmem:[#allocation2 + $0x1a7] sm:$0x1] }
 0x3c2   : > { %2840 = vrot.lane.b32.xlu0 %v2754_v23, %s5286_s18  ;;  %v2696_v58 = vld [vmem:[#allocation2 + $0x150] sm:$0xff]  ;;  %v2698_v16 = vld [vmem:[#allocation2 + $0x168] sm:$0xff]  ;;  %v2613_v45 = vld [vmem:[#allocation2 + $0x19a] sm:$0x1]  ;;  %2667 = vst.msk [vmem:[#allocation2 + $0x1a9] sm:$0x1] %vm260_vm1, %v2649_v42 }
 0x3c3   : > { %2846 = vrot.lane.b32.xlu1 %v2757_v18, %s5286_s18  ;;  %2728 = vst.msk [vmem:[#allocation3 + $0xe0] sm:$0xff] %vm204_vm0, %v2696_v58  ;;  %2730 = vst.msk [vmem:[#allocation3 + $0xf0] sm:$0xff] %vm204_vm0, %v2698_v16  ;;  %v2763_v36 = vld [vmem:[#allocation2 + $0x171] sm:$0xff]  ;;  %v2762_v15 = vld [vmem:[#allocation2 + $0x169] sm:$0xff] }
 0x3c4   : > { %2631 = vst.msk [vmem:[#allocation2 + $0x198] sm:$0x1] %vm260_vm1, %v2613_v45  ;;  %v2925_v1 = vld [vmem:[#allocation2 + $0xa] sm:$0xff]  ;;  %v2924_v57 = vld [vmem:[#allocation2 + $0x2] sm:$0xff]  ;;  %v7001_v47 = vld [vmem:[#allocation2 + $0x1a] sm:$0xff] }
 0x3c5   : > { %v6997_v53 = vld [vmem:[#allocation2 + $0x22] sm:$0xff]  ;;  %v7005_v30 = vld [vmem:[#allocation2 + $0x3a] sm:$0xff]  ;;  %v7009_v63 = vld [vmem:[#allocation2 + $0x32] sm:$0xff] }
 0x3c6   : > { %2844 = vrot.lane.b32.xlu0 %v2756_v51, %s5286_s18  ;;  %v7013_v40 = vld [vmem:[#allocation2 + $0x52] sm:$0xff]  ;;  %v7017_v22 = vld [vmem:[#allocation2 + $0x4a] sm:$0xff]  ;;  %v7025_v10 = vld [vmem:[#allocation2 + $0x62] sm:$0xff] }
 0x3c7   : > { %2850 = vrot.lane.b32.xlu1 %v2759_v35, %s5286_s18  ;;  %v7021_v39 = vld [vmem:[#allocation2 + $0x6a] sm:$0xff]  ;;  %v7029_v27 = vld [vmem:[#allocation2 + $0x82] sm:$0xff]  ;;  %v7033_v43 = vld [vmem:[#allocation2 + $0x7a] sm:$0xff] }
 0x3c8   : > { %v7037_v33 = vld [vmem:[#allocation2 + $0x9a] sm:$0xff]  ;;  %v7041_v20 = vld [vmem:[#allocation2 + $0x92] sm:$0xff]  ;;  %v7049_v18 = vld [vmem:[#allocation2 + $0xaa] sm:$0xff] }
 0x3c9   : > { %v7045_v23 = vld [vmem:[#allocation2 + $0xb2] sm:$0xff]  ;;  %v2941_v58 = vld [vmem:[#allocation2 + $0xca] sm:$0xff]  ;;  %v7054_v16 = vld [vmem:[#allocation2 + $0xc2] sm:$0xff] }
 0x3ca   : > { %2848 = vrot.lane.b32.xlu0 %v2758_v31, %s5286_s18  ;;  %v2943_v51 = vld [vmem:[#allocation2 + $0xe2] sm:$0xff]  ;;  %v2942_v35 = vld [vmem:[#allocation2 + $0xda] sm:$0xff]  ;;  %v2946_v52 = vld [vmem:[#allocation2 + $0x10a] sm:$0xff] }
 0x3cb   : > { %2854 = vrot.lane.b32.xlu1 %v2761_v25, %s5286_s18  ;;  %v2945_v31 = vld [vmem:[#allocation2 + $0xfa] sm:$0xff]  ;;  %v2944_v25 = vld [vmem:[#allocation2 + $0xf2] sm:$0xff]  ;;  %v2948_v42 = vld [vmem:[#allocation2 + $0x122] sm:$0xff] }
 0x3ce   : > { %2852 = vrot.lane.b32.xlu0 %v2760_v7, %s5286_s18  ;;  %v2947_v7 = vld [vmem:[#allocation2 + $0x112] sm:$0xff] }
 0x3cf   : > { %2858 = vrot.lane.b32.xlu1 %v2763_v36, %s5286_s18  ;;  %v2949_v36 = vld [vmem:[#allocation2 + $0x12a] sm:$0xff] }
 0x3d2   : > { %2856 = vrot.lane.b32.xlu0 %v2762_v15, %s5286_s18  ;;  %v2951_v15 = vld [vmem:[#allocation2 + $0x142] sm:$0xff] }
 0x3d3   : > { %2990 = vrot.lane.b32.xlu1 %v2925_v1, %s5287_s19 }
 0x3d6   : > { %2988 = vrot.lane.b32.xlu0 %v2924_v57, %s5287_s19  ;;  %v2950_v57 = vld [vmem:[#allocation2 + $0x13a] sm:$0xff] }
 0x3d7   : > { %2994 = vrot.lane.b32.xlu1 %v6997_v53, %s5287_s19 }
 0x3da   : > { %2992 = vrot.lane.b32.xlu0 %v7001_v47, %s5287_s19 }
 0x3db   : > { %2998 = vrot.lane.b32.xlu1 %v7005_v30, %s5287_s19 }
 0x3de   : > { %2996 = vrot.lane.b32.xlu0 %v7009_v63, %s5287_s19 }
 0x3df   : > { %3002 = vrot.lane.b32.xlu1 %v7013_v40, %s5287_s19 }
 0x3e2   : > { %3000 = vrot.lane.b32.xlu0 %v7017_v22, %s5287_s19 }
 0x3e3   : > { %3006 = vrot.lane.b32.xlu1 %v7021_v39, %s5287_s19 }
 0x3e6   : > { %3004 = vrot.lane.b32.xlu0 %v7025_v10, %s5287_s19 }
 0x3e7   : > { %3010 = vrot.lane.b32.xlu1 %v7029_v27, %s5287_s19 }
 0x3ea   : > { %3008 = vrot.lane.b32.xlu0 %v7033_v43, %s5287_s19 }
 0x3eb   : > { %3014 = vrot.lane.b32.xlu1 %v7037_v33, %s5287_s19 }
 0x3ee   : > { %3012 = vrot.lane.b32.xlu0 %v7041_v20, %s5287_s19 }
 0x3ef   : > { %3018 = vrot.lane.b32.xlu1 %v7045_v23, %s5287_s19 }
 0x3f2   : > { %3016 = vrot.lane.b32.xlu0 %v7049_v18, %s5287_s19 }
 0x3f3   : > { %3022 = vrot.lane.b32.xlu1 %v2941_v58, %s5287_s19 }
 0x3f6   : > { %3020 = vrot.lane.b32.xlu0 %v7054_v16, %s5287_s19 }
 0x3f7   : > { %3026 = vrot.lane.b32.xlu1 %v2943_v51, %s5287_s19  ;;  %v2953_v51 = vld [vmem:[#allocation2 + $0x15a] sm:$0xff] }
 0x3fa   : > { %3024 = vrot.lane.b32.xlu0 %v2942_v35, %s5287_s19 }
 0x3fb   : > { %3030 = vrot.lane.b32.xlu1 %v2945_v31, %s5287_s19  ;;  %v2952_v31 = vld [vmem:[#allocation2 + $0x152] sm:$0xff] }
 0x3fe   : > { %3028 = vrot.lane.b32.xlu0 %v2944_v25, %s5287_s19 }
 0x3ff   : > { %3034 = vrot.lane.b32.xlu1 %v2947_v7, %s5287_s19  ;;  %v2955_v7 = vld [vmem:[#allocation2 + $0x172] sm:$0xff] }
 0x402   : > { %3032 = vrot.lane.b32.xlu0 %v2946_v52, %s5287_s19  ;;  %v2799_v45 = vpop.permute.xlu1 %2798 }
 0x403   : > { %3038 = vrot.lane.b32.xlu1 %v2949_v36, %s5287_s19  ;;  %2893 = vst.msk [vmem:[#allocation3 + $0x8] sm:$0xff] %vm539_vm2, %v2799_v45  ;;  %v2954_v36 = vld [vmem:[#allocation2 + $0x16a] sm:$0xff] }
 0x406   : > { %3036 = vrot.lane.b32.xlu0 %v2948_v42, %s5287_s19 }
 0x407   : > { %3042 = vrot.lane.b32.xlu1 %v2951_v15, %s5287_s19 }
 0x408   : > { %v2797_v1 = vpop.permute.xlu0 %2796 }
 0x409   : > { %2892 = vst.msk [vmem:[#allocation3] sm:$0xff] %vm539_vm2, %v2797_v1  ;;  %v2803_v58 = vpop.permute.xlu1 %2802 }
 0x40a   : > { %3040 = vrot.lane.b32.xlu0 %v2950_v57, %s5287_s19  ;;  %2895 = vst.msk [vmem:[#allocation3 + $0x18] sm:$0xff] %vm539_vm2, %v2803_v58 }
 0x40b   : > { %3046 = vrot.lane.b32.xlu1 %v2953_v51, %s5287_s19 }
 0x40c   : > { %v2801_v35 = vpop.permute.xlu0 %2800 }
 0x40d   : > { %2894 = vst.msk [vmem:[#allocation3 + $0x10] sm:$0xff] %vm539_vm2, %v2801_v35  ;;  %v2807_v25 = vpop.permute.xlu1 %2806 }
 0x40e   : > { %3044 = vrot.lane.b32.xlu0 %v2952_v31, %s5287_s19  ;;  %2897 = vst.msk [vmem:[#allocation3 + $0x28] sm:$0xff] %vm539_vm2, %v2807_v25 }
 0x40f   : > { %3050 = vrot.lane.b32.xlu1 %v2955_v7, %s5287_s19  ;;  %v4302_v7 = vld [vmem:[%s8063_s2 + $0x10] sm:$0xff] }
 0x410   : > { %v2805_v52 = vpop.permute.xlu0 %2804 }
 0x411   : > { %2896 = vst.msk [vmem:[#allocation3 + $0x20] sm:$0xff] %vm539_vm2, %v2805_v52  ;;  %v2811_v45 = vpop.permute.xlu1 %2810 }
 0x412   : > { %3048 = vrot.lane.b32.xlu0 %v2954_v36, %s5287_s19  ;;  %2899 = vst.msk [vmem:[#allocation3 + $0x38] sm:$0xff] %vm539_vm2, %v2811_v45  ;;  %v4300_v45 = vld [vmem:[%s8063_s2] sm:$0xff] }
 0x413   : > { %3182 = vrot.lane.b32.xlu1 %v6848_v59, %s5288_s20 }
 0x414   : > { %v2809_v42 = vpop.permute.xlu0 %2808 }
 0x415   : > { %2898 = vst.msk [vmem:[#allocation3 + $0x30] sm:$0xff] %vm539_vm2, %v2809_v42  ;;  %v2815_v15 = vpop.permute.xlu1 %2814 }
 0x416   : > { %3180 = vrot.lane.b32.xlu0 %v6880_v19, %s5288_s20  ;;  %2901 = vst.msk [vmem:[#allocation3 + $0x48] sm:$0xff] %vm539_vm2, %v2815_v15 }
 0x417   : > { %3186 = vrot.lane.b32.xlu1 %v6856_v37, %s5288_s20 }
 0x418   : > { %v2813_v1 = vpop.permute.xlu0 %2812 }
 0x419   : > { %2900 = vst.msk [vmem:[#allocation3 + $0x40] sm:$0xff] %vm539_vm2, %v2813_v1  ;;  %v2819_v57 = vpop.permute.xlu1 %2818 }
 0x41a   : > { %3184 = vrot.lane.b32.xlu0 %v6903_v29, %s5288_s20  ;;  %2903 = vst.msk [vmem:[#allocation3 + $0x58] sm:$0xff] %vm539_vm2, %v2819_v57 }
 0x41b   : > { %3190 = vrot.lane.b32.xlu1 %v6867_v34, %s5288_s20 }
 0x41c   : > { %v2817_v59 = vpop.permute.xlu0 %2816 }
 0x41d   : > { %2902 = vst.msk [vmem:[#allocation3 + $0x50] sm:$0xff] %vm539_vm2, %v2817_v59  ;;  %v2823_v19 = vpop.permute.xlu1 %2822 }
 0x41e   : > { %3188 = vrot.lane.b32.xlu0 %v6921_v13, %s5288_s20  ;;  %2905 = vst.msk [vmem:[#allocation3 + $0x68] sm:$0xff] %vm539_vm2, %v2823_v19 }
 0x41f   : > { %3372 = vrot.lane.b32.xlu1 %v6796_v3, %s5289_s21 }
 0x420   : > { %v2821_v58 = vpop.permute.xlu0 %2820 }
 0x421   : > { %2904 = vst.msk [vmem:[#allocation3 + $0x60] sm:$0xff] %vm539_vm2, %v2821_v58  ;;  %v2827_v51 = vpop.permute.xlu1 %2826 }
 0x422   : > { %3192 = vrot.lane.b32.xlu0 %v6933_v4, %s5288_s20  ;;  %2907 = vst.msk [vmem:[#allocation3 + $0x78] sm:$0xff] %vm539_vm2, %v2827_v51 }
 0x423   : > { %3564 = vrot.lane.b32.xlu1 %v7001_v47, %s5290_s22  ;;  %v4304_v47 = vld [vmem:[%s8063_s2 + $0x20] sm:$0xf] }
 0x424   : > { %v2825_v35 = vpop.permute.xlu0 %2824  ;;  %5200 = vmatprep.subr.msk.mxu1 %vm2058_vm5, %v4304_v47 }
 0x425   : > { %2906 = vst.msk [vmem:[#allocation3 + $0x70] sm:$0xff] %vm539_vm2, %v2825_v35  ;;  %v2831_v31 = vpop.permute.xlu1 %2830  ;;  %5201 = vmatpush3.msk.msra.mxu1 %vm2058_vm5, %v4304_v47 }
 0x426   : > { %3374 = vrot.lane.b32.xlu0 %v6792_v56, %s5289_s21  ;;  %2909 = vst.msk [vmem:[#allocation3 + $0x88] sm:$0xff] %vm539_vm2, %v2831_v31 }
 0x427   : > { %3756 = vrot.lane.b32.xlu1 %v6903_v29, %s5291_s4 }
 0x428   : > { %v2829_v3 = vpop.permute.xlu0 %2828 }
 0x429   : > { %2908 = vst.msk [vmem:[#allocation3 + $0x80] sm:$0xff] %vm539_vm2, %v2829_v3  ;;  %v2835_v25 = vpop.permute.xlu1 %2834 }
 0x42a   : > { %3566 = vrot.lane.b32.xlu0 %v6997_v53, %s5290_s22  ;;  %2911 = vst.msk [vmem:[#allocation3 + $0x98] sm:$0xff] %vm539_vm2, %v2835_v25  ;;  %v4303_v53 = vld [vmem:[%s8063_s2 + $0x18] sm:$0xff] }
 0x42b   : > { %3948 = vrot.lane.b32.xlu1 %v6804_v26, %s5292_s7  ;;  %5202 = vmatprep.subr.mxu1 %v4303_v53 }
 0x42c   : > { %v2833_v56 = vpop.permute.xlu0 %2832  ;;  %5203 = vmatpush3.msra.mxu1 %v4303_v53 }
 0x42d   : > { %2910 = vst.msk [vmem:[#allocation3 + $0x90] sm:$0xff] %vm539_vm2, %v2833_v56  ;;  %v2839_v29 = vpop.permute.xlu1 %2838  ;;  %5204 = vmatprep.subr.mxu1 %v4302_v7 }
 0x42e   : > { %3758 = vrot.lane.b32.xlu0 %v6856_v37, %s5291_s4  ;;  %2913 = vst.msk [vmem:[#allocation3 + $0xa8] sm:$0xff] %vm539_vm2, %v2839_v29  ;;  %5205 = vmatpush3.msra.mxu1 %v4302_v7  ;;  %v4301_v37 = vld [vmem:[%s8063_s2 + $0x8] sm:$0xff] }
 0x42f   : > { %3950 = vrot.lane.b32.xlu1 %v6800_v6, %s5292_s7  ;;  %5206 = vmatprep.subr.mxu1 %v4301_v37 }
 0x430   : > { %v2837_v52 = vpop.permute.xlu0 %2836  ;;  %5207 = vmatpush3.msra.mxu1 %v4301_v37 }
 0x431   : > { %2912 = vst.msk [vmem:[#allocation3 + $0xa0] sm:$0xff] %vm539_vm2, %v2837_v52  ;;  %v2843_v36 = vpop.permute.xlu1 %2842  ;;  %5208 = vmatprep.subr.mxu1 %v4300_v45 }
 0x432   : > { %3376 = vrot.lane.b32.xlu0 %v6804_v26, %s5289_s21  ;;  %2915 = vst.msk [vmem:[#allocation3 + $0xb8] sm:$0xff] %vm539_vm2, %v2843_v36  ;;  %5209 = vmatpush3.msra.mxu1 %v4300_v45 }
 0x433   : > { %3378 = vrot.lane.b32.xlu1 %v6800_v6, %s5289_s21 }
 0x434   : > { %v2841_v42 = vpop.permute.xlu0 %2840 }
 0x435   : > { %2914 = vst.msk [vmem:[#allocation3 + $0xb0] sm:$0xff] %vm539_vm2, %v2841_v42  ;;  %v2847_v15 = vpop.permute.xlu1 %2846 }
 0x436   : > { %4140 = vrot.lane.b32.xlu0 %v7009_v63, %s5293_s8  ;;  %2917 = vst.msk [vmem:[#allocation3 + $0xc8] sm:$0xff] %vm539_vm2, %v2847_v15 }
 0x437   : > { %4142 = vrot.lane.b32.xlu1 %v7005_v30, %s5293_s8 }
 0x438   : > { %v2845_v26 = vpop.permute.xlu0 %2844 }
 0x439   : > { %2916 = vst.msk [vmem:[#allocation3 + $0xc0] sm:$0xff] %vm539_vm2, %v2845_v26  ;;  %v2851_v1 = vpop.permute.xlu1 %2850 }
 0x43a   : > { %3568 = vrot.lane.b32.xlu0 %v7009_v63, %s5290_s22  ;;  %2919 = vst.msk [vmem:[#allocation3 + $0xd8] sm:$0xff] %vm539_vm2, %v2851_v1 }
 0x43b   : > { %3760 = vrot.lane.b32.xlu1 %v6921_v13, %s5291_s4 }
 0x43c   : > { %v2849_v6 = vpop.permute.xlu0 %2848 }
 0x43d   : > { %2918 = vst.msk [vmem:[#allocation3 + $0xd0] sm:$0xff] %vm539_vm2, %v2849_v6  ;;  %v2855_v57 = vpop.permute.xlu1 %2854  ;;  %v3894_v6 = vld [vmem:[#allocation2 + $0xa9] sm:$0xff] }
 0x43e   : > { %3570 = vrot.lane.b32.xlu0 %v7005_v30, %s5290_s22  ;;  %2921 = vst.msk [vmem:[#allocation3 + $0xe8] sm:$0xff] %vm539_vm2, %v2855_v57 }
 0x43f   : > { %3952 = vrot.lane.b32.xlu1 %v6813_v12, %s5292_s7 }
 0x440   : > { %v2853_v59 = vpop.permute.xlu0 %2852 }
 0x441   : > { %2920 = vst.msk [vmem:[#allocation3 + $0xe0] sm:$0xff] %vm539_vm2, %v2853_v59  ;;  %v2859_v63 = vpop.permute.xlu1 %2858 }
 0x442   : > { %3762 = vrot.lane.b32.xlu0 %v6867_v34, %s5291_s4  ;;  %2923 = vst.msk [vmem:[#allocation3 + $0xf8] sm:$0xff] %vm539_vm2, %v2859_v63 }
 0x443   : > { %3954 = vrot.lane.b32.xlu1 %v6808_v21, %s5292_s7 }
 0x444   : > { %v2857_v13 = vpop.permute.xlu0 %2856 }
 0x445   : > { %2922 = vst.msk [vmem:[#allocation3 + $0xf0] sm:$0xff] %vm539_vm2, %v2857_v13  ;;  %v2991_v30 = vpop.permute.xlu1 %2990  ;;  %v3895_v13 = vld [vmem:[#allocation2 + $0xb1] sm:$0xff] }
 0x446   : > { %3380 = vrot.lane.b32.xlu0 %v6813_v12, %s5289_s21  ;;  %3085 = vst.msk [vmem:[#allocation3 + $0x8] sm:$0xff] %vm732_vm3, %v2991_v30 }
 0x447   : > { %3382 = vrot.lane.b32.xlu1 %v6808_v21, %s5289_s21 }
 0x448   : > { %v2989_v19 = vpop.permute.xlu0 %2988 }
 0x449   : > { %3084 = vst.msk [vmem:[#allocation3] sm:$0xff] %vm732_vm3, %v2989_v19  ;;  %v2995_v34 = vpop.permute.xlu1 %2994 }
 0x44a   : > { %4144 = vrot.lane.b32.xlu0 %v7017_v22, %s5293_s8  ;;  %3087 = vst.msk [vmem:[#allocation3 + $0x18] sm:$0xff] %vm732_vm3, %v2995_v34 }
 0x44b   : > { %4146 = vrot.lane.b32.xlu1 %v7013_v40, %s5293_s8 }
 0x44c   : > { %v2993_v58 = vpop.permute.xlu0 %2992 }
 0x44d   : > { %3086 = vst.msk [vmem:[#allocation3 + $0x10] sm:$0xff] %vm732_vm3, %v2993_v58  ;;  %v2999_v12 = vpop.permute.xlu1 %2998 }
 0x44e   : > { %3572 = vrot.lane.b32.xlu0 %v7017_v22, %s5290_s22  ;;  %3089 = vst.msk [vmem:[#allocation3 + $0x28] sm:$0xff] %vm732_vm3, %v2999_v12 }
 0x44f   : > { %3764 = vrot.lane.b32.xlu1 %v6933_v4, %s5291_s4 }
 0x450   : > { %v2997_v21 = vpop.permute.xlu0 %2996 }
 0x451   : > { %3088 = vst.msk [vmem:[#allocation3 + $0x20] sm:$0xff] %vm732_vm3, %v2997_v21  ;;  %v3003_v51 = vpop.permute.xlu1 %3002 }
 0x452   : > { %3574 = vrot.lane.b32.xlu0 %v7013_v40, %s5290_s22  ;;  %3091 = vst.msk [vmem:[#allocation3 + $0x38] sm:$0xff] %vm732_vm3, %v3003_v51 }
 0x453   : > { %3956 = vrot.lane.b32.xlu1 %v6826_v0, %s5292_s7 }
 0x454   : > { %v3001_v35 = vpop.permute.xlu0 %3000 }
 0x455   : > { %3090 = vst.msk [vmem:[#allocation3 + $0x30] sm:$0xff] %vm732_vm3, %v3001_v35  ;;  %v3007_v22 = vpop.permute.xlu1 %3006 }
 0x456   : > { %3766 = vrot.lane.b32.xlu0 %v6872_v11, %s5291_s4  ;;  %3093 = vst.msk [vmem:[#allocation3 + $0x48] sm:$0xff] %vm732_vm3, %v3007_v22 }
 0x457   : > { %3384 = vrot.lane.b32.xlu1 %v6826_v0, %s5289_s21 }
 0x458   : > { %v3005_v4 = vpop.permute.xlu0 %3004 }
 0x459   : > { %3092 = vst.msk [vmem:[#allocation3 + $0x40] sm:$0xff] %vm732_vm3, %v3005_v4  ;;  %v3011_v40 = vpop.permute.xlu1 %3010 }
 0x45a   : > { %3194 = vrot.lane.b32.xlu0 %v6872_v11, %s5288_s20  ;;  %3095 = vst.msk [vmem:[#allocation3 + $0x58] sm:$0xff] %vm732_vm3, %v3011_v40 }
 0x45b   : > { %4148 = vrot.lane.b32.xlu1 %v7025_v10, %s5293_s8 }
 0x45c   : > { %v3009_v31 = vpop.permute.xlu0 %3008 }
 0x45d   : > { %3094 = vst.msk [vmem:[#allocation3 + $0x50] sm:$0xff] %vm732_vm3, %v3009_v31  ;;  %v3015_v3 = vpop.permute.xlu1 %3014  ;;  %v3897_v31 = vld [vmem:[#allocation2 + $0xc9] sm:$0xff] }
 0x45e   : > { %3958 = vrot.lane.b32.xlu0 %v6817_v17, %s5292_s7  ;;  %3097 = vst.msk [vmem:[#allocation3 + $0x68] sm:$0xff] %vm732_vm3, %v3015_v3 }
 0x45f   : > { %3576 = vrot.lane.b32.xlu1 %v7025_v10, %s5290_s22 }
 0x460   : > { %v3013_v0 = vpop.permute.xlu0 %3012 }
 0x461   : > { %3096 = vst.msk [vmem:[#allocation3 + $0x60] sm:$0xff] %vm732_vm3, %v3013_v0  ;;  %v3019_v11 = vpop.permute.xlu1 %3018  ;;  %v3514_v0 = vld [vmem:[#allocation2 + $0xc2] sm:$0xff] }
 0x462   : > { %3386 = vrot.lane.b32.xlu0 %v6817_v17, %s5289_s21  ;;  %3099 = vst.msk [vmem:[#allocation3 + $0x78] sm:$0xff] %vm732_vm3, %v3019_v11 }
 0x463   : > { %3578 = vrot.lane.b32.xlu1 %v7021_v39, %s5290_s22 }
 0x464   : > { %v3017_v25 = vpop.permute.xlu0 %3016 }
 0x465   : > { %3098 = vst.msk [vmem:[#allocation3 + $0x70] sm:$0xff] %vm732_vm3, %v3017_v25  ;;  %v3023_v47 = vpop.permute.xlu1 %3022 }
 0x466   : > { %4150 = vrot.lane.b32.xlu0 %v7021_v39, %s5293_s8  ;;  %3101 = vst.msk [vmem:[#allocation3 + $0x88] sm:$0xff] %vm732_vm3, %v3023_v47 }
 0x467   : > { %3196 = vrot.lane.b32.xlu1 %v6935_v2, %s5288_s20 }
 0x468   : > { %v3021_v10 = vpop.permute.xlu0 %3020 }
 0x469   : > { %3100 = vst.msk [vmem:[#allocation3 + $0x80] sm:$0xff] %vm732_vm3, %v3021_v10  ;;  %v3027_v17 = vpop.permute.xlu1 %3026 }
 0x46a   : > { %3768 = vrot.lane.b32.xlu0 %v6935_v2, %s5291_s4  ;;  %3103 = vst.msk [vmem:[#allocation3 + $0x98] sm:$0xff] %vm732_vm3, %v3027_v17 }
 0x46b   : > { %3960 = vrot.lane.b32.xlu1 %v6839_v50, %s5292_s7 }
 0x46c   : > { %v3025_v56 = vpop.permute.xlu0 %3024 }
 0x46d   : > { %3102 = vst.msk [vmem:[#allocation3 + $0x90] sm:$0xff] %vm732_vm3, %v3025_v56  ;;  %v3031_v39 = vpop.permute.xlu1 %3030 }
 0x46e   : > { %3770 = vrot.lane.b32.xlu0 %v6877_v44, %s5291_s4  ;;  %3105 = vst.msk [vmem:[#allocation3 + $0xa8] sm:$0xff] %vm732_vm3, %v3031_v39 }
 0x46f   : > { %3388 = vrot.lane.b32.xlu1 %v6839_v50, %s5289_s21 }
 0x470   : > { %v3029_v29 = vpop.permute.xlu0 %3028 }
 0x471   : > { %3104 = vst.msk [vmem:[#allocation3 + $0xa0] sm:$0xff] %vm732_vm3, %v3029_v29  ;;  %v3035_v2 = vpop.permute.xlu1 %3034  ;;  %v3898_v29 = vld [vmem:[#allocation2 + $0xd9] sm:$0xff] }
 0x472   : > { %3198 = vrot.lane.b32.xlu0 %v6877_v44, %s5288_s20  ;;  %3107 = vst.msk [vmem:[#allocation3 + $0xb8] sm:$0xff] %vm732_vm3, %v3035_v2 }
 0x473   : > { %4152 = vrot.lane.b32.xlu1 %v7033_v43, %s5293_s8 }
 0x474   : > { %v3033_v53 = vpop.permute.xlu0 %3032 }
 0x475   : > { %3106 = vst.msk [vmem:[#allocation3 + $0xb0] sm:$0xff] %vm732_vm3, %v3033_v53  ;;  %v3039_v7 = vpop.permute.xlu1 %3038 }
 0x476   : > { %3962 = vrot.lane.b32.xlu0 %v6831_v28, %s5292_s7  ;;  %3109 = vst.msk [vmem:[#allocation3 + $0xc8] sm:$0xff] %vm732_vm3, %v3039_v7 }
 0x477   : > { %3580 = vrot.lane.b32.xlu1 %v7033_v43, %s5290_s22 }
 0x478   : > { %v3037_v50 = vpop.permute.xlu0 %3036 }
 0x479   : > { %3108 = vst.msk [vmem:[#allocation3 + $0xc0] sm:$0xff] %vm732_vm3, %v3037_v50  ;;  %v3043_v44 = vpop.permute.xlu1 %3042  ;;  %v4090_v50 = vld [vmem:[#allocation2 + $0xda] sm:$0xff] }
 0x47a   : > { %3390 = vrot.lane.b32.xlu0 %v6831_v28, %s5289_s21  ;;  %3111 = vst.msk [vmem:[#allocation3 + $0xd8] sm:$0xff] %vm732_vm3, %v3043_v44 }
 0x47b   : > { %3582 = vrot.lane.b32.xlu1 %v7029_v27, %s5290_s22 }
 0x47c   : > { %v3041_v52 = vpop.permute.xlu0 %3040 }
 0x47d   : > { %3110 = vst.msk [vmem:[#allocation3 + $0xd0] sm:$0xff] %vm732_vm3, %v3041_v52  ;;  %v3047_v36 = vpop.permute.xlu1 %3046  ;;  %v3899_v52 = vld [vmem:[#allocation2 + $0xe1] sm:$0xff] }
 0x47e   : > { %4154 = vrot.lane.b32.xlu0 %v7029_v27, %s5293_s8  ;;  %3113 = vst.msk [vmem:[#allocation3 + $0xe8] sm:$0xff] %vm732_vm3, %v3047_v36 }
 0x47f   : > { %3200 = vrot.lane.b32.xlu1 %v6945_v8, %s5288_s20 }
 0x480   : > { %v3045_v43 = vpop.permute.xlu0 %3044 }
 0x481   : > { %3112 = vst.msk [vmem:[#allocation3 + $0xe0] sm:$0xff] %vm732_vm3, %v3045_v43  ;;  %v3051_v28 = vpop.permute.xlu1 %3050 }
 0x482   : > { %3772 = vrot.lane.b32.xlu0 %v6945_v8, %s5291_s4  ;;  %3115 = vst.msk [vmem:[#allocation3 + $0xf8] sm:$0xff] %vm732_vm3, %v3051_v28 }
 0x483   : > { %3964 = vrot.lane.b32.xlu1 %v6858_v55, %s5292_s7 }
 0x484   : > { %v3049_v37 = vpop.permute.xlu0 %3048 }
 0x485   : > { %3114 = vst.msk [vmem:[#allocation3 + $0xf0] sm:$0xff] %vm732_vm3, %v3049_v37  ;;  %v3183_v27 = vpop.permute.xlu1 %3182  ;;  %v3517_v37 = vld [vmem:[#allocation2 + $0xe2] sm:$0xff] }
 0x486   : > { %3774 = vrot.lane.b32.xlu0 %v6886_v41, %s5291_s4  ;;  %3277 = vst.msk [vmem:[#allocation3 + $0x8] sm:$0xff] %vm925_vm4, %v3183_v27 }
 0x487   : > { %3392 = vrot.lane.b32.xlu1 %v6858_v55, %s5289_s21 }
 0x488   : > { %v3181_v45 = vpop.permute.xlu0 %3180 }
 0x489   : > { %3276 = vst.msk [vmem:[#allocation3] sm:$0xff] %vm925_vm4, %v3181_v45  ;;  %v3187_v8 = vpop.permute.xlu1 %3186 }
 0x48a   : > { %3202 = vrot.lane.b32.xlu0 %v6886_v41, %s5288_s20  ;;  %3279 = vst.msk [vmem:[#allocation3 + $0x18] sm:$0xff] %vm925_vm4, %v3187_v8 }
 0x48b   : > { %4156 = vrot.lane.b32.xlu1 %v7041_v20, %s5293_s8 }
 0x48c   : > { %v3185_v42 = vpop.permute.xlu0 %3184 }
 0x48d   : > { %3278 = vst.msk [vmem:[#allocation3 + $0x10] sm:$0xff] %vm925_vm4, %v3185_v42  ;;  %v3191_v15 = vpop.permute.xlu1 %3190 }
 0x48e   : > { %3966 = vrot.lane.b32.xlu0 %v6846_v54, %s5292_s7  ;;  %3281 = vst.msk [vmem:[#allocation3 + $0x28] sm:$0xff] %vm925_vm4, %v3191_v15 }
 0x48f   : > { %3584 = vrot.lane.b32.xlu1 %v7041_v20, %s5290_s22 }
 0x490   : > { %v3189_v55 = vpop.permute.xlu0 %3188 }
 0x491   : > { %3280 = vst.msk [vmem:[#allocation3 + $0x20] sm:$0xff] %vm925_vm4, %v3189_v55  ;;  %v3373_v41 = vpop.permute.xlu1 %3372  ;;  %v3900_v55 = vld [vmem:[#allocation2 + $0xf1] sm:$0xff] }
 0x492   : > { %3394 = vrot.lane.b32.xlu0 %v6846_v54, %s5289_s21  ;;  %3468 = vst.msk [vmem:[#allocation3] sm:$0xff] %vm1118_vm6, %v3373_v41 }
 0x493   : > { %3586 = vrot.lane.b32.xlu1 %v7037_v33, %s5290_s22 }
 0x494   : > { %v3193_v26 = vpop.permute.xlu0 %3192 }
 0x495   : > { %3282 = vst.msk [vmem:[#allocation3 + $0x30] sm:$0xff] %vm925_vm4, %v3193_v26  ;;  %v3565_v1 = vpop.permute.xlu1 %3564 }
 0x496   : > { %4158 = vrot.lane.b32.xlu0 %v7037_v33, %s5293_s8  ;;  %3660 = vst.msk [vmem:[#allocation3] sm:$0xff] %vm1311_vm7, %v3565_v1 }
 0x497   : > { %3204 = vrot.lane.b32.xlu1 %v6951_v5, %s5288_s20 }
 0x498   : > { %v3375_v20 = vpop.permute.xlu0 %3374 }
 0x499   : > { %3469 = vst.msk [vmem:[#allocation3 + $0x8] sm:$0xff] %vm1118_vm6, %v3375_v20  ;;  %v3757_v54 = vpop.permute.xlu1 %3756  ;;  %v4092_v20 = vld [vmem:[#allocation2 + $0xf2] sm:$0xff] }
 0x49a   : > { %3776 = vrot.lane.b32.xlu0 %v6951_v5, %s5291_s4  ;;  %3852 = vst.msk [vmem:[#allocation3] sm:$0xff] %vm1505_vm8, %v3757_v54 }
 0x49b   : > { %3968 = vrot.lane.b32.xlu1 %v3894_v6, %s5292_s7 }
 0x49c   : > { %v3567_v57 = vpop.permute.xlu0 %3566 }
 0x49d   : > { %3661 = vst.msk [vmem:[#allocation3 + $0x8] sm:$0xff] %vm1311_vm7, %v3567_v57  ;;  %v3949_v33 = vpop.permute.xlu1 %3948 }
 0x49e   : > { %3778 = vrot.lane.b32.xlu0 %v6894_v9, %s5291_s4  ;;  %4044 = vst.msk [vmem:[#allocation3] sm:$0xff] %vm1698_vm9, %v3949_v33 }
 0x49f   : > { %3396 = vrot.lane.b32.xlu1 %v3894_v6, %s5289_s21  ;;  %v3901_v6 = vld [vmem:[#allocation2 + $0xf9] sm:$0xff] }
 0x4a0   : > { %v3759_v59 = vpop.permute.xlu0 %3758 }
 0x4a1   : > { %3853 = vst.msk [vmem:[#allocation3 + $0x8] sm:$0xff] %vm1505_vm8, %v3759_v59  ;;  %v3951_v5 = vpop.permute.xlu1 %3950 }
 0x4a2   : > { %3206 = vrot.lane.b32.xlu0 %v6894_v9, %s5288_s20  ;;  %4045 = vst.msk [vmem:[#allocation3 + $0x8] sm:$0xff] %vm1698_vm9, %v3951_v5  ;;  %v3519_v5 = vld [vmem:[#allocation2 + $0xfa] sm:$0xff] }
 0x4a3   : > { %4160 = vrot.lane.b32.xlu1 %v7049_v18, %s5293_s8 }
 0x4a4   : > { %v3377_v63 = vpop.permute.xlu0 %3376 }
 0x4a5   : > { %3470 = vst.msk [vmem:[#allocation3 + $0x10] sm:$0xff] %vm1118_vm6, %v3377_v63  ;;  %v3379_v30 = vpop.permute.xlu1 %3378 }
 0x4a6   : > { %3970 = vrot.lane.b32.xlu0 %v3895_v13, %s5292_s7  ;;  %3471 = vst.msk [vmem:[#allocation3 + $0x18] sm:$0xff] %vm1118_vm6, %v3379_v30 }
 0x4a7   : > { %3588 = vrot.lane.b32.xlu1 %v7049_v18, %s5290_s22 }
 0x4a8   : > { %v4141_v19 = vpop.permute.xlu0 %4140 }
 0x4a9   : > { %4236 = vst.msk [vmem:[#allocation3] sm:$0xff] %vm1891_vm10, %v4141_v19  ;;  %v4143_v9 = vpop.permute.xlu1 %4142 }
 0x4aa   : > { %3398 = vrot.lane.b32.xlu0 %v3895_v13, %s5289_s21  ;;  %4237 = vst.msk [vmem:[#allocation3 + $0x8] sm:$0xff] %vm1891_vm10, %v4143_v9 }
 0x4ab   : > { %3590 = vrot.lane.b32.xlu1 %v7045_v23, %s5290_s22 }
 0x4ac   : > { %v3569_v34 = vpop.permute.xlu0 %3568 }
 0x4ad   : > { %3662 = vst.msk [vmem:[#allocation3 + $0x10] sm:$0xff] %vm1311_vm7, %v3569_v34  ;;  %v3761_v58 = vpop.permute.xlu1 %3760  ;;  %v3902_v34 = vld [vmem:[#allocation2 + $0x109] sm:$0xff] }
 0x4ae   : > { %4162 = vrot.lane.b32.xlu0 %v7045_v23, %s5293_s8  ;;  %3854 = vst.msk [vmem:[#allocation3 + $0x10] sm:$0xff] %vm1505_vm8, %v3761_v58  ;;  %v3896_v23 = vld [vmem:[#allocation2 + $0xc1] sm:$0xff] }
 0x4af   : > { %3208 = vrot.lane.b32.xlu1 %v6957_v32, %s5288_s20 }
 0x4b0   : > { %v3571_v18 = vpop.permute.xlu0 %3570  ;;  %v4268_v12 = vld [vmem:[#allocation3] sm:$0xff] }
 0x4b1   : > { %3663 = vst.msk [vmem:[#allocation3 + $0x18] sm:$0xff] %vm1311_vm7, %v3571_v18  ;;  %5210 = vmatprep.mubr.msk.f32.mxu1 %vm1961_vm11, %v4268_v12  ;;  %v3953_v21 = vpop.permute.xlu1 %3952  ;;  %v4269_v51 = vld [vmem:[#allocation3 + $0x8] sm:$0xff] }
 0x4b2   : > { %3780 = vrot.lane.b32.xlu0 %v6957_v32, %s5291_s4  ;;  %4046 = vst.msk [vmem:[#allocation3 + $0x10] sm:$0xff] %vm1698_vm9, %v3953_v21  ;;  %5211 = vmatmul.mubr.msk.f32.vlgmr.msra.gmra.mxu1 %vm1961_vm11, %v4269_v51  ;;  %v4094_v21 = vld [vmem:[#allocation2 + $0x10a] sm:$0xff] }
 0x4b3   : > { %3972 = vrot.lane.b32.xlu1 %v3896_v23, %s5292_s7 }
 0x4b4   : > { %v3763_v35 = vpop.permute.xlu0 %3762 }
 0x4b5   : > { %3855 = vst.msk [vmem:[#allocation3 + $0x18] sm:$0xff] %vm1505_vm8, %v3763_v35  ;;  %v3955_v22 = vpop.permute.xlu1 %3954 }
 0x4b6   : > { %3782 = vrot.lane.b32.xlu0 %v6899_v60, %s5291_s4  ;;  %4047 = vst.msk [vmem:[#allocation3 + $0x18] sm:$0xff] %vm1698_vm9, %v3955_v22 }
 0x4b7   : > { %3400 = vrot.lane.b32.xlu1 %v3896_v23, %s5289_s21  ;;  %v3903_v23 = vld [vmem:[#allocation2 + $0x111] sm:$0xff] }
 0x4b8   : > { %v3381_v4 = vpop.permute.xlu0 %3380 }
 0x4b9   : > { %3472 = vst.msk [vmem:[#allocation3 + $0x20] sm:$0xff] %vm1118_vm6, %v3381_v4  ;;  %v3383_v32 = vpop.permute.xlu1 %3382 }
 0x4ba   : > { %3210 = vrot.lane.b32.xlu0 %v6899_v60, %s5288_s20  ;;  %3473 = vst.msk [vmem:[#allocation3 + $0x28] sm:$0xff] %vm1118_vm6, %v3383_v32  ;;  %v3521_v32 = vld [vmem:[#allocation2 + $0x112] sm:$0xff] }
 0x4bb   : > { %4164 = vrot.lane.b32.xlu1 %v7054_v16, %s5293_s8  ;;  %v3515_v16 = vld [vmem:[#allocation2 + $0xca] sm:$0xff] }
 0x4bc   : > { %v4145_v40 = vpop.permute.xlu0 %4144 }
 0x4bd   : > { %4238 = vst.msk [vmem:[#allocation3 + $0x10] sm:$0xff] %vm1891_vm10, %v4145_v40  ;;  %v4147_v3 = vpop.permute.xlu1 %4146 }
 0x4be   : > { %3974 = vrot.lane.b32.xlu0 %v3897_v31, %s5292_s7  ;;  %4239 = vst.msk [vmem:[#allocation3 + $0x18] sm:$0xff] %vm1891_vm10, %v4147_v3 }
 0x4bf   : > { %3592 = vrot.lane.b32.xlu1 %v3514_v0, %s5290_s22 }
 0x4c0   : > { %v3573_v11 = vpop.permute.xlu0 %3572 }
 0x4c1   : > { %3664 = vst.msk [vmem:[#allocation3 + $0x20] sm:$0xff] %vm1311_vm7, %v3573_v11  ;;  %v3765_v60 = vpop.permute.xlu1 %3764 }
 0x4c2   : > { %3402 = vrot.lane.b32.xlu0 %v3897_v31, %s5289_s21  ;;  %3856 = vst.msk [vmem:[#allocation3 + $0x20] sm:$0xff] %vm1505_vm8, %v3765_v60  ;;  %v3904_v60 = vld [vmem:[#allocation2 + $0x121] sm:$0xff] }
 0x4c3   : > { %3594 = vrot.lane.b32.xlu1 %v3515_v16, %s5290_s22 }
 0x4c4   : > { %v3575_v25 = vpop.permute.xlu0 %3574  ;;  %v4270_v47 = vld [vmem:[#allocation3 + $0x10] sm:$0xff] }
 0x4c5   : > { %3665 = vst.msk [vmem:[#allocation3 + $0x28] sm:$0xff] %vm1311_vm7, %v3575_v25  ;;  %5213 = vmatprep.mubr.msk.f32.mxu1 %vm1961_vm11, %v4270_v47  ;;  %v3957_v10 = vpop.permute.xlu1 %3956  ;;  %v4271_v17 = vld [vmem:[#allocation3 + $0x18] sm:$0xff] }
 0x4c6   : > { %4166 = vrot.lane.b32.xlu0 %v3515_v16, %s5293_s8  ;;  %4048 = vst.msk [vmem:[#allocation3 + $0x20] sm:$0xff] %vm1698_vm9, %v3957_v10  ;;  %5214 = vmatmul.mubr.msk.f32.gmra.mxu1 %vm1961_vm11, %v4271_v17  ;;  %v4096_v17 = vld [vmem:[#allocation2 + $0x122] sm:$0xff] }
 0x4c7   : > { %3212 = vrot.lane.b32.xlu1 %v6962_v61, %s5288_s20 }
 0x4c8   : > { %v3767_v56 = vpop.permute.xlu0 %3766 }
 0x4c9   : > { %3857 = vst.msk [vmem:[#allocation3 + $0x28] sm:$0xff] %vm1505_vm8, %v3767_v56  ;;  %v3385_v39 = vpop.permute.xlu1 %3384 }
 0x4ca   : > { %3784 = vrot.lane.b32.xlu0 %v6962_v61, %s5291_s4  ;;  %3474 = vst.msk [vmem:[#allocation3 + $0x30] sm:$0xff] %vm1118_vm6, %v3385_v39 }
 0x4cb   : > { %3976 = vrot.lane.b32.xlu1 %v3898_v29, %s5292_s7 }
 0x4cc   : > { %v3195_v2 = vpop.permute.xlu0 %3194 }
 0x4cd   : > { %3283 = vst.msk [vmem:[#allocation3 + $0x38] sm:$0xff] %vm925_vm4, %v3195_v2  ;;  %v4149_v53 = vpop.permute.xlu1 %4148 }
 0x4ce   : > { %3786 = vrot.lane.b32.xlu0 %v6901_v38, %s5291_s4  ;;  %4240 = vst.msk [vmem:[#allocation3 + $0x20] sm:$0xff] %vm1891_vm10, %v4149_v53 }
 0x4cf   : > { %3404 = vrot.lane.b32.xlu1 %v3898_v29, %s5289_s21 }
 0x4d0   : > { %v3959_v7 = vpop.permute.xlu0 %3958 }
 0x4d1   : > { %4049 = vst.msk [vmem:[#allocation3 + $0x28] sm:$0xff] %vm1698_vm9, %v3959_v7  ;;  %v3577_v61 = vpop.permute.xlu1 %3576  ;;  %v3523_v7 = vld [vmem:[#allocation2 + $0x12a] sm:$0xff] }
 0x4d2   : > { %3214 = vrot.lane.b32.xlu0 %v6901_v38, %s5288_s20  ;;  %3666 = vst.msk [vmem:[#allocation3 + $0x30] sm:$0xff] %vm1311_vm7, %v3577_v61 }
 0x4d3   : > { %4168 = vrot.lane.b32.xlu1 %v4090_v50, %s5293_s8 }
 0x4d4   : > { %v3387_v44 = vpop.permute.xlu0 %3386 }
 0x4d5   : > { %3475 = vst.msk [vmem:[#allocation3 + $0x38] sm:$0xff] %vm1118_vm6, %v3387_v44  ;;  %v3579_v36 = vpop.permute.xlu1 %3578  ;;  %v4272_v43 = vld [vmem:[#allocation3 + $0x20] sm:$0xff]  ;;  %v3140_v44 = vld [vmem:[#allocation2 + $0x138] sm:$0xff] }
 0x4d6   : > { %3978 = vrot.lane.b32.xlu0 %v3899_v52, %s5292_s7  ;;  %3667 = vst.msk [vmem:[#allocation3 + $0x38] sm:$0xff] %vm1311_vm7, %v3579_v36  ;;  %5216 = vmatprep.mubr.msk.f32.mxu1 %vm1961_vm11, %v4272_v43 }
 0x4d7   : > { %3596 = vrot.lane.b32.xlu1 %v4090_v50, %s5290_s22 }
 0x4d8   : > { %v4151_v38 = vpop.permute.xlu0 %4150 }
 0x4d9   : > { %4241 = vst.msk [vmem:[#allocation3 + $0x28] sm:$0xff] %vm1891_vm10, %v4151_v38  ;;  %v3197_v28 = vpop.permute.xlu1 %3196  ;;  %v3906_v38 = vld [vmem:[#allocation2 + $0x139] sm:$0xff] }
 0x4da   : > { %3406 = vrot.lane.b32.xlu0 %v3899_v52, %s5289_s21  ;;  %3284 = vst.msk [vmem:[#allocation3 + $0x40] sm:$0xff] %vm925_vm4, %v3197_v28 }
 0x4db   : > { %3598 = vrot.lane.b32.xlu1 %v3517_v37, %s5290_s22 }
 0x4dc   : > { %v3769_v27 = vpop.permute.xlu0 %3768 }
 0x4dd   : > { %3858 = vst.msk [vmem:[#allocation3 + $0x30] sm:$0xff] %vm1505_vm8, %v3769_v27  ;;  %v3961_v45 = vpop.permute.xlu1 %3960 }
 0x4de   : > { %4170 = vrot.lane.b32.xlu0 %v3517_v37, %s5293_s8  ;;  %4050 = vst.msk [vmem:[#allocation3 + $0x30] sm:$0xff] %vm1698_vm9, %v3961_v45  ;;  %v3715_v37 = vld [vmem:[#allocation2 + $0x140] sm:$0xff] }
 0x4df   : > { %3216 = vrot.lane.b32.xlu1 %v6967_v49, %s5288_s20 }
 0x4e0   : > { %v3771_v8 = vpop.permute.xlu0 %3770  ;;  %v4273_v42 = vld [vmem:[#allocation3 + $0x28] sm:$0xff] }
 0x4e1   : > { %3859 = vst.msk [vmem:[#allocation3 + $0x38] sm:$0xff] %vm1505_vm8, %v3771_v8  ;;  %5217 = vmatmul.mubr.msk.f32.gmra.mxu1 %vm1961_vm11, %v4273_v42  ;;  %v3389_v15 = vpop.permute.xlu1 %3388  ;;  %v4098_v42 = vld [vmem:[#allocation2 + $0x13a] sm:$0xff] }
 0x4e2   : > { %3788 = vrot.lane.b32.xlu0 %v6967_v49, %s5291_s4  ;;  %3476 = vst.msk [vmem:[#allocation3 + $0x40] sm:$0xff] %vm1118_vm6, %v3389_v15 }
 0x4e3   : > { %3980 = vrot.lane.b32.xlu1 %v3900_v55, %s5292_s7 }
 0x4e4   : > { %v3199_v41 = vpop.permute.xlu0 %3198 }
 0x4e5   : > { %3285 = vst.msk [vmem:[#allocation3 + $0x48] sm:$0xff] %vm925_vm4, %v3199_v41  ;;  %v4153_v26 = vpop.permute.xlu1 %4152 }
 0x4e6   : > { %3790 = vrot.lane.b32.xlu0 %v6910_v62, %s5291_s4  ;;  %4242 = vst.msk [vmem:[#allocation3 + $0x30] sm:$0xff] %vm1891_vm10, %v4153_v26 }
 0x4e7   : > { %3408 = vrot.lane.b32.xlu1 %v3900_v55, %s5289_s21  ;;  %v3907_v55 = vld [vmem:[#allocation2 + $0x141] sm:$0xff] }
 0x4e8   : > { %v3963_v1 = vpop.permute.xlu0 %3962 }
 0x4e9   : > { %4051 = vst.msk [vmem:[#allocation3 + $0x38] sm:$0xff] %vm1698_vm9, %v3963_v1  ;;  %v3581_v49 = vpop.permute.xlu1 %3580 }
 0x4ea   : > { %3218 = vrot.lane.b32.xlu0 %v6910_v62, %s5288_s20  ;;  %3668 = vst.msk [vmem:[#allocation3 + $0x40] sm:$0xff] %vm1311_vm7, %v3581_v49 }
 0x4eb   : > { %4172 = vrot.lane.b32.xlu1 %v4092_v20, %s5293_s8 }
 0x4ec   : > { %v3391_v54 = vpop.permute.xlu0 %3390 }
 0x4ed   : > { %3477 = vst.msk [vmem:[#allocation3 + $0x48] sm:$0xff] %vm1118_vm6, %v3391_v54  ;;  %v3583_v57 = vpop.permute.xlu1 %3582  ;;  %v4274_v33 = vld [vmem:[#allocation3 + $0x30] sm:$0xff] }
 0x4ee   : > { %3982 = vrot.lane.b32.xlu0 %v3901_v6, %s5292_s7  ;;  %3669 = vst.msk [vmem:[#allocation3 + $0x48] sm:$0xff] %vm1311_vm7, %v3583_v57  ;;  %5219 = vmatprep.mubr.msk.f32.mxu1 %vm1961_vm11, %v4274_v33  ;;  %v3142_v57 = vld [vmem:[#allocation2 + $0x150] sm:$0xff] }
 0x4ef   : > { %3600 = vrot.lane.b32.xlu1 %v4092_v20, %s5290_s22  ;;  %v3525_v20 = vld [vmem:[#allocation2 + $0x142] sm:$0xff] }
 0x4f0   : > { %v4155_v62 = vpop.permute.xlu0 %4154 }
 0x4f1   : > { %4243 = vst.msk [vmem:[#allocation3 + $0x38] sm:$0xff] %vm1891_vm10, %v4155_v62  ;;  %v3201_v59 = vpop.permute.xlu1 %3200 }
 0x4f2   : > { %3410 = vrot.lane.b32.xlu0 %v3901_v6, %s5289_s21  ;;  %3286 = vst.msk [vmem:[#allocation3 + $0x50] sm:$0xff] %vm925_vm4, %v3201_v59 }
 0x4f3   : > { %3602 = vrot.lane.b32.xlu1 %v3519_v5, %s5290_s22 }
 0x4f4   : > { %v3773_v63 = vpop.permute.xlu0 %3772 }
 0x4f5   : > { %3860 = vst.msk [vmem:[#allocation3 + $0x40] sm:$0xff] %vm1505_vm8, %v3773_v63  ;;  %v3965_v13 = vpop.permute.xlu1 %3964 }
 0x4f6   : > { %4174 = vrot.lane.b32.xlu0 %v3519_v5, %s5293_s8  ;;  %4052 = vst.msk [vmem:[#allocation3 + $0x40] sm:$0xff] %vm1698_vm9, %v3965_v13  ;;  %v3908_v5 = vld [vmem:[#allocation2 + $0x151] sm:$0xff] }
 0x4f7   : > { %3220 = vrot.lane.b32.xlu1 %v6972_v46, %s5288_s20  ;;  %v3717_v13 = vld [vmem:[#allocation2 + $0x158] sm:$0xff] }
 0x4f8   : > { %v3775_v30 = vpop.permute.xlu0 %3774  ;;  %v4275_v19 = vld [vmem:[#allocation3 + $0x38] sm:$0xff] }
 0x4f9   : > { %3861 = vst.msk [vmem:[#allocation3 + $0x48] sm:$0xff] %vm1505_vm8, %v3775_v30  ;;  %5220 = vmatmul.mubr.msk.f32.gmra.mxu1 %vm1961_vm11, %v4275_v19  ;;  %v3393_v9 = vpop.permute.xlu1 %3392 }
 0x4fa   : > { %3792 = vrot.lane.b32.xlu0 %v6972_v46, %s5291_s4  ;;  %3478 = vst.msk [vmem:[#allocation3 + $0x50] sm:$0xff] %vm1118_vm6, %v3393_v9 }
 0x4fb   : > { %3984 = vrot.lane.b32.xlu1 %v3902_v34, %s5292_s7 }
 0x4fc   : > { %v3203_v58 = vpop.permute.xlu0 %3202 }
 0x4fd   : > { %3287 = vst.msk [vmem:[#allocation3 + $0x58] sm:$0xff] %vm925_vm4, %v3203_v58  ;;  %v4157_v18 = vpop.permute.xlu1 %4156 }
 0x4fe   : > { %3794 = vrot.lane.b32.xlu0 %v6918_v14, %s5291_s4  ;;  %4244 = vst.msk [vmem:[#allocation3 + $0x40] sm:$0xff] %vm1891_vm10, %v4157_v18  ;;  %v3909_v18 = vld [vmem:[#allocation2 + $0x159] sm:$0xff] }
 0x4ff   : > { %3412 = vrot.lane.b32.xlu1 %v3902_v34, %s5289_s21  ;;  %v4100_v34 = vld [vmem:[#allocation2 + $0x152] sm:$0xff] }
 0x500   : > { %v3967_v12 = vpop.permute.xlu0 %3966 }
 0x501   : > { %4053 = vst.msk [vmem:[#allocation3 + $0x48] sm:$0xff] %vm1698_vm9, %v3967_v12  ;;  %v3585_v46 = vpop.permute.xlu1 %3584 }
 0x502   : > { %3222 = vrot.lane.b32.xlu0 %v6918_v14, %s5288_s20  ;;  %3670 = vst.msk [vmem:[#allocation3 + $0x50] sm:$0xff] %vm1311_vm7, %v3585_v46 }
 0x503   : > { %4176 = vrot.lane.b32.xlu1 %v4094_v21, %s5293_s8 }
 0x504   : > { %v3395_v51 = vpop.permute.xlu0 %3394 }
 0x505   : > { %3479 = vst.msk [vmem:[#allocation3 + $0x58] sm:$0xff] %vm1118_vm6, %v3395_v51  ;;  %v3587_v35 = vpop.permute.xlu1 %3586  ;;  %v4276_v22 = vld [vmem:[#allocation3 + $0x40] sm:$0xff] }
 0x506   : > { %3986 = vrot.lane.b32.xlu0 %v3903_v23, %s5292_s7  ;;  %3671 = vst.msk [vmem:[#allocation3 + $0x58] sm:$0xff] %vm1311_vm7, %v3587_v35  ;;  %5222 = vmatprep.mubr.msk.f32.mxu1 %vm1961_vm11, %v4276_v22 }
 0x507   : > { %3604 = vrot.lane.b32.xlu1 %v4094_v21, %s5290_s22 }
 0x508   : > { %v4159_v14 = vpop.permute.xlu0 %4158 }
 0x509   : > { %4245 = vst.msk [vmem:[#allocation3 + $0x48] sm:$0xff] %vm1891_vm10, %v4159_v14  ;;  %v3205_v4 = vpop.permute.xlu1 %3204  ;;  %v3144_v14 = vld [vmem:[#allocation2 + $0x168] sm:$0xff] }
 0x50a   : > { %3414 = vrot.lane.b32.xlu0 %v3903_v23, %s5289_s21  ;;  %3288 = vst.msk [vmem:[#allocation3 + $0x60] sm:$0xff] %vm925_vm4, %v3205_v4  ;;  %v3527_v23 = vld [vmem:[#allocation2 + $0x15a] sm:$0xff] }
 0x50b   : > { %3606 = vrot.lane.b32.xlu1 %v3521_v32, %s5290_s22 }
 0x50c   : > { %v3777_v40 = vpop.permute.xlu0 %3776 }
 0x50d   : > { %3862 = vst.msk [vmem:[#allocation3 + $0x50] sm:$0xff] %vm1505_vm8, %v3777_v40  ;;  %v3969_v31 = vpop.permute.xlu1 %3968 }
 0x50e   : > { %4178 = vrot.lane.b32.xlu0 %v3521_v32, %s5293_s8  ;;  %4054 = vst.msk [vmem:[#allocation3 + $0x50] sm:$0xff] %vm1698_vm9, %v3969_v31  ;;  %v3910_v31 = vld [vmem:[#allocation2 + $0x169] sm:$0xff] }
 0x50f   : > { %3224 = vrot.lane.b32.xlu1 %v6976_v24, %s5288_s20 }
 0x510   : > { %v3779_v3 = vpop.permute.xlu0 %3778  ;;  %v4277_v0 = vld [vmem:[#allocation3 + $0x48] sm:$0xff] }
 0x511   : > { %3863 = vst.msk [vmem:[#allocation3 + $0x58] sm:$0xff] %vm1505_vm8, %v3779_v3  ;;  %5223 = vmatmul.mubr.msk.f32.gmra.mxu1 %vm1961_vm11, %v4277_v0  ;;  %v3397_v11 = vpop.permute.xlu1 %3396  ;;  %v3719_v0 = vld [vmem:[#allocation2 + $0x170] sm:$0xff] }
 0x512   : > { %3796 = vrot.lane.b32.xlu0 %v6976_v24, %s5291_s4  ;;  %3480 = vst.msk [vmem:[#allocation3 + $0x60] sm:$0xff] %vm1118_vm6, %v3397_v11  ;;  %v3139_v24 = vld [vmem:[#allocation2 + $0x128] sm:$0xff] }
 0x513   : > { %3988 = vrot.lane.b32.xlu1 %v3904_v60, %s5292_s7 }
 0x514   : > { %v3207_v16 = vpop.permute.xlu0 %3206 }
 0x515   : > { %3289 = vst.msk [vmem:[#allocation3 + $0x68] sm:$0xff] %vm925_vm4, %v3207_v16  ;;  %v4161_v25 = vpop.permute.xlu1 %4160 }
 0x516   : > { %3798 = vrot.lane.b32.xlu0 %v6926_v48, %s5291_s4  ;;  %4246 = vst.msk [vmem:[#allocation3 + $0x50] sm:$0xff] %vm1891_vm10, %v4161_v25  ;;  %v3905_v48 = vld [vmem:[#allocation2 + $0x129] sm:$0xff] }
 0x517   : > { %3416 = vrot.lane.b32.xlu1 %v3904_v60, %s5289_s21  ;;  %v4102_v25 = vld [vmem:[#allocation2 + $0x16a] sm:$0xff] }
 0x518   : > { %v3971_v47 = vpop.permute.xlu0 %3970 }
 0x519   : > { %4055 = vst.msk [vmem:[#allocation3 + $0x58] sm:$0xff] %vm1698_vm9, %v3971_v47  ;;  %v3589_v10 = vpop.permute.xlu1 %3588 }
 0x51a   : > { %3226 = vrot.lane.b32.xlu0 %v3139_v24, %s5288_s20  ;;  %3672 = vst.msk [vmem:[#allocation3 + $0x60] sm:$0xff] %vm1311_vm7, %v3589_v10  ;;  %v3911_v24 = vld [vmem:[#allocation2 + $0x171] sm:$0xff] }
 0x51b   : > { %4180 = vrot.lane.b32.xlu1 %v4096_v17, %s5293_s8 }
 0x51c   : > { %v3399_v56 = vpop.permute.xlu0 %3398 }
 0x51d   : > { %3481 = vst.msk [vmem:[#allocation3 + $0x68] sm:$0xff] %vm1118_vm6, %v3399_v56  ;;  %v3591_v39 = vpop.permute.xlu1 %3590  ;;  %v4278_v29 = vld [vmem:[#allocation3 + $0x50] sm:$0xff] }
 0x51e   : > { %3990 = vrot.lane.b32.xlu0 %v3905_v48, %s5292_s7  ;;  %3673 = vst.msk [vmem:[#allocation3 + $0x68] sm:$0xff] %vm1311_vm7, %v3591_v39  ;;  %5225 = vmatprep.mubr.msk.f32.mxu1 %vm1961_vm11, %v4278_v29  ;;  %v3529_v39 = vld [vmem:[#allocation2 + $0x172] sm:$0xff] }
 0x51f   : > { %3608 = vrot.lane.b32.xlu1 %v4096_v17, %s5290_s22 }
 0x520   : > { %v4163_v2 = vpop.permute.xlu0 %4162 }
 0x521   : > { %4247 = vst.msk [vmem:[#allocation3 + $0x58] sm:$0xff] %vm1891_vm10, %v4163_v2  ;;  %v3209_v53 = vpop.permute.xlu1 %3208 }
 0x522   : > { %3418 = vrot.lane.b32.xlu0 %v3905_v48, %s5289_s21  ;;  %3290 = vst.msk [vmem:[#allocation3 + $0x70] sm:$0xff] %vm925_vm4, %v3209_v53  ;;  %v3146_v53 = vld [vmem:[#allocation2 + $0x180] sm:$0xff] }
 0x523   : > { %3610 = vrot.lane.b32.xlu1 %v3523_v7, %s5290_s22 }
 0x524   : > { %v3781_v61 = vpop.permute.xlu0 %3780 }
 0x525   : > { %3864 = vst.msk [vmem:[#allocation3 + $0x60] sm:$0xff] %vm1505_vm8, %v3781_v61  ;;  %v3973_v50 = vpop.permute.xlu1 %3972 }
 0x526   : > { %4182 = vrot.lane.b32.xlu0 %v3523_v7, %s5293_s8  ;;  %4056 = vst.msk [vmem:[#allocation3 + $0x60] sm:$0xff] %vm1698_vm9, %v3973_v50 }
 0x527   : > { %3228 = vrot.lane.b32.xlu1 %v3140_v44, %s5288_s20 }
 0x528   : > { %v3783_v52 = vpop.permute.xlu0 %3782  ;;  %v4279_v36 = vld [vmem:[#allocation3 + $0x58] sm:$0xff] }
 0x529   : > { %3865 = vst.msk [vmem:[#allocation3 + $0x68] sm:$0xff] %vm1505_vm8, %v3783_v52  ;;  %5226 = vmatmul.mubr.msk.f32.gmra.mxu1 %vm1961_vm11, %v4279_v36  ;;  %v3401_v43 = vpop.permute.xlu1 %3400  ;;  %v3721_v36 = vld [vmem:[#allocation2 + $0x188] sm:$0xff] }
 0x52a   : > { %3800 = vrot.lane.b32.xlu0 %v3140_v44, %s5291_s4  ;;  %3482 = vst.msk [vmem:[#allocation3 + $0x70] sm:$0xff] %vm1118_vm6, %v3401_v43  ;;  %v3912_v44 = vld [vmem:[#allocation2 + $0x181] sm:$0xff] }
 0x52b   : > { %3992 = vrot.lane.b32.xlu1 %v3906_v38, %s5292_s7 }
 0x52c   : > { %v3211_v28 = vpop.permute.xlu0 %3210 }
 0x52d   : > { %3291 = vst.msk [vmem:[#allocation3 + $0x78] sm:$0xff] %vm925_vm4, %v3211_v28  ;;  %v4165_v27 = vpop.permute.xlu1 %4164 }
 0x52e   : > { %3802 = vrot.lane.b32.xlu0 %v3715_v37, %s5291_s4  ;;  %4248 = vst.msk [vmem:[#allocation3 + $0x60] sm:$0xff] %vm1891_vm10, %v4165_v27 }
 0x52f   : > { %3420 = vrot.lane.b32.xlu1 %v3906_v38, %s5289_s21 }
 0x530   : > { %v3975_v45 = vpop.permute.xlu0 %3974 }
 0x531   : > { %4057 = vst.msk [vmem:[#allocation3 + $0x68] sm:$0xff] %vm1698_vm9, %v3975_v45  ;;  %v3593_v8 = vpop.permute.xlu1 %3592  ;;  %v3913_v45 = vld [vmem:[#allocation2 + $0x189] sm:$0xff] }
 0x532   : > { %3230 = vrot.lane.b32.xlu0 %v3715_v37, %s5288_s20  ;;  %3674 = vst.msk [vmem:[#allocation3 + $0x70] sm:$0xff] %vm1311_vm7, %v3593_v8  ;;  %v4104_v37 = vld [vmem:[#allocation2 + $0x182] sm:$0xff] }
 0x533   : > { %4184 = vrot.lane.b32.xlu1 %v4098_v42, %s5293_s8 }
 0x534   : > { %v3403_v15 = vpop.permute.xlu0 %3402 }
 0x535   : > { %3483 = vst.msk [vmem:[#allocation3 + $0x78] sm:$0xff] %vm1118_vm6, %v3403_v15  ;;  %v3595_v41 = vpop.permute.xlu1 %3594  ;;  %v4280_v26 = vld [vmem:[#allocation3 + $0x60] sm:$0xff] }
 0x536   : > { %3994 = vrot.lane.b32.xlu0 %v3907_v55, %s5292_s7  ;;  %3675 = vst.msk [vmem:[#allocation3 + $0x78] sm:$0xff] %vm1311_vm7, %v3595_v41  ;;  %5228 = vmatprep.mubr.msk.f32.mxu1 %vm1961_vm11, %v4280_v26  ;;  %v3531_v41 = vld [vmem:[#allocation2 + $0x18a] sm:$0xff] }
 0x537   : > { %3612 = vrot.lane.b32.xlu1 %v4098_v42, %s5290_s22 }
 0x538   : > { %v4167_v1 = vpop.permute.xlu0 %4166 }
 0x539   : > { %4249 = vst.msk [vmem:[#allocation3 + $0x68] sm:$0xff] %vm1891_vm10, %v4167_v1  ;;  %v3213_v49 = vpop.permute.xlu1 %3212 }
 0x53a   : > { %3422 = vrot.lane.b32.xlu0 %v3907_v55, %s5289_s21  ;;  %3292 = vst.msk [vmem:[#allocation3 + $0x80] sm:$0xff] %vm925_vm4, %v3213_v49  ;;  %v3723_v49 = vld [vmem:[#allocation2 + $0x1a0] sm:$0xff] }
 0x53b   : > { %3614 = vrot.lane.b32.xlu1 %v3525_v20, %s5290_s22 }
 0x53c   : > { %v3785_v54 = vpop.permute.xlu0 %3784 }
 0x53d   : > { %3866 = vst.msk [vmem:[#allocation3 + $0x70] sm:$0xff] %vm1505_vm8, %v3785_v54  ;;  %v3977_v6 = vpop.permute.xlu1 %3976 }
 0x53e   : > { %4186 = vrot.lane.b32.xlu0 %v3525_v20, %s5293_s8  ;;  %4058 = vst.msk [vmem:[#allocation3 + $0x70] sm:$0xff] %vm1698_vm9, %v3977_v6  ;;  %v3722_v6 = vld [vmem:[#allocation2 + $0x198] sm:$0xff] }
 0x53f   : > { %3232 = vrot.lane.b32.xlu1 %v3142_v57, %s5288_s20 }
 0x540   : > { %v3787_v33 = vpop.permute.xlu0 %3786  ;;  %v4281_v62 = vld [vmem:[#allocation3 + $0x68] sm:$0xff] }
 0x541   : > { %3867 = vst.msk [vmem:[#allocation3 + $0x78] sm:$0xff] %vm1505_vm8, %v3787_v33  ;;  %5229 = vmatmul.mubr.msk.f32.gmra.mxu1 %vm1961_vm11, %v4281_v62  ;;  %v3405_v59 = vpop.permute.xlu1 %3404  ;;  %v3915_v33 = vld [vmem:[#allocation2 + $0x1a1] sm:$0xff] }
 0x542   : > { %3804 = vrot.lane.b32.xlu0 %v3142_v57, %s5291_s4  ;;  %3484 = vst.msk [vmem:[#allocation3 + $0x80] sm:$0xff] %vm1118_vm6, %v3405_v59  ;;  %v3914_v59 = vld [vmem:[#allocation2 + $0x199] sm:$0xff] }
 0x543   : > { %3996 = vrot.lane.b32.xlu1 %v3908_v5, %s5292_s7 }
 0x544   : > { %v3215_v63 = vpop.permute.xlu0 %3214 }
 0x545   : > { %3293 = vst.msk [vmem:[#allocation3 + $0x88] sm:$0xff] %vm925_vm4, %v3215_v63  ;;  %v4169_v30 = vpop.permute.xlu1 %4168  ;;  %v4107_v63 = vld [vmem:[#allocation2 + $0x1a2] sm:$0xff] }
 0x546   : > { %3806 = vrot.lane.b32.xlu0 %v3717_v13, %s5291_s4  ;;  %4250 = vst.msk [vmem:[#allocation3 + $0x70] sm:$0xff] %vm1891_vm10, %v4169_v30  ;;  %v4106_v30 = vld [vmem:[#allocation2 + $0x19a] sm:$0xff] }
 0x547   : > { %3424 = vrot.lane.b32.xlu1 %v3908_v5, %s5289_s21 }
 0x548   : > { %v3979_v19 = vpop.permute.xlu0 %3978 }
 0x549   : > { %4059 = vst.msk [vmem:[#allocation3 + $0x78] sm:$0xff] %vm1698_vm9, %v3979_v19  ;;  %v3597_v9 = vpop.permute.xlu1 %3596 }
 0x54a   : > { %3234 = vrot.lane.b32.xlu0 %v3717_v13, %s5288_s20  ;;  %3676 = vst.msk [vmem:[#allocation3 + $0x80] sm:$0xff] %vm1311_vm7, %v3597_v9 }
 0x54b   : > { %4188 = vrot.lane.b32.xlu1 %v4100_v34, %s5293_s8 }
 0x54c   : > { %v3407_v58 = vpop.permute.xlu0 %3406 }
 0x54d   : > { %3485 = vst.msk [vmem:[#allocation3 + $0x88] sm:$0xff] %vm1118_vm6, %v3407_v58  ;;  %v3599_v12 = vpop.permute.xlu1 %3598  ;;  %v4282_v46 = vld [vmem:[#allocation3 + $0x70] sm:$0xff] }
 0x54e   : > { %3998 = vrot.lane.b32.xlu0 %v3909_v18, %s5292_s7  ;;  %3677 = vst.msk [vmem:[#allocation3 + $0x88] sm:$0xff] %vm1311_vm7, %v3599_v12  ;;  %5231 = vmatprep.mubr.msk.f32.mxu1 %vm1961_vm11, %v4282_v46 }
 0x54f   : > { %3616 = vrot.lane.b32.xlu1 %v4100_v34, %s5290_s22 }
 0x550   : > { %v4171_v21 = vpop.permute.xlu0 %4170 }
 0x551   : > { %4251 = vst.msk [vmem:[#allocation3 + $0x78] sm:$0xff] %vm1891_vm10, %v4171_v21  ;;  %v3217_v51 = vpop.permute.xlu1 %3216 }
 0x552   : > { %3426 = vrot.lane.b32.xlu0 %v3909_v18, %s5289_s21  ;;  %3294 = vst.msk [vmem:[#allocation3 + $0x90] sm:$0xff] %vm925_vm4, %v3217_v51 }
 0x553   : > { %3618 = vrot.lane.b32.xlu1 %v3527_v23, %s5290_s22 }
 0x554   : > { %v3789_v35 = vpop.permute.xlu0 %3788 }
 0x555   : > { %3868 = vst.msk [vmem:[#allocation3 + $0x80] sm:$0xff] %vm1505_vm8, %v3789_v35  ;;  %v3981_v22 = vpop.permute.xlu1 %3980 }
 0x556   : > { %4190 = vrot.lane.b32.xlu0 %v3527_v23, %s5293_s8  ;;  %4060 = vst.msk [vmem:[#allocation3 + $0x80] sm:$0xff] %vm1698_vm9, %v3981_v22 }
 0x557   : > { %3236 = vrot.lane.b32.xlu1 %v3144_v14, %s5288_s20 }
 0x558   : > { %v3791_v4 = vpop.permute.xlu0 %3790  ;;  %v4283_v32 = vld [vmem:[#allocation3 + $0x78] sm:$0xff] }
 0x559   : > { %3869 = vst.msk [vmem:[#allocation3 + $0x88] sm:$0xff] %vm1505_vm8, %v3791_v4  ;;  %5232 = vmatmul.mubr.msk.f32.gmra.mxu1 %vm1961_vm11, %v4283_v32  ;;  %v3409_v40 = vpop.permute.xlu1 %3408 }
 0x55a   : > { %3808 = vrot.lane.b32.xlu0 %v3144_v14, %s5291_s4  ;;  %3486 = vst.msk [vmem:[#allocation3 + $0x90] sm:$0xff] %vm1118_vm6, %v3409_v40 }
 0x55b   : > { %4000 = vrot.lane.b32.xlu1 %v3910_v31, %s5292_s7 }
 0x55c   : > { %v3219_v3 = vpop.permute.xlu0 %3218 }
 0x55d   : > { %3295 = vst.msk [vmem:[#allocation3 + $0x98] sm:$0xff] %vm925_vm4, %v3219_v3  ;;  %v4173_v11 = vpop.permute.xlu1 %4172 }
 0x55e   : > { %3810 = vrot.lane.b32.xlu0 %v3719_v0, %s5291_s4  ;;  %4252 = vst.msk [vmem:[#allocation3 + $0x80] sm:$0xff] %vm1891_vm10, %v4173_v11 }
 0x55f   : > { %3428 = vrot.lane.b32.xlu1 %v3910_v31, %s5289_s21 }
 0x560   : > { %v3983_v60 = vpop.permute.xlu0 %3982 }
 0x561   : > { %4061 = vst.msk [vmem:[#allocation3 + $0x88] sm:$0xff] %vm1698_vm9, %v3983_v60  ;;  %v3601_v16 = vpop.permute.xlu1 %3600 }
 0x562   : > { %3238 = vrot.lane.b32.xlu0 %v3719_v0, %s5288_s20  ;;  %3678 = vst.msk [vmem:[#allocation3 + $0x90] sm:$0xff] %vm1311_vm7, %v3601_v16 }
 0x563   : > { %4192 = vrot.lane.b32.xlu1 %v4102_v25, %s5293_s8 }
 0x564   : > { %v3411_v47 = vpop.permute.xlu0 %3410 }
 0x565   : > { %3487 = vst.msk [vmem:[#allocation3 + $0x98] sm:$0xff] %vm1118_vm6, %v3411_v47  ;;  %v3603_v10 = vpop.permute.xlu1 %3602  ;;  %v4284_v17 = vld [vmem:[#allocation3 + $0x80] sm:$0xff] }
 0x566   : > { %4002 = vrot.lane.b32.xlu0 %v3911_v24, %s5292_s7  ;;  %3679 = vst.msk [vmem:[#allocation3 + $0x98] sm:$0xff] %vm1311_vm7, %v3603_v10  ;;  %5234 = vmatprep.mubr.msk.f32.mxu1 %vm1961_vm11, %v4284_v17 }
 0x567   : > { %3620 = vrot.lane.b32.xlu1 %v4102_v25, %s5290_s22 }
 0x568   : > { %v4175_v56 = vpop.permute.xlu0 %4174 }
 0x569   : > { %4253 = vst.msk [vmem:[#allocation3 + $0x88] sm:$0xff] %vm1891_vm10, %v4175_v56  ;;  %v3221_v48 = vpop.permute.xlu1 %3220 }
 0x56a   : > { %3430 = vrot.lane.b32.xlu0 %v3911_v24, %s5289_s21  ;;  %3296 = vst.msk [vmem:[#allocation3 + $0xa0] sm:$0xff] %vm925_vm4, %v3221_v48 }
 0x56b   : > { %3622 = vrot.lane.b32.xlu1 %v3529_v39, %s5290_s22 }
 0x56c   : > { %v3793_v29 = vpop.permute.xlu0 %3792 }
 0x56d   : > { %3870 = vst.msk [vmem:[#allocation3 + $0x90] sm:$0xff] %vm1505_vm8, %v3793_v29  ;;  %v3985_v2 = vpop.permute.xlu1 %3984 }
 0x56e   : > { %4194 = vrot.lane.b32.xlu0 %v3529_v39, %s5293_s8  ;;  %4062 = vst.msk [vmem:[#allocation3 + $0x90] sm:$0xff] %vm1698_vm9, %v3985_v2 }
 0x56f   : > { %3240 = vrot.lane.b32.xlu1 %v3146_v53, %s5288_s20 }
 0x570   : > { %v3795_v7 = vpop.permute.xlu0 %3794  ;;  %v4285_v61 = vld [vmem:[#allocation3 + $0x88] sm:$0xff] }
 0x571   : > { %3871 = vst.msk [vmem:[#allocation3 + $0x98] sm:$0xff] %vm1505_vm8, %v3795_v7  ;;  %5235 = vmatmul.mubr.msk.f32.gmra.mxu1 %vm1961_vm11, %v4285_v61  ;;  %v3413_v50 = vpop.permute.xlu1 %3412 }
 0x572   : > { %3812 = vrot.lane.b32.xlu0 %v3146_v53, %s5291_s4  ;;  %3488 = vst.msk [vmem:[#allocation3 + $0xa0] sm:$0xff] %vm1118_vm6, %v3413_v50 }
 0x573   : > { %4004 = vrot.lane.b32.xlu1 %v3912_v44, %s5292_s7 }
 0x574   : > { %v3223_v52 = vpop.permute.xlu0 %3222 }
 0x575   : > { %3297 = vst.msk [vmem:[#allocation3 + $0xa8] sm:$0xff] %vm925_vm4, %v3223_v52  ;;  %v4177_v43 = vpop.permute.xlu1 %4176 }
 0x576   : > { %3814 = vrot.lane.b32.xlu0 %v3721_v36, %s5291_s4  ;;  %4254 = vst.msk [vmem:[#allocation3 + $0x90] sm:$0xff] %vm1891_vm10, %v4177_v43 }
 0x577   : > { %3432 = vrot.lane.b32.xlu1 %v3912_v44, %s5289_s21 }
 0x578   : > { %v3987_v38 = vpop.permute.xlu0 %3986 }
 0x579   : > { %4063 = vst.msk [vmem:[#allocation3 + $0x98] sm:$0xff] %vm1698_vm9, %v3987_v38  ;;  %v3605_v28 = vpop.permute.xlu1 %3604 }
 0x57a   : > { %3242 = vrot.lane.b32.xlu0 %v3721_v36, %s5288_s20  ;;  %3680 = vst.msk [vmem:[#allocation3 + $0xa0] sm:$0xff] %vm1311_vm7, %v3605_v28 }
 0x57b   : > { %4196 = vrot.lane.b32.xlu1 %v4104_v37, %s5293_s8 }
 0x57c   : > { %v3415_v27 = vpop.permute.xlu0 %3414 }
 0x57d   : > { %3489 = vst.msk [vmem:[#allocation3 + $0xa8] sm:$0xff] %vm1118_vm6, %v3415_v27  ;;  %v3607_v8 = vpop.permute.xlu1 %3606  ;;  %v4286_v42 = vld [vmem:[#allocation3 + $0x90] sm:$0xff] }
 0x57e   : > { %4006 = vrot.lane.b32.xlu0 %v3913_v45, %s5292_s7  ;;  %3681 = vst.msk [vmem:[#allocation3 + $0xa8] sm:$0xff] %vm1311_vm7, %v3607_v8  ;;  %5237 = vmatprep.mubr.msk.f32.mxu1 %vm1961_vm11, %v4286_v42 }
 0x57f   : > { %3624 = vrot.lane.b32.xlu1 %v4104_v37, %s5290_s22 }
 0x580   : > { %v4179_v15 = vpop.permute.xlu0 %4178 }
 0x581   : > { %4255 = vst.msk [vmem:[#allocation3 + $0x98] sm:$0xff] %vm1891_vm10, %v4179_v15  ;;  %v3225_v55 = vpop.permute.xlu1 %3224 }
 0x582   : > { %3434 = vrot.lane.b32.xlu0 %v3913_v45, %s5289_s21  ;;  %3298 = vst.msk [vmem:[#allocation3 + $0xb0] sm:$0xff] %vm925_vm4, %v3225_v55 }
 0x583   : > { %3626 = vrot.lane.b32.xlu1 %v3531_v41, %s5290_s22  ;;  %s7960_s22 = scalar_lea.vmem %s8064_s3, %s5066_s14 }
 0x584   : > { %v3797_v26 = vpop.permute.xlu0 %3796 }
 0x585   : > { %3872 = vst.msk [vmem:[#allocation3 + $0xa0] sm:$0xff] %vm1505_vm8, %v3797_v26  ;;  %v3989_v1 = vpop.permute.xlu1 %3988 }
 0x586   : > { %4198 = vrot.lane.b32.xlu0 %v3531_v41, %s5293_s8  ;;  %4064 = vst.msk [vmem:[#allocation3 + $0xa0] sm:$0xff] %vm1698_vm9, %v3989_v1 }
 0x587   : > { %3818 = vrot.lane.b32.xlu1 %v3723_v49, %s5291_s4 }
 0x588   : > { %v3799_v20 = vpop.permute.xlu0 %3798  ;;  %v4287_v54 = vld [vmem:[#allocation3 + $0x98] sm:$0xff] }
 0x589   : > { %3873 = vst.msk [vmem:[#allocation3 + $0xa8] sm:$0xff] %vm1505_vm8, %v3799_v20  ;;  %5238 = vmatmul.mubr.msk.f32.gmra.mxu1 %vm1961_vm11, %v4287_v54  ;;  %v3417_v57 = vpop.permute.xlu1 %3416 }
 0x58a   : > { %3816 = vrot.lane.b32.xlu0 %v3722_v6, %s5291_s4  ;;  %3490 = vst.msk [vmem:[#allocation3 + $0xb0] sm:$0xff] %vm1118_vm6, %v3417_v57 }
 0x58b   : > { %4010 = vrot.lane.b32.xlu1 %v3915_v33, %s5292_s7 }
 0x58c   : > { %v3227_v62 = vpop.permute.xlu0 %3226 }
 0x58d   : > { %3299 = vst.msk [vmem:[#allocation3 + $0xb8] sm:$0xff] %vm925_vm4, %v3227_v62  ;;  %v4181_v5 = vpop.permute.xlu1 %4180 }
 0x58e   : > { %4008 = vrot.lane.b32.xlu0 %v3914_v59, %s5292_s7  ;;  %4256 = vst.msk [vmem:[#allocation3 + $0xa0] sm:$0xff] %vm1891_vm10, %v4181_v5 }
 0x58f   : > { %4202 = vrot.lane.b32.xlu1 %v4107_v63, %s5293_s8 }
 0x590   : > { %v3991_v13 = vpop.permute.xlu0 %3990 }
 0x591   : > { %4065 = vst.msk [vmem:[#allocation3 + $0xa8] sm:$0xff] %vm1698_vm9, %v3991_v13  ;;  %v3609_v19 = vpop.permute.xlu1 %3608 }
 0x592   : > { %4200 = vrot.lane.b32.xlu0 %v4106_v30, %s5293_s8  ;;  %3682 = vst.msk [vmem:[#allocation3 + $0xb0] sm:$0xff] %vm1311_vm7, %v3609_v19 }
 0x594   : > { %v3419_v9 = vpop.permute.xlu0 %3418 }
 0x595   : > { %3491 = vst.msk [vmem:[#allocation3 + $0xb8] sm:$0xff] %vm1118_vm6, %v3419_v9  ;;  %v3611_v34 = vpop.permute.xlu1 %3610  ;;  %v4288_v58 = vld [vmem:[#allocation3 + $0xa0] sm:$0xff] }
 0x596   : > { %3683 = vst.msk [vmem:[#allocation3 + $0xb8] sm:$0xff] %vm1311_vm7, %v3611_v34  ;;  %5240 = vmatprep.mubr.msk.f32.mxu1 %vm1961_vm11, %v4288_v58 }
 0x598   : > { %v4183_v18 = vpop.permute.xlu0 %4182 }
 0x599   : > { %4257 = vst.msk [vmem:[#allocation3 + $0xa8] sm:$0xff] %vm1891_vm10, %v4183_v18  ;;  %v3229_v12 = vpop.permute.xlu1 %3228 }
 0x59a   : > { %3300 = vst.msk [vmem:[#allocation3 + $0xc0] sm:$0xff] %vm925_vm4, %v3229_v12 }
 0x59c   : > { %v3801_v46 = vpop.permute.xlu0 %3800 }
 0x59d   : > { %3874 = vst.msk [vmem:[#allocation3 + $0xb0] sm:$0xff] %vm1505_vm8, %v3801_v46  ;;  %v3993_v21 = vpop.permute.xlu1 %3992  ;;  %v7663_v46 = vpop.f32.mrf.mxu1 }
 0x59e   : > { %4066 = vst.msk [vmem:[#allocation3 + $0xb0] sm:$0xff] %vm1698_vm9, %v3993_v21 }
 0x59f   : > { %v7665_v21 = vpop.f32.mrf.mxu1 }
 0x5a0   : > { %v3803_v51 = vpop.permute.xlu0 %3802  ;;  %v4289_v23 = vld [vmem:[#allocation3 + $0xa8] sm:$0xff] }
 0x5a1   : > { %3875 = vst.msk [vmem:[#allocation3 + $0xb8] sm:$0xff] %vm1505_vm8, %v3803_v51  ;;  %5241 = vmatmul.mubr.msk.f32.gmra.mxu1 %vm1961_vm11, %v4289_v23  ;;  %v3421_v35 = vpop.permute.xlu1 %3420  ;;  %v7667_v51 = vpop.f32.mrf.mxu1 }
 0x5a2   : > { %3492 = vst.msk [vmem:[#allocation3 + $0xc0] sm:$0xff] %vm1118_vm6, %v3421_v35  ;;  %v4698_v35 = vmul.f32 %v7665_v21, %v7665_v21 }
 0x5a3   : > { %v7669_v23 = vpop.f32.mrf.mxu1 }
 0x5a4   : > { %v3231_v22 = vpop.permute.xlu0 %3230 }
 0x5a5   : > { %3301 = vst.msk [vmem:[#allocation3 + $0xc8] sm:$0xff] %vm925_vm4, %v3231_v22  ;;  %v4185_v14 = vpop.permute.xlu1 %4184  ;;  %v7673_v22 = vpop.f32.mrf.mxu1 }
 0x5a6   : > { %4258 = vst.msk [vmem:[#allocation3 + $0xb0] sm:$0xff] %vm1891_vm10, %v4185_v14  ;;  %v4699_v14 = vmul.f32 %v7663_v46, %v7663_v46 }
 0x5a8   : > { %v3995_v4 = vpop.permute.xlu0 %3994 }
 0x5a9   : > { %4067 = vst.msk [vmem:[#allocation3 + $0xb8] sm:$0xff] %vm1698_vm9, %v3995_v4  ;;  %v3613_v32 = vpop.permute.xlu1 %3612  ;;  %v4629_v4 = vsel %vm204_vm0, %v7665_v21, 0.0 }
 0x5aa   : > { %3684 = vst.msk [vmem:[#allocation3 + $0xc0] sm:$0xff] %vm1311_vm7, %v3613_v32  ;;  %v4700_v32 = vmul.f32 %v7669_v23, %v7669_v23 }
 0x5ac   : > { %v3423_v40 = vpop.permute.xlu0 %3422 }
 0x5ad   : > { %3493 = vst.msk [vmem:[#allocation3 + $0xc8] sm:$0xff] %vm1118_vm6, %v3423_v40  ;;  %v3615_v31 = vpop.permute.xlu1 %3614  ;;  %v4290_v3 = vld [vmem:[#allocation3 + $0xb0] sm:$0xff]  ;;  %v4630_v40 = vsel %vm204_vm0, %v7663_v46, 0.0 }
 0x5ae   : > { %3685 = vst.msk [vmem:[#allocation3 + $0xc8] sm:$0xff] %vm1311_vm7, %v3615_v31  ;;  %5243 = vmatprep.mubr.msk.f32.mxu1 %vm1961_vm11, %v4290_v3  ;;  %v4730_v31 = vsel %vm204_vm0, %v4698_v35, 0.0  ;;  %v4632_v3 = vsel %vm204_vm0, %v7669_v23, 0.0 }
 0x5b0   : > { %v4187_v0 = vpop.permute.xlu0 %4186 }
 0x5b1   : > { %4259 = vst.msk [vmem:[#allocation3 + $0xb8] sm:$0xff] %vm1891_vm10, %v4187_v0  ;;  %v3233_v11 = vpop.permute.xlu1 %3232  ;;  %v4631_v0 = vadd.f32 %v4630_v40, %v4629_v4 }
 0x5b2   : > { %3302 = vst.msk [vmem:[#allocation3 + $0xd0] sm:$0xff] %vm925_vm4, %v3233_v11  ;;  %v7686_v11 = vpop.f32.mrf.mxu1 }
 0x5b4   : > { %v3805_v60 = vpop.permute.xlu0 %3804 }
 0x5b5   : > { %3876 = vst.msk [vmem:[#allocation3 + $0xc0] sm:$0xff] %vm1505_vm8, %v3805_v60  ;;  %v3997_v16 = vpop.permute.xlu1 %3996  ;;  %v4731_v60 = vsel %vm204_vm0, %v4699_v14, 0.0 }
 0x5b6   : > { %4068 = vst.msk [vmem:[#allocation3 + $0xc0] sm:$0xff] %vm1698_vm9, %v3997_v16  ;;  %v4733_v16 = vsel %vm204_vm0, %v4700_v32, 0.0 }
 0x5b8   : > { %v3807_v25 = vpop.permute.xlu0 %3806  ;;  %v4291_v47 = vld [vmem:[#allocation3 + $0xb8] sm:$0xff] }
 0x5b9   : > { %3877 = vst.msk [vmem:[#allocation3 + $0xc8] sm:$0xff] %vm1505_vm8, %v3807_v25  ;;  %5244 = vmatmul.mubr.msk.f32.gmra.mxu1 %vm1961_vm11, %v4291_v47  ;;  %v3425_v24 = vpop.permute.xlu1 %3424  ;;  %v4732_v25 = vadd.f32 %v4731_v60, %v4730_v31  ;;  %v4633_v47 = vadd.f32 %v4632_v3, %v4631_v0 }
 0x5ba   : > { %3494 = vst.msk [vmem:[#allocation3 + $0xd0] sm:$0xff] %vm1118_vm6, %v3425_v24  ;;  %v7690_v24 = vpop.f32.mrf.mxu1 }
 0x5bc   : > { %v3235_v10 = vpop.permute.xlu0 %3234 }
 0x5bd   : > { %3303 = vst.msk [vmem:[#allocation3 + $0xd8] sm:$0xff] %vm925_vm4, %v3235_v10  ;;  %v4189_v17 = vpop.permute.xlu1 %4188  ;;  %v4701_v10 = vmul.f32 %v7667_v51, %v7667_v51 }
 0x5be   : > { %4260 = vst.msk [vmem:[#allocation3 + $0xc0] sm:$0xff] %vm1891_vm10, %v4189_v17  ;;  %v4702_v17 = vmul.f32 %v7686_v11, %v7686_v11 }
 0x5c0   : > { %v3999_v56 = vpop.permute.xlu0 %3998 }
 0x5c1   : > { %4069 = vst.msk [vmem:[#allocation3 + $0xc8] sm:$0xff] %vm1698_vm9, %v3999_v56  ;;  %v3617_v48 = vpop.permute.xlu1 %3616  ;;  %v4734_v56 = vadd.f32 %v4733_v16, %v4732_v25 }
 0x5c2   : > { %3686 = vst.msk [vmem:[#allocation3 + $0xd0] sm:$0xff] %vm1311_vm7, %v3617_v48  ;;  %v4634_v48 = vsel %vm204_vm0, %v7667_v51, 0.0 }
 0x5c4   : > { %v3427_v39 = vpop.permute.xlu0 %3426 }
 0x5c5   : > { %3495 = vst.msk [vmem:[#allocation3 + $0xd8] sm:$0xff] %vm1118_vm6, %v3427_v39  ;;  %v3619_v29 = vpop.permute.xlu1 %3618  ;;  %v4292_v2 = vld [vmem:[#allocation3 + $0xc0] sm:$0xff]  ;;  %v4636_v39 = vsel %vm204_vm0, %v7686_v11, 0.0 }
 0x5c6   : > { %3687 = vst.msk [vmem:[#allocation3 + $0xd8] sm:$0xff] %vm1311_vm7, %v3619_v29  ;;  %5246 = vmatprep.mubr.msk.f32.mxu1 %vm1961_vm11, %v4292_v2  ;;  %v4635_v29 = vadd.f32 %v4634_v48, %v4633_v47  ;;  %v7700_v2 = vpop.f32.mrf.mxu1 }
 0x5c8   : > { %v4191_v53 = vpop.permute.xlu0 %4190 }
 0x5c9   : > { %4261 = vst.msk [vmem:[#allocation3 + $0xc8] sm:$0xff] %vm1891_vm10, %v4191_v53  ;;  %v3237_v7 = vpop.permute.xlu1 %3236  ;;  %v4735_v53 = vsel %vm204_vm0, %v4701_v10, 0.0 }
 0x5ca   : > { %3304 = vst.msk [vmem:[#allocation3 + $0xe0] sm:$0xff] %vm925_vm4, %v3237_v7  ;;  %v4737_v7 = vsel %vm204_vm0, %v4702_v17, 0.0 }
 0x5cc   : > { %v3809_v61 = vpop.permute.xlu0 %3808 }
 0x5cd   : > { %3878 = vst.msk [vmem:[#allocation3 + $0xd0] sm:$0xff] %vm1505_vm8, %v3809_v61  ;;  %v4001_v50 = vpop.permute.xlu1 %4000  ;;  %v4637_v61 = vadd.f32 %v4636_v39, %v4635_v29 }
 0x5ce   : > { %4070 = vst.msk [vmem:[#allocation3 + $0xd0] sm:$0xff] %vm1698_vm9, %v4001_v50  ;;  %v4736_v50 = vadd.f32 %v4735_v53, %v4734_v56 }
 0x5d0   : > { %v3811_v44 = vpop.permute.xlu0 %3810  ;;  %v4293_v52 = vld [vmem:[#allocation3 + $0xc8] sm:$0xff] }
 0x5d1   : > { %3879 = vst.msk [vmem:[#allocation3 + $0xd8] sm:$0xff] %vm1505_vm8, %v3811_v44  ;;  %5247 = vmatmul.mubr.msk.f32.gmra.mxu1 %vm1961_vm11, %v4293_v52  ;;  %v3429_v36 = vpop.permute.xlu1 %3428  ;;  %v7704_v44 = vpop.f32.mrf.mxu1  ;;  %v4703_v52 = vmul.f32 %v7673_v22, %v7673_v22 }
 0x5d2   : > { %3496 = vst.msk [vmem:[#allocation3 + $0xe0] sm:$0xff] %vm1118_vm6, %v3429_v36  ;;  %v4704_v36 = vmul.f32 %v7700_v2, %v7700_v2 }
 0x5d4   : > { %v3239_v43 = vpop.permute.xlu0 %3238 }
 0x5d5   : > { %3305 = vst.msk [vmem:[#allocation3 + $0xe8] sm:$0xff] %vm925_vm4, %v3239_v43  ;;  %v4193_v38 = vpop.permute.xlu1 %4192  ;;  %v4738_v43 = vadd.f32 %v4737_v7, %v4736_v50 }
 0x5d6   : > { %4262 = vst.msk [vmem:[#allocation3 + $0xd0] sm:$0xff] %vm1891_vm10, %v4193_v38  ;;  %v4638_v38 = vsel %vm204_vm0, %v7673_v22, 0.0 }
 0x5d8   : > { %v4003_v28 = vpop.permute.xlu0 %4002 }
 0x5d9   : > { %4071 = vst.msk [vmem:[#allocation3 + $0xd8] sm:$0xff] %vm1698_vm9, %v4003_v28  ;;  %v3621_v37 = vpop.permute.xlu1 %3620  ;;  %v4640_v28 = vsel %vm204_vm0, %v7700_v2, 0.0 }
 0x5da   : > { %3688 = vst.msk [vmem:[#allocation3 + $0xe0] sm:$0xff] %vm1311_vm7, %v3621_v37  ;;  %v4639_v37 = vadd.f32 %v4638_v38, %v4637_v61 }
 0x5dc   : > { %v3431_v27 = vpop.permute.xlu0 %3430 }
 0x5dd   : > { %3497 = vst.msk [vmem:[#allocation3 + $0xe8] sm:$0xff] %vm1118_vm6, %v3431_v27  ;;  %v3623_v45 = vpop.permute.xlu1 %3622  ;;  %v4294_v8 = vld [vmem:[#allocation3 + $0xd0] sm:$0xff]  ;;  %v7714_v27 = vpop.f32.mrf.mxu1 }
 0x5de   : > { %3689 = vst.msk [vmem:[#allocation3 + $0xe8] sm:$0xff] %vm1311_vm7, %v3623_v45  ;;  %5249 = vmatprep.mubr.msk.f32.mxu1 %vm1961_vm11, %v4294_v8  ;;  %v4739_v45 = vsel %vm204_vm0, %v4703_v52, 0.0  ;;  %v4741_v8 = vsel %vm204_vm0, %v4704_v36, 0.0 }
 0x5e0   : > { %v4195_v42 = vpop.permute.xlu0 %4194 }
 0x5e1   : > { %4263 = vst.msk [vmem:[#allocation3 + $0xd8] sm:$0xff] %vm1891_vm10, %v4195_v42  ;;  %v3241_v15 = vpop.permute.xlu1 %3240  ;;  %v4641_v42 = vadd.f32 %v4640_v28, %v4639_v37 }
 0x5e2   : > { %3306 = vst.msk [vmem:[#allocation3 + $0xf0] sm:$0xff] %vm925_vm4, %v3241_v15  ;;  %v4740_v15 = vadd.f32 %v4739_v45, %v4738_v43 }
 0x5e4   : > { %v3813_v55 = vpop.permute.xlu0 %3812 }
 0x5e5   : > { %3880 = vst.msk [vmem:[#allocation3 + $0xe0] sm:$0xff] %vm1505_vm8, %v3813_v55  ;;  %v4005_v41 = vpop.permute.xlu1 %4004 }
 0x5e6   : > { %4072 = vst.msk [vmem:[#allocation3 + $0xe0] sm:$0xff] %vm1698_vm9, %v4005_v41  ;;  %v4705_v41 = vmul.f32 %v7690_v24, %v7690_v24 }
 0x5e8   : > { %v3815_v26 = vpop.permute.xlu0 %3814  ;;  %v4295_v1 = vld [vmem:[#allocation3 + $0xd8] sm:$0xff] }
 0x5e9   : > { %3881 = vst.msk [vmem:[#allocation3 + $0xe8] sm:$0xff] %vm1505_vm8, %v3815_v26  ;;  %5250 = vmatmul.mubr.msk.f32.gmra.mxu1 %vm1961_vm11, %v4295_v1  ;;  %v3433_v49 = vpop.permute.xlu1 %3432  ;;  %v7718_v55 = vpop.f32.mrf.mxu1  ;;  %v4706_v26 = vmul.f32 %v7714_v27, %v7714_v27  ;;  %v4742_v1 = vadd.f32 %v4741_v8, %v4740_v15 }
 0x5ea   : > { %3498 = vst.msk [vmem:[#allocation3 + $0xf0] sm:$0xff] %vm1118_vm6, %v3433_v49  ;;  %v4642_v49 = vsel %vm204_vm0, %v7690_v24, 0.0  ;;  %v4709_v32 = vmul.f32 %v7718_v55, %v7718_v55  ;;  %v4650_v3 = vsel %vm204_vm0, %v7718_v55, 0.0 }
 0x5ec   : > { %v3243_v20 = vpop.permute.xlu0 %3242  ;;  %v4751_v25 = vsel %vm204_vm0, %v4709_v32, 0.0 }
 0x5ed   : > { %3307 = vst.msk [vmem:[#allocation3 + $0xf8] sm:$0xff] %vm925_vm4, %v3243_v20  ;;  %v4197_v54 = vpop.permute.xlu1 %4196  ;;  %v4644_v20 = vsel %vm204_vm0, %v7714_v27, 0.0 }
 0x5ee   : > { %4264 = vst.msk [vmem:[#allocation3 + $0xe0] sm:$0xff] %vm1891_vm10, %v4197_v54  ;;  %v4643_v54 = vadd.f32 %v4642_v49, %v4641_v42 }
 0x5f0   : > { %v4007_v6 = vpop.permute.xlu0 %4006 }
 0x5f1   : > { %4073 = vst.msk [vmem:[#allocation3 + $0xe8] sm:$0xff] %vm1698_vm9, %v4007_v6  ;;  %v3625_v57 = vpop.permute.xlu1 %3624  ;;  %v7728_v6 = vpop.f32.mrf.mxu1 }
 0x5f2   : > { %3690 = vst.msk [vmem:[#allocation3 + $0xf0] sm:$0xff] %vm1311_vm7, %v3625_v57  ;;  %v4743_v57 = vsel %vm204_vm0, %v4705_v41, 0.0 }
 0x5f4   : > { %v3435_v33 = vpop.permute.xlu0 %3434 }
 0x5f5   : > { %3499 = vst.msk [vmem:[#allocation3 + $0xf8] sm:$0xff] %vm1118_vm6, %v3435_v33  ;;  %v3627_v62 = vpop.permute.xlu1 %3626  ;;  %v4296_v59 = vld [vmem:[#allocation3 + $0xe0] sm:$0xff]  ;;  %v4745_v33 = vsel %vm204_vm0, %v4706_v26, 0.0 }
 0x5f6   : > { %3691 = vst.msk [vmem:[#allocation3 + $0xf8] sm:$0xff] %vm1311_vm7, %v3627_v62  ;;  %5252 = vmatprep.mubr.msk.f32.mxu1 %vm1961_vm11, %v4296_v59  ;;  %v4645_v62 = vadd.f32 %v4644_v20, %v4643_v54  ;;  %v4744_v59 = vadd.f32 %v4743_v57, %v4742_v1 }
 0x5f8   : > { %v4199_v5 = vpop.permute.xlu0 %4198 }
 0x5f9   : > { %4265 = vst.msk [vmem:[#allocation3 + $0xe8] sm:$0xff] %vm1891_vm10, %v4199_v5  ;;  %v3819_v63 = vpop.permute.xlu1 %3818 }
 0x5fa   : > { %3883 = vst.msk [vmem:[#allocation3 + $0xf8] sm:$0xff] %vm1505_vm8, %v3819_v63  ;;  %v4707_v63 = vmul.f32 %v7704_v44, %v7704_v44 }
 0x5fc   : > { %v3817_v13 = vpop.permute.xlu0 %3816 }
 0x5fd   : > { %3882 = vst.msk [vmem:[#allocation3 + $0xf0] sm:$0xff] %vm1505_vm8, %v3817_v13  ;;  %v4011_v30 = vpop.permute.xlu1 %4010  ;;  %v4708_v13 = vmul.f32 %v7728_v6, %v7728_v6 }
 0x5fe   : > { %4075 = vst.msk [vmem:[#allocation3 + $0xf8] sm:$0xff] %vm1698_vm9, %v4011_v30  ;;  %v4746_v30 = vadd.f32 %v4745_v33, %v4744_v59 }
 0x600   : > { %v4009_v19 = vpop.permute.xlu0 %4008  ;;  %v4297_v9 = vld [vmem:[#allocation3 + $0xe8] sm:$0xff] }
 0x601   : > { %4074 = vst.msk [vmem:[#allocation3 + $0xf0] sm:$0xff] %vm1698_vm9, %v4009_v19  ;;  %5253 = vmatmul.mubr.msk.f32.gmra.mxu1 %vm1961_vm11, %v4297_v9  ;;  %v4203_v34 = vpop.permute.xlu1 %4202  ;;  %v7732_v5 = vpop.f32.mrf.mxu1  ;;  %v4646_v19 = vsel %vm204_vm0, %v7704_v44, 0.0  ;;  %v4648_v9 = vsel %vm204_vm0, %v7728_v6, 0.0 }
 0x602   : > { %4267 = vst.msk [vmem:[#allocation3 + $0xf8] sm:$0xff] %vm1891_vm10, %v4203_v34  ;;  %v4647_v34 = vadd.f32 %v4646_v19, %v4645_v62  ;;  %v4711_v48 = vmul.f32 %v7732_v5, %v7732_v5  ;;  %v4654_v53 = vsel %vm204_vm0, %v7732_v5, 0.0 }
 0x604   : > { %v4201_v58 = vpop.permute.xlu0 %4200  ;;  %v4649_v35 = vadd.f32 %v4648_v9, %v4647_v34  ;;  %v4755_v52 = vsel %vm204_vm0, %v4711_v48, 0.0 }
 0x605   : > { %4266 = vst.msk [vmem:[#allocation3 + $0xf0] sm:$0xff] %vm1891_vm10, %v4201_v58  ;;  %v7742_v58 = vpop.f32.mrf.mxu1 }
 0x606   : > { %v4710_v40 = vmul.f32 %v7742_v58, %v7742_v58  ;;  %v4652_v0 = vsel %vm204_vm0, %v7742_v58, 0.0  ;;  %v4651_v60 = vadd.f32 %v4650_v3, %v4649_v35 }
 0x608   : > { %v4753_v47 = vsel %vm204_vm0, %v4710_v40, 0.0  ;;  %v4653_v10 = vadd.f32 %v4652_v0, %v4651_v60 }
 0x609   : > { %v4299_v18 = vld [vmem:[#allocation3 + $0xf8] sm:$0xff] }
 0x60a   : > { %v4655_v61 = vadd.f32 %v4654_v53, %v4653_v10 }
 0x60c   : > { %v4298_v12 = vld [vmem:[#allocation3 + $0xf0] sm:$0xff] }
 0x60d   : > { %5255 = vmatprep.mubr.msk.f32.mxu1 %vm1961_vm11, %v4298_v12  ;;  %v4749_v12 = vsel %vm204_vm0, %v4708_v13, 0.0 }
 0x60e   : > { %5256 = vmatmul.mubr.msk.f32.gmra.mxu1 %vm1961_vm11, %v4299_v18  ;;  %v4747_v18 = vsel %vm204_vm0, %v4707_v63, 0.0 }
 0x60f   : > { %v4748_v14 = vadd.f32 %v4747_v18, %v4746_v30 }
 0x611   : > { %v4750_v31 = vadd.f32 %v4749_v12, %v4748_v14 }
 0x613   : > { %v4752_v17 = vadd.f32 %v4751_v25, %v4750_v31 }
 0x615   : > { %v4754_v29 = vadd.f32 %v4753_v47, %v4752_v17 }
 0x617   : > { %v4756_v38 = vadd.f32 %v4755_v52, %v4754_v29 }
 0x619   : > { %v7746_v4 = vpop.f32.mrf.mxu1 }
 0x61a   : > { %v4713_v37 = vmul.f32 %v7746_v4, %v7746_v4  ;;  %v4658_v42 = vsel %vm204_vm0, %v7746_v4, 0.0 }
 0x61b   : > { %v7756_v16 = vpop.f32.mrf.mxu1 }
 0x61c   : > { %v4712_v39 = vmul.f32 %v7756_v16, %v7756_v16  ;;  %v4656_v7 = vsel %vm204_vm0, %v7756_v16, 0.0  ;;  %v4759_v1 = vsel %vm204_vm0, %v4713_v37, 0.0 }
 0x61d   : > { %v4657_v43 = vadd.f32 %v4656_v7, %v4655_v61 }
 0x61e   : > { %v4757_v36 = vsel %vm204_vm0, %v4712_v39, 0.0 }
 0x61f   : > { %v4758_v8 = vadd.f32 %v4757_v36, %v4756_v38  ;;  %v4659_v41 = vadd.f32 %v4658_v42, %v4657_v43 }
 0x621   : > { %v4760_v54 = vadd.f32 %v4759_v1, %v4758_v8 }
 0x631   : > { %v7760_v56 = vpop.f32.mrf.mxu1 }
 0x632   : > { %v4715_v33 = vmul.f32 %v7760_v56, %v7760_v56  ;;  %v4662_v63 = vsel %vm204_vm0, %v7760_v56, 0.0 }
 0x633   : > { %v7770_v50 = vpop.f32.mrf.mxu1 }
 0x634   : > { %v4714_v45 = vmul.f32 %v7770_v50, %v7770_v50  ;;  %v4660_v15 = vsel %vm204_vm0, %v7770_v50, 0.0  ;;  %v4763_v9 = vsel %vm204_vm0, %v4715_v33, 0.0 }
 0x635   : > { %v4661_v20 = vadd.f32 %v4660_v15, %v4659_v41 }
 0x636   : > { %v4761_v49 = vsel %vm204_vm0, %v4714_v45, 0.0 }
 0x637   : > { %v4762_v59 = vadd.f32 %v4761_v49, %v4760_v54  ;;  %v4663_v30 = vadd.f32 %v4662_v63, %v4661_v20 }
 0x639   : > { %v4764_v12 = vadd.f32 %v4763_v9, %v4762_v59 }
 0x649   : > { %v7774_v28 = vpop.f32.mrf.mxu1 }
 0x64a   : > { %v4717_v14 = vmul.f32 %v7774_v28, %v7774_v28  ;;  %v4666_v31 = vsel %vm204_vm0, %v7774_v28, 0.0 }
 0x64b   : > { %v7784_v26 = vpop.f32.mrf.mxu1 }
 0x64c   : > { %v4716_v62 = vmul.f32 %v7784_v26, %v7784_v26  ;;  %v4664_v13 = vsel %vm204_vm0, %v7784_v26, 0.0  ;;  %v4767_v25 = vsel %vm204_vm0, %v4717_v14, 0.0 }
 0x64d   : > { %v4665_v18 = vadd.f32 %v4664_v13, %v4663_v30 }
 0x64e   : > { %v4765_v34 = vsel %vm204_vm0, %v4716_v62, 0.0 }
 0x64f   : > { %v4766_v40 = vadd.f32 %v4765_v34, %v4764_v12  ;;  %v4667_v0 = vadd.f32 %v4666_v31, %v4665_v18 }
 0x651   : > { %v4768_v17 = vadd.f32 %v4767_v25, %v4766_v40 }
 0x661   : > { %v7788_v57 = vpop.f32.mrf.mxu1 }
 0x662   : > { %v4719_v39 = vmul.f32 %v7788_v57, %v7788_v57  ;;  %v4670_v7 = vsel %vm204_vm0, %v7788_v57, 0.0 }
 0x663   : > { %v7798_v19 = vpop.f32.mrf.mxu1 }
 0x664   : > { %v4718_v32 = vmul.f32 %v7798_v19, %v7798_v19  ;;  %v4668_v3 = vsel %vm204_vm0, %v7798_v19, 0.0  ;;  %v4771_v43 = vsel %vm204_vm0, %v4719_v39, 0.0 }
 0x665   : > { %v4669_v10 = vadd.f32 %v4668_v3, %v4667_v0 }
 0x666   : > { %v4769_v47 = vsel %vm204_vm0, %v4718_v32, 0.0 }
 0x667   : > { %v4770_v53 = vadd.f32 %v4769_v47, %v4768_v17  ;;  %v4671_v52 = vadd.f32 %v4670_v7, %v4669_v10 }
 0x669   : > { %v4772_v45 = vadd.f32 %v4771_v43, %v4770_v53 }
 0x679   : > { %v7802_v35 = vpop.f32.mrf.mxu1 }
 0x67a   : > { %v4721_v42 = vmul.f32 %v7802_v35, %v7802_v35  ;;  %v4674_v1 = vsel %vm204_vm0, %v7802_v35, 0.0 }
 0x67b   : > { %v7812_v60 = vpop.f32.mrf.mxu1 }
 0x67c   : > { %v4720_v29 = vmul.f32 %v7812_v60, %v7812_v60  ;;  %v4672_v61 = vsel %vm204_vm0, %v7812_v60, 0.0  ;;  %v4775_v33 = vsel %vm204_vm0, %v4721_v42, 0.0 }
 0x67d   : > { %v4673_v37 = vadd.f32 %v4672_v61, %v4671_v52 }
 0x67e   : > { %v4773_v38 = vsel %vm204_vm0, %v4720_v29, 0.0 }
 0x67f   : > { %v4774_v41 = vadd.f32 %v4773_v38, %v4772_v45  ;;  %v4675_v20 = vadd.f32 %v4674_v1, %v4673_v37 }
 0x681   : > { %v4776_v63 = vadd.f32 %v4775_v33, %v4774_v41 }
 0x691   : > { %v7816_v48 = vpop.f32.mrf.mxu1 }
 0x692   : > { %v4723_v13 = vmul.f32 %v7816_v48, %v7816_v48  ;;  %v4678_v18 = vsel %vm204_vm0, %v7816_v48, 0.0 }
 0x693   : > { %v7826_v36 = vpop.f32.mrf.mxu1 }
 0x694   : > { %v4722_v15 = vmul.f32 %v7826_v36, %v7826_v36  ;;  %v4676_v49 = vsel %vm204_vm0, %v7826_v36, 0.0  ;;  %v4779_v40 = vsel %vm204_vm0, %v4723_v13, 0.0 }
 0x695   : > { %v4677_v59 = vadd.f32 %v4676_v49, %v4675_v20 }
 0x696   : > { %v4777_v62 = vsel %vm204_vm0, %v4722_v15, 0.0 }
 0x697   : > { %v4778_v34 = vadd.f32 %v4777_v62, %v4776_v63  ;;  %v4679_v14 = vadd.f32 %v4678_v18, %v4677_v59 }
 0x699   : > { %v4780_v0 = vadd.f32 %v4779_v40, %v4778_v34 }
 0x6a9   : > { %v7830_v8 = vpop.f32.mrf.mxu1 }
 0x6aa   : > { %v4725_v25 = vmul.f32 %v7830_v8, %v7830_v8  ;;  %v4682_v17 = vsel %vm204_vm0, %v7830_v8, 0.0 }
 0x6ab   : > { %v7840_v54 = vpop.f32.mrf.mxu1 }
 0x6ac   : > { %v4724_v30 = vmul.f32 %v7840_v54, %v7840_v54  ;;  %v4680_v12 = vsel %vm204_vm0, %v7840_v54, 0.0  ;;  %v4783_v53 = vsel %vm204_vm0, %v4725_v25, 0.0 }
 0x6ad   : > { %v4681_v3 = vadd.f32 %v4680_v12, %v4679_v14 }
 0x6ae   : > { %v4781_v31 = vsel %vm204_vm0, %v4724_v30, 0.0 }
 0x6af   : > { %v4782_v10 = vadd.f32 %v4781_v31, %v4780_v0  ;;  %v4683_v29 = vadd.f32 %v4682_v17, %v4681_v3 }
 0x6b1   : > { %v4784_v52 = vadd.f32 %v4783_v53, %v4782_v10 }
 0x6c1   : > { %v7848_v9 = vpop.f32.mrf.mxu1 }
 0x6c2   : > { %v4727_v43 = vmul.f32 %v7848_v9, %v7848_v9  ;;  %v4686_v45 = vsel %vm204_vm0, %v7848_v9, 0.0 }
 0x6c3   : > { %v7854_v32 = vpop.f32.mrf.mxu1 }
 0x6c4   : > { %v4726_v47 = vmul.f32 %v7854_v32, %v7854_v32  ;;  %v4684_v39 = vsel %vm204_vm0, %v7854_v32, 0.0  ;;  %v4787_v41 = vsel %vm204_vm0, %v4727_v43, 0.0 }
 0x6c5   : > { %v4685_v61 = vadd.f32 %v4684_v39, %v4683_v29 }
 0x6c6   : > { %v4785_v7 = vsel %vm204_vm0, %v4726_v47, 0.0 }
 0x6c7   : > { %v4786_v38 = vadd.f32 %v4785_v7, %v4784_v52  ;;  %v4687_v15 = vadd.f32 %v4686_v45, %v4685_v61 }
 0x6c9   : > { %v4788_v62 = vadd.f32 %v4787_v41, %v4786_v38 }
 0x6ce   : > { %v7870_v37 = vpop.f32.mrf.mxu1 }
 0x6cf   : > { %v4729_v1 = vmul.f32 %v7870_v37, %v7870_v37  ;;  %v4690_v59 = vsel %vm204_vm0, %v7870_v37, 0.0 }
 0x6d0   : > { %v7874_v42 = vpop.f32.mrf.mxu1 }
 0x6d1   : > { %v4688_v49 = vsel %vm204_vm0, %v7874_v42, 0.0  ;;  %v4728_v20 = vmul.f32 %v7874_v42, %v7874_v42  ;;  %v4791_v34 = vsel %vm204_vm0, %v4729_v1, 0.0 }
 0x6d2   : > { %v4689_v33 = vadd.f32 %v4688_v49, %v4687_v15 }
 0x6d3   : > { %v4789_v63 = vsel %vm204_vm0, %v4728_v20, 0.0 }
 0x6d4   : > { %v4691_v13 = vadd.f32 %v4690_v59, %v4689_v33  ;;  %v4790_v30 = vadd.f32 %v4789_v63, %v4788_v62 }
 0x6d6   : > { %v4692_v18 = vrot.slane %v4691_v13, 4  ;;  %v4792_v12 = vadd.f32 %v4791_v34, %v4790_v30 }
 0x6d8   : > { %v4693_v14 = vadd.f32 %v4692_v18, %v4691_v13  ;;  %v4793_v40 = vrot.slane %v4792_v12, 4 }
 0x6da   : > { %v4694_v31 = vrot.slane %v4693_v14, 2  ;;  %v4794_v3 = vadd.f32 %v4793_v40, %v4792_v12 }
 0x6dc   : > { %v4695_v0 = vadd.f32 %v4694_v31, %v4693_v14  ;;  %v4795_v25 = vrot.slane %v4794_v3, 2 }
 0x6de   : > { %v4696_v47 = vrot.slane %v4695_v0, 1  ;;  %v4796_v10 = vadd.f32 %v4795_v25, %v4794_v3 }
 0x6e0   : > { %v4697_v17 = vadd.f32 %v4696_v47, %v4695_v0  ;;  %v4797_v39 = vrot.slane %v4796_v10, 1 }
 0x6e2   : > { %v4798_v29 = vadd.f32 %v4797_v39, %v4796_v10  ;;  %v7887_v53 = vmul.f32 0.00390625, %v4697_v17 }
 0x6e4   : > { %v4800_v7 = vmul.f32 0.00390625, %v4798_v29  ;;  %v4801_v61 = vmul.f32 %v7887_v53, %v7887_v53  ;;  %v4804_v45 = vsub.f32 %v7665_v21, %v7887_v53  ;;  %v4805_v15 = vsub.f32 %v7663_v46, %v7887_v53 }
 0x6e5   : > { %v4806_v41 = vsub.f32 %v7669_v23, %v7887_v53  ;;  %v4807_v1 = vsub.f32 %v7667_v51, %v7887_v53  ;;  %v4808_v49 = vsub.f32 %v7686_v11, %v7887_v53  ;;  %v4809_v20 = vsub.f32 %v7673_v22, %v7887_v53 }
 0x6e6   : > { %v4802_v52 = vsub.f32 %v4800_v7, %v4801_v61  ;;  %v4810_v33 = vsub.f32 %v7700_v2, %v7887_v53  ;;  %v4811_v21 = vsub.f32 %v7690_v24, %v7887_v53  ;;  %v4812_v46 = vsub.f32 %v7714_v27, %v7887_v53 }
 0x6e7   : > { %v4813_v23 = vsub.f32 %v7704_v44, %v7887_v53  ;;  %v4814_v51 = vsub.f32 %v7728_v6, %v7887_v53  ;;  %v4815_v11 = vsub.f32 %v7718_v55, %v7887_v53  ;;  %v4816_v22 = vsub.f32 %v7742_v58, %v7887_v53 }
 0x6e8   : > { %v4803_v43 = vmax.f32 %v4802_v52, 0.0  ;;  %v4817_v2 = vsub.f32 %v7732_v5, %v7887_v53  ;;  %v4818_v24 = vsub.f32 %v7756_v16, %v7887_v53  ;;  %v4819_v27 = vsub.f32 %v7746_v4, %v7887_v53 }
 0x6e9   : > { %v4820_v44 = vsub.f32 %v7770_v50, %v7887_v53  ;;  %v4821_v6 = vsub.f32 %v7760_v56, %v7887_v53  ;;  %v4822_v55 = vsub.f32 %v7784_v26, %v7887_v53  ;;  %v4823_v58 = vsub.f32 %v7774_v28, %v7887_v53 }
 0x6ea   : > { %v4836_v38 = vadd.f32 1e-05, %v4803_v43  ;;  %v4824_v5 = vsub.f32 %v7798_v19, %v7887_v53  ;;  %v4825_v16 = vsub.f32 %v7788_v57, %v7887_v53  ;;  %v4826_v4 = vsub.f32 %v7812_v60, %v7887_v53 }
 0x6eb   : > { %v4827_v50 = vsub.f32 %v7802_v35, %v7887_v53  ;;  %v4828_v56 = vsub.f32 %v7826_v36, %v7887_v53  ;;  %v4829_v26 = vsub.f32 %v7816_v48, %v7887_v53  ;;  %v4830_v28 = vsub.f32 %v7840_v54, %v7887_v53 }
 0x6ec   : > { %5276 = vrsqrt.f32 %v4836_v38  ;;  %v4831_v19 = vsub.f32 %v7830_v8, %v7887_v53  ;;  %v4832_v57 = vsub.f32 %v7854_v32, %v7887_v53  ;;  %v4833_v60 = vsub.f32 %v7848_v9, %v7887_v53 }
 0x6ed   : > { %v4834_v35 = vsub.f32 %v7874_v42, %v7887_v53  ;;  %v4835_v36 = vsub.f32 %v7870_v37, %v7887_v53 }
 0x6f9   : > { %v5277_v62 = vpop.eup %5276 }
 0x6fa   : > { %v4838_v48 = vmul.f32 %v5277_v62, %v4804_v45  ;;  %v4839_v59 = vmul.f32 %v5277_v62, %v4805_v15  ;;  %v4840_v63 = vmul.f32 %v5277_v62, %v4806_v41  ;;  %v4841_v54 = vmul.f32 %v5277_v62, %v4807_v1  ;;  %v8167_v15 = vld [vmem:[#allocation5_spill] sm:$0xff]  ;;  %v8168_v1 = vld [vmem:[#allocation7_spill] sm:$0xff] }
 0x6fb   : > { %v4842_v13 = vmul.f32 %v5277_v62, %v4808_v49  ;;  %v4843_v30 = vmul.f32 %v5277_v62, %v4809_v20  ;;  %v4844_v8 = vmul.f32 %v5277_v62, %v4810_v33  ;;  %v4845_v34 = vmul.f32 %v5277_v62, %v4811_v21  ;;  %v8169_v20 = vld [vmem:[#allocation4_spill] sm:$0xff]  ;;  %v8170_v21 = vld [vmem:[#allocation6_spill] sm:$0xff] }
 0x6fc   : > { %v4846_v18 = vmul.f32 %v5277_v62, %v4812_v46  ;;  %v4847_v12 = vmul.f32 %v5277_v62, %v4813_v23  ;;  %v4848_v32 = vmul.f32 %v5277_v62, %v4814_v51  ;;  %v4849_v14 = vmul.f32 %v5277_v62, %v4815_v11  ;;  %v8171_v23 = vld [vmem:[#allocation8_spill] sm:$0xff]  ;;  %v8172_v11 = vld [vmem:[#allocation9_spill] sm:$0xff] }
 0x6fd   : > { %v4850_v40 = vmul.f32 %v5277_v62, %v4816_v22  ;;  %v4851_v9 = vmul.f32 %v5277_v62, %v4817_v2  ;;  %v4852_v31 = vmul.f32 %v5277_v62, %v4818_v24  ;;  %v4853_v42 = vmul.f32 %v5277_v62, %v4819_v27  ;;  %v8173_v2 = vld [vmem:[#allocation10_spill] sm:$0xff]  ;;  %v8174_v27 = vld [vmem:[#allocation11_spill] sm:$0xff] }
 0x6fe   : > { %v4854_v3 = vmul.f32 %v5277_v62, %v4820_v44  ;;  %v4855_v0 = vmul.f32 %v5277_v62, %v4821_v6  ;;  %v4856_v37 = vmul.f32 %v5277_v62, %v4822_v55  ;;  %v4857_v25 = vmul.f32 %v5277_v62, %v4823_v58  ;;  %v8175_v6 = vld [vmem:[#allocation12_spill] sm:$0xff]  ;;  %v8176_v58 = vld [vmem:[#allocation13_spill] sm:$0xff] }
 0x6ff   : > { %v4858_v47 = vmul.f32 %v5277_v62, %v4824_v5  ;;  %v4859_v10 = vmul.f32 %v5277_v62, %v4825_v16  ;;  %v4860_v17 = vmul.f32 %v5277_v62, %v4826_v4  ;;  %v4861_v39 = vmul.f32 %v5277_v62, %v4827_v50  ;;  %v8177_v16 = vld [vmem:[#allocation14_spill] sm:$0xff]  ;;  %v8178_v50 = vld [vmem:[#allocation15_spill] sm:$0xff] }
 0x700   : > { %v4862_v29 = vmul.f32 %v5277_v62, %v4828_v56  ;;  %v4863_v53 = vmul.f32 %v5277_v62, %v4829_v26  ;;  %v4864_v7 = vmul.f32 %v5277_v62, %v4830_v28  ;;  %v4865_v61 = vmul.f32 %v5277_v62, %v4831_v19  ;;  %v8179_v26 = vld [vmem:[#allocation16_spill] sm:$0xff]  ;;  %v8180_v19 = vld [vmem:[#allocation17_spill] sm:$0xff] }
 0x701   : > { %v4866_v52 = vmul.f32 %v5277_v62, %v4832_v57  ;;  %v4867_v43 = vmul.f32 %v5277_v62, %v4833_v60  ;;  %v4868_v38 = vmul.f32 %v5277_v62, %v4834_v35  ;;  %v4869_v45 = vmul.f32 %v5277_v62, %v4835_v36  ;;  %v8181_v57 = vld [vmem:[#allocation18_spill] sm:$0xff]  ;;  %v8182_v35 = vld [vmem:[#allocation19_spill] sm:$0xff] }
 0x702   : > { %v4870_v41 = vadd.f32 %v4838_v48, %v8167_v15  ;;  %v4871_v49 = vadd.f32 %v4839_v59, %v8168_v1  ;;  %v4872_v33 = vadd.f32 %v4840_v63, %v8169_v20  ;;  %v4873_v46 = vadd.f32 %v4841_v54, %v8170_v21  ;;  %v8183_v48 = vld [vmem:[#allocation20_spill] sm:$0xff]  ;;  %v8184_v63 = vld [vmem:[#allocation21_spill] sm:$0xff] }
 0x703   : > { %v4874_v51 = vadd.f32 %v4842_v13, %v8171_v23  ;;  %v4875_v22 = vadd.f32 %v4843_v30, %v8172_v11  ;;  %v4876_v24 = vadd.f32 %v4844_v8, %v8173_v2  ;;  %v4877_v44 = vadd.f32 %v4845_v34, %v8174_v27  ;;  %v8185_v13 = vld [vmem:[#allocation22_spill] sm:$0xff]  ;;  %v8186_v8 = vld [vmem:[#allocation23_spill] sm:$0xff]  ;;  %v8196_v15 = vld [vmem:[#allocation33_spill] sm:$0xff] }
 0x704   : > { %v4878_v55 = vadd.f32 %v4846_v18, %v8175_v6  ;;  %v4879_v5 = vadd.f32 %v4847_v12, %v8176_v58  ;;  %v4880_v4 = vadd.f32 %v4848_v32, %v8177_v16  ;;  %v4881_v56 = vadd.f32 %v4849_v14, %v8178_v50  ;;  %4902 = vst.msk [vmem:[%s7960_s22] sm:$0xff] %vm204_vm0, %v4870_v41  ;;  %v8187_v18 = vld [vmem:[#allocation24_spill] sm:$0xff]  ;;  %v8188_v32 = vld [vmem:[#allocation25_spill] sm:$0xff]  ;;  %v8197_v41 = vld [vmem:[#allocation34_spill] sm:$0xff] }
 0x705   : > { %4903 = vst.msk [vmem:[%s7960_s22 + $0x8] sm:$0xff] %vm204_vm0, %v4871_v49  ;;  %4904 = vst.msk [vmem:[%s7960_s22 + $0x10] sm:$0xff] %vm204_vm0, %v4872_v33  ;;  %v4882_v28 = vadd.f32 %v4850_v40, %v8179_v26  ;;  %v4883_v62 = vadd.f32 %v4851_v9, %v8180_v19  ;;  %v4884_v60 = vadd.f32 %v4852_v31, %v8181_v57  ;;  %v8189_v40 = vld [vmem:[#allocation26_spill] sm:$0xff]  ;;  %v8190_v31 = vld [vmem:[#allocation27_spill] sm:$0xff] }
 0x706   : > { %4905 = vst.msk [vmem:[%s7960_s22 + $0x18] sm:$0xff] %vm204_vm0, %v4873_v46  ;;  %v4885_v36 = vadd.f32 %v4853_v42, %v8182_v35  ;;  %4906 = vst.msk [vmem:[%s7960_s22 + $0x20] sm:$0xff] %vm204_vm0, %v4874_v51  ;;  %v4886_v59 = vadd.f32 %v4854_v3, %v8183_v48  ;;  %v4887_v54 = vadd.f32 %v4855_v0, %v8184_v63  ;;  %v8191_v3 = vld [vmem:[#allocation28_spill] sm:$0xff] }
 0x707   : > { %4907 = vst.msk [vmem:[%s7960_s22 + $0x28] sm:$0xff] %vm204_vm0, %v4875_v22  ;;  %4908 = vst.msk [vmem:[%s7960_s22 + $0x30] sm:$0xff] %vm204_vm0, %v4876_v24  ;;  %v4888_v30 = vadd.f32 %v4856_v37, %v8185_v13  ;;  %v4889_v34 = vadd.f32 %v4857_v25, %v8186_v8  ;;  %v4890_v12 = vadd.f32 %v4858_v47, %v8187_v18  ;;  %v8192_v37 = vld [vmem:[#allocation29_spill] sm:$0xff]  ;;  %v8193_v47 = vld [vmem:[#allocation30_spill] sm:$0xff] }
 0x708   : > { %4909 = vst.msk [vmem:[%s7960_s22 + $0x38] sm:$0xff] %vm204_vm0, %v4877_v44  ;;  %4910 = vst.msk [vmem:[%s7960_s22 + $0x40] sm:$0xff] %vm204_vm0, %v4878_v55  ;;  %v4891_v14 = vadd.f32 %v4859_v10, %v8188_v32  ;;  %v4892_v9 = vadd.f32 %v4860_v17, %v8189_v40  ;;  %v4893_v42 = vadd.f32 %v4861_v39, %v8190_v31  ;;  %v8194_v17 = vld [vmem:[#allocation31_spill] sm:$0xff] }
 0x709   : > { %4911 = vst.msk [vmem:[%s7960_s22 + $0x48] sm:$0xff] %vm204_vm0, %v4879_v5  ;;  %4912 = vst.msk [vmem:[%s7960_s22 + $0x50] sm:$0xff] %vm204_vm0, %v4880_v4  ;;  %v4894_v0 = vadd.f32 %v4862_v29, %v8191_v3  ;;  %v4895_v25 = vadd.f32 %v4863_v53, %v8192_v37  ;;  %v4896_v10 = vadd.f32 %v4864_v7, %v8193_v47  ;;  %v8195_v29 = vld [vmem:[#allocation32_spill] sm:$0xff] }
 0x70a   : > { %4913 = vst.msk [vmem:[%s7960_s22 + $0x58] sm:$0xff] %vm204_vm0, %v4881_v56  ;;  %4914 = vst.msk [vmem:[%s7960_s22 + $0x60] sm:$0xff] %vm204_vm0, %v4882_v28  ;;  %v4897_v39 = vadd.f32 %v4865_v61, %v8194_v17  ;;  %v4898_v53 = vadd.f32 %v4866_v52, %v8195_v29  ;;  %v4899_v7 = vadd.f32 %v4867_v43, %v8196_v15  ;;  %v8198_v61 = vld [vmem:[#allocation37_spill] sm:$0xff] }
 0x70b   : > { %4915 = vst.msk [vmem:[%s7960_s22 + $0x68] sm:$0xff] %vm204_vm0, %v4883_v62  ;;  %4916 = vst.msk [vmem:[%s7960_s22 + $0x70] sm:$0xff] %vm204_vm0, %v4884_v60  ;;  %v4900_v1 = vadd.f32 %v4868_v38, %v8197_v41  ;;  %v4901_v49 = vadd.f32 %v4869_v45, %v8198_v61 }
 0x70c   : > { %4917 = vst.msk [vmem:[%s7960_s22 + $0x78] sm:$0xff] %vm204_vm0, %v4885_v36  ;;  %4918 = vst.msk [vmem:[%s7960_s22 + $0x80] sm:$0xff] %vm204_vm0, %v4886_v59 }
 0x70d   : > { %4919 = vst.msk [vmem:[%s7960_s22 + $0x88] sm:$0xff] %vm204_vm0, %v4887_v54  ;;  %4920 = vst.msk [vmem:[%s7960_s22 + $0x90] sm:$0xff] %vm204_vm0, %v4888_v30 }
 0x70e   : > { %4921 = vst.msk [vmem:[%s7960_s22 + $0x98] sm:$0xff] %vm204_vm0, %v4889_v34  ;;  %4922 = vst.msk [vmem:[%s7960_s22 + $0xa0] sm:$0xff] %vm204_vm0, %v4890_v12 }
 0x70f   : > { %4923 = vst.msk [vmem:[%s7960_s22 + $0xa8] sm:$0xff] %vm204_vm0, %v4891_v14  ;;  %4924 = vst.msk [vmem:[%s7960_s22 + $0xb0] sm:$0xff] %vm204_vm0, %v4892_v9 }
 0x710   : > { %4925 = vst.msk [vmem:[%s7960_s22 + $0xb8] sm:$0xff] %vm204_vm0, %v4893_v42  ;;  %4926 = vst.msk [vmem:[%s7960_s22 + $0xc0] sm:$0xff] %vm204_vm0, %v4894_v0 }
 0x711   : > { %4927 = vst.msk [vmem:[%s7960_s22 + $0xc8] sm:$0xff] %vm204_vm0, %v4895_v25  ;;  %4928 = vst.msk [vmem:[%s7960_s22 + $0xd0] sm:$0xff] %vm204_vm0, %v4896_v10 }
 0x712   : > { %4929 = vst.msk [vmem:[%s7960_s22 + $0xd8] sm:$0xff] %vm204_vm0, %v4897_v39  ;;  %4930 = vst.msk [vmem:[%s7960_s22 + $0xe0] sm:$0xff] %vm204_vm0, %v4898_v53 }
 0x713   : > { %4931 = vst.msk [vmem:[%s7960_s22 + $0xe8] sm:$0xff] %vm204_vm0, %v4899_v7  ;;  %4932 = vst.msk [vmem:[%s7960_s22 + $0xf0] sm:$0xff] %vm204_vm0, %v4900_v1 }
 0x714   : > { %4933 = vst.msk [vmem:[%s7960_s22 + $0xf8] sm:$0xff] %vm204_vm0, %v4901_v49 }
 0x715 PF: > { %s13_s12 = sadd.s32 1, %s5284_s12  }
 0x716   : > { %p10_p4 = scmp.ge.s32.totalorder %s13_s12, 4  }
 0x718   :  { %12 = sbr.rel (!%p10_p4) target bundleno = 1 (0x1), region = 65 }

</bundles_post_ra>
